<compile_context>
chip_gen: v6e
topology: v6e:2x2x1
jax: 0.10.0
libtpu: 0.0.40
codegen_flags: <defaults>
</compile_context>

<pallas_src>
import functools

import jax
import jax.numpy as jnp
from jax import lax
from jax.experimental import pallas as pl
from jax.experimental.pallas import tpu as pltpu

LN_EPS = 1e-5
NEG_INF = -1e30  # PyTorch uses -inf; fully-masked rows here give a uniform
                 # distribution instead of NaN (degenerate case only).


def _layer_norm(x, w, b):
    mean = jnp.mean(x, axis=-1, keepdims=True)
    c = x - mean
    var = jnp.mean(c * c, axis=-1, keepdims=True)
    return c * lax.rsqrt(var + LN_EPS) * w + b


def _mha(xq_bf, xkv_bf, key_bias, wq_t, bq, wkv_t, bkv, wo_t, bo,
         num_heads, return_weights):
    """Multi-head cross attention for one batch element.

    xq_bf:    (Sq, Eq)   bf16 normalized queries
    xkv_bf:   (Skv, Ekv) bf16 normalized keys/values
    key_bias: (1, Skv)   f32 additive key-padding bias (0 keep / NEG_INF pad)
    Returns (attn_out (Sq,Eq) f32, head-averaged probs (Sq,Skv) f32 or None).
    """
    sq = xq_bf.shape[0]
    skv = xkv_bf.shape[0]
    eq = wq_t.shape[1]
    dh = eq // num_heads

    # Q and fused K/V projections (1/sqrt(dh) already folded into wq_t / bq).
    q = jnp.dot(xq_bf, wq_t, preferred_element_type=jnp.float32) + bq
    kv = jnp.dot(xkv_bf, wkv_t, preferred_element_type=jnp.float32) + bkv
    q_bf = q.astype(jnp.bfloat16)
    kv_bf = kv.astype(jnp.bfloat16)

    bias = jnp.broadcast_to(key_bias, (sq, skv))          # hoisted once

    ctx_heads = []
    wacc = jnp.zeros((sq, skv), jnp.float32) if return_weights else None
    for h in range(num_heads):                            # static head loop
        qh = q_bf[:, h * dh:(h + 1) * dh]
        kh = kv_bf[:, h * dh:(h + 1) * dh]
        vh = kv_bf[:, eq + h * dh:eq + (h + 1) * dh]
        s = lax.dot_general(qh, kh, (((1,), (1,)), ((), ())),
                            preferred_element_type=jnp.float32) + bias
        s = s - jnp.max(s, axis=-1, keepdims=True)
        e = jnp.exp(s)
        p = e * pl.reciprocal(jnp.sum(e, axis=-1, keepdims=True), approx=True)
        ctx_heads.append(jnp.dot(p.astype(jnp.bfloat16), vh,
                                 preferred_element_type=jnp.float32))
        if return_weights:
            wacc = wacc + p

    # Single output projection, hoisted out of the head loop.
    ctx = jnp.concatenate(ctx_heads, axis=-1).astype(jnp.bfloat16)  # (Sq, Eq)
    out = jnp.dot(ctx, wo_t, preferred_element_type=jnp.float32) + bo
    if return_weights:
        return out, wacc * (1.0 / num_heads)   # average_attn_weights=True
    return out, None


def _ffn_block(e, ln_w, ln_b, w1_t, b1, w2_t, b2):
    x = _layer_norm(e, ln_w, ln_b).astype(jnp.bfloat16)
    h = jnp.maximum(jnp.dot(x, w1_t, preferred_element_type=jnp.float32) + b1,
                    0.0)
    y = jnp.dot(h.astype(jnp.bfloat16), w2_t,
                preferred_element_type=jnp.float32) + b2
    return e + y          # embed + dropout(ff(x)), dropout = identity (eval)


def fused_kernel(num_heads, return_weights,
                 x1_ref, x2_ref, m1_ref, m2_ref,
                 ln1_w_ref, ln1_b_ref, ln2_w_ref, ln2_b_ref,
                 a12_wq_ref, a12_bq_ref, a12_wkv_ref, a12_bkv_ref,
                 a12_wo_ref, a12_bo_ref,
                 a21_wq_ref, a21_bq_ref, a21_wkv_ref, a21_bkv_ref,
                 a21_wo_ref, a21_bo_ref,
                 ff1_lnw_ref, ff1_lnb_ref, ff1_w1_ref, ff1_b1_ref,
                 ff1_w2_ref, ff1_b2_ref,
                 ff2_lnw_ref, ff2_lnb_ref, ff2_w1_ref, ff2_b1_ref,
                 ff2_w2_ref, ff2_b2_ref,
                 out1_ref, out2_ref, *attn_w_refs):
    x1 = x1_ref[0]                                   # (S1, E1) f32
    x2 = x2_ref[0]                                   # (S2, E2) f32

    # Pre-attention LayerNorms, computed once and shared by both directions.
    x1n = _layer_norm(x1, ln1_w_ref[...], ln1_b_ref[...])
    x2n = _layer_norm(x2, ln2_w_ref[...], ln2_b_ref[...])
    x1n_bf = x1n.astype(jnp.bfloat16)
    x2n_bf = x2n.astype(jnp.bfloat16)

    # key_padding_mask = ~mask  ->  additive bias (0 keep / NEG_INF padded)
    bias1 = jnp.where(m1_ref[0] > 0.5, 0.0, NEG_INF).astype(jnp.float32)
    bias2 = jnp.where(m2_ref[0] > 0.5, 0.0, NEG_INF).astype(jnp.float32)

    attn1, w1 = _mha(x1n_bf, x2n_bf, bias2,
                     a12_wq_ref[...], a12_bq_ref[...],
                     a12_wkv_ref[...], a12_bkv_ref[...],
                     a12_wo_ref[...], a12_bo_ref[...],
                     num_heads, return_weights)
    attn2, w2 = _mha(x2n_bf, x1n_bf, bias1,
                     a21_wq_ref[...], a21_bq_ref[...],
                     a21_wkv_ref[...], a21_bkv_ref[...],
                     a21_wo_ref[...], a21_bo_ref[...],
                     num_heads, return_weights)

    e1 = x1 + attn1              # embed + dropout(attn), dropout = identity
    e2 = x2 + attn2
    out1_ref[0] = _ffn_block(e1, ff1_lnw_ref[...], ff1_lnb_ref[...],
                             ff1_w1_ref[...], ff1_b1_ref[...],
                             ff1_w2_ref[...], ff1_b2_ref[...])
    out2_ref[0] = _ffn_block(e2, ff2_lnw_ref[...], ff2_lnb_ref[...],
                             ff2_w1_ref[...], ff2_b1_ref[...],
                             ff2_w2_ref[...], ff2_b2_ref[...])

    if return_weights:
        aw1_ref, aw2_ref = attn_w_refs
        aw1_ref[0] = w1
        aw2_ref[0] = w2


# ---------------------------------------------------------------------------
# Host-side parameter preparation (one time, outside the hot path)
# ---------------------------------------------------------------------------
def prepare_params(p, num_heads):
    """Transpose Linear weights to (in, out), fuse K/V projections, fold the
    1/sqrt(head_dim) query scale into Wq/bq, and cast matmul weights to bf16
    (biases / LN params stay f32 for f32 elementwise math)."""
    def attn(a):
        eq = a["wq"].shape[0]
        scale = 1.0 / float(eq // num_heads) ** 0.5
        return dict(
            wq_t=(a["wq"].T * scale).astype(jnp.bfloat16),
            bq=(a["bq"] * scale).astype(jnp.float32),
            wkv_t=jnp.concatenate([a["wk"].T, a["wv"].T],
                                  axis=1).astype(jnp.bfloat16),
            bkv=jnp.concatenate([a["bk"], a["bv"]],
                                axis=1).astype(jnp.float32),
            wo_t=a["wo"].T.astype(jnp.bfloat16),
            bo=a["bo"].astype(jnp.float32))

    def ff(f):
        return dict(ln_w=f["ln_w"], ln_b=f["ln_b"],
                    w1_t=f["w1"].T.astype(jnp.bfloat16), b1=f["b1"],
                    w2_t=f["w2"].T.astype(jnp.bfloat16), b2=f["b2"])

    return dict(ln1_w=p["ln1_w"], ln1_b=p["ln1_b"],
                ln2_w=p["ln2_w"], ln2_b=p["ln2_b"],
                a12=attn(p["attn12"]), a21=attn(p["attn21"]),
                ff1=ff(p["ff1"]), ff2=ff(p["ff2"]))


def cross_attention_module_forward(embed_1, embed_2, mask1, mask2, params,
                                   num_heads, return_weights=True):
    """Equivalent to CrossAttentionModule.forward(...) with
    include_residual_stream=True, in eval mode (dropout = identity).
    `params` must come from prepare_params()."""
    B, S1, E1 = embed_1.shape
    _, S2, E2 = embed_2.shape

    x1 = embed_1.astype(jnp.float32)
    x2 = embed_2.astype(jnp.float32)
    m1 = mask1.astype(jnp.float32).reshape(B, 1, S1)
    m2 = mask2.astype(jnp.float32).reshape(B, 1, S2)

    p = params
    weights = (
        p["ln1_w"], p["ln1_b"], p["ln2_w"], p["ln2_b"],
        p["a12"]["wq_t"], p["a12"]["bq"], p["a12"]["wkv_t"], p["a12"]["bkv"],
        p["a12"]["wo_t"], p["a12"]["bo"],
        p["a21"]["wq_t"], p["a21"]["bq"], p["a21"]["wkv_t"], p["a21"]["bkv"],
        p["a21"]["wo_t"], p["a21"]["bo"],
        p["ff1"]["ln_w"], p["ff1"]["ln_b"], p["ff1"]["w1_t"], p["ff1"]["b1"],
        p["ff1"]["w2_t"], p["ff1"]["b2"],
        p["ff2"]["ln_w"], p["ff2"]["ln_b"], p["ff2"]["w1_t"], p["ff2"]["b1"],
        p["ff2"]["w2_t"], p["ff2"]["b2"],
    )

    def batch_spec(s, e):
        # One batch element per grid step (blocked operands default to VMEM).
        return pl.BlockSpec((1, s, e), lambda b: (b, 0, 0))

    def const_spec(arr):
        # Full-block, constant index_map: DMA'd once, resident across steps.
        return pl.BlockSpec(arr.shape, lambda b: (0, 0))

    in_specs = [batch_spec(S1, E1), batch_spec(S2, E2),
                batch_spec(1, S1), batch_spec(1, S2)]
    in_specs += [const_spec(w) for w in weights]

    out_shape = [jax.ShapeDtypeStruct((B, S1, E1), jnp.float32),
                 jax.ShapeDtypeStruct((B, S2, E2), jnp.float32)]
    out_specs = [batch_spec(S1, E1), batch_spec(S2, E2)]
    if return_weights:
        out_shape += [jax.ShapeDtypeStruct((B, S1, S2), jnp.float32),
                      jax.ShapeDtypeStruct((B, S2, S1), jnp.float32)]
        out_specs += [batch_spec(S1, S2), batch_spec(S2, S1)]

    kernel = functools.partial(fused_kernel, num_heads, return_weights)

    res = pl.pallas_call(
        kernel,
        out_shape=tuple(out_shape),
        grid_spec=pltpu.PrefetchScalarGridSpec(
            num_scalar_prefetch=0,
            grid=(B,),
            in_specs=in_specs,
            out_specs=tuple(out_specs)),
        compiler_params=pltpu.CompilerParams(
            dimension_semantics=("parallel",),   # v7x: 2 TCs split the batch
            vmem_limit_bytes=32 * 1024 * 1024),
    )(x1, x2, m1, m2, *weights)

    if return_weights:
        return res[0], res[1], (res[2], res[3])
    return res[0], res[1]


# ---------------------------------------------------------------------------
# Deterministic parameter init (shapes match the nn.Module __init__,
# PyTorch Linear convention: W is (out, in))
# ---------------------------------------------------------------------------
def init_params(key, e1, e2, ff_scale=2):
    ks = iter(jax.random.split(key, 32))

    def w(shape, scale=0.05):
        return jax.random.normal(next(ks), shape, jnp.float32) * scale

    return dict(
        # pre-attention LayerNorms (PyTorch default: weight=1, bias=0)
        ln1_w=jnp.ones((1, e1), jnp.float32), ln1_b=jnp.zeros((1, e1), jnp.float32),
        ln2_w=jnp.ones((1, e2), jnp.float32), ln2_b=jnp.zeros((1, e2), jnp.float32),
        attn12=dict(  # embed1_to_2: query dim e1, key/value dim e2
            wq=w((e1, e1)), wk=w((e1, e2)), wv=w((e1, e2)),
            bq=w((1, e1)), bk=w((1, e1)), bv=w((1, e1)),
            wo=w((e1, e1)), bo=w((1, e1))),
        attn21=dict(  # embed2_to_1: query dim e2, key/value dim e1
            wq=w((e2, e2)), wk=w((e2, e1)), wv=w((e2, e1)),
            bq=w((1, e2)), bk=w((1, e2)), bv=w((1, e2)),
            wo=w((e2, e2)), bo=w((1, e2))),
        ff1=dict(
            ln_w=jnp.ones((1, e1), jnp.float32), ln_b=jnp.zeros((1, e1), jnp.float32),
            w1=w((e1 * ff_scale, e1)), b1=w((1, e1 * ff_scale)),
            w2=w((e1, e1 * ff_scale)), b2=w((1, e1))),
        ff2=dict(
            ln_w=jnp.ones((1, e2), jnp.float32), ln_b=jnp.zeros((1, e2), jnp.float32),
            w1=w((e2 * ff_scale, e2)), b1=w((1, e2 * ff_scale)),
            w2=w((e2, e2 * ff_scale)), b2=w((1, e2))),
    )


if __name__ == "__main__":
    B, S1, S2 = 2, 8, 16
    E1, E2, H = 32, 64, 4

    key = jax.random.PRNGKey(0)
    k_e1, k_e2, k_p = jax.random.split(key, 3)

    embed_1 = jax.random.normal(k_e1, (B, S1, E1), jnp.float32)
    embed_2 = jax.random.normal(k_e2, (B, S2, E2), jnp.float32)

    # masks: True = real element (the opposite is used as key_padding_mask)
    len1 = jnp.array([S1, 5])
    len2 = jnp.array([S2, 10])
    mask1 = jnp.arange(S1)[None, :] < len1[:, None]   # (B, S1) bool
    mask2 = jnp.arange(S2)[None, :] < len2[:, None]   # (B, S2) bool

    params = prepare_params(init_params(k_p, E1, E2), num_heads=H)

    fwd = jax.jit(functools.partial(cross_attention_module_forward,
                                    num_heads=H, return_weights=True))
    e1_out, e2_out, (aw1, aw2) = fwd(embed_1, embed_2, mask1, mask2, params)
    jax.block_until_ready((e1_out, e2_out, aw1, aw2))

    assert e1_out.shape == (B, S1, E1)
    assert e2_out.shape == (B, S2, E2)
    assert aw1.shape == (B, S1, S2)
    assert aw2.shape == (B, S2, S1)
    assert bool(jnp.all(jnp.isfinite(e1_out))) and bool(jnp.all(jnp.isfinite(e2_out)))
    assert bool(jnp.all(jnp.isfinite(aw1))) and bool(jnp.all(jnp.isfinite(aw2)))

    # weights-free inference path (skips all attention-weight compute/stores)
    e1_nw, e2_nw = cross_attention_module_forward(
        embed_1, embed_2, mask1, mask2, params, num_heads=H,
        return_weights=False)
    jax.block_until_ready((e1_nw, e2_nw))
    assert e1_nw.shape == (B, S1, E1) and e2_nw.shape == (B, S2, E2)

    print("KERNEL_OK")
</pallas_src>

<mosaic_0001>
module attributes {stable_mosaic.version = 11 : i64} {
  func.func @fused_kernel(%arg0: i32, %arg1: memref<1x8x32xf32, #tpu.memory_space<vmem>>, %arg2: memref<1x16x64xf32, #tpu.memory_space<vmem>>, %arg3: memref<1x1x8xf32, #tpu.memory_space<vmem>>, %arg4: memref<1x1x16xf32, #tpu.memory_space<vmem>>, %arg5: memref<1x32xf32, #tpu.memory_space<vmem>>, %arg6: memref<1x32xf32, #tpu.memory_space<vmem>>, %arg7: memref<1x64xf32, #tpu.memory_space<vmem>>, %arg8: memref<1x64xf32, #tpu.memory_space<vmem>>, %arg9: memref<32x32xbf16, #tpu.memory_space<vmem>>, %arg10: memref<1x32xf32, #tpu.memory_space<vmem>>, %arg11: memref<64x64xbf16, #tpu.memory_space<vmem>>, %arg12: memref<1x64xf32, #tpu.memory_space<vmem>>, %arg13: memref<32x32xbf16, #tpu.memory_space<vmem>>, %arg14: memref<1x32xf32, #tpu.memory_space<vmem>>, %arg15: memref<64x64xbf16, #tpu.memory_space<vmem>>, %arg16: memref<1x64xf32, #tpu.memory_space<vmem>>, %arg17: memref<32x128xbf16, #tpu.memory_space<vmem>>, %arg18: memref<1x128xf32, #tpu.memory_space<vmem>>, %arg19: memref<64x64xbf16, #tpu.memory_space<vmem>>, %arg20: memref<1x64xf32, #tpu.memory_space<vmem>>, %arg21: memref<1x32xf32, #tpu.memory_space<vmem>>, %arg22: memref<1x32xf32, #tpu.memory_space<vmem>>, %arg23: memref<32x64xbf16, #tpu.memory_space<vmem>>, %arg24: memref<1x64xf32, #tpu.memory_space<vmem>>, %arg25: memref<64x32xbf16, #tpu.memory_space<vmem>>, %arg26: memref<1x32xf32, #tpu.memory_space<vmem>>, %arg27: memref<1x64xf32, #tpu.memory_space<vmem>>, %arg28: memref<1x64xf32, #tpu.memory_space<vmem>>, %arg29: memref<64x128xbf16, #tpu.memory_space<vmem>>, %arg30: memref<1x128xf32, #tpu.memory_space<vmem>>, %arg31: memref<128x64xbf16, #tpu.memory_space<vmem>>, %arg32: memref<1x64xf32, #tpu.memory_space<vmem>>, %arg33: memref<1x8x32xf32, #tpu.memory_space<vmem>>, %arg34: memref<1x16x64xf32, #tpu.memory_space<vmem>>, %arg35: memref<1x8x16xf32, #tpu.memory_space<vmem>>, %arg36: memref<1x16x8xf32, #tpu.memory_space<vmem>>) attributes {dimension_semantics = [#tpu.dimension_semantics<parallel>], iteration_bounds = array<i64: 2>, scalar_prefetch = 0 : i64, scratch_operands = 0 : i64, tpu.core_type = #tpu.core_type<tc>, window_params = [{transform_indices = @transform_0, window_bounds = array<i64: 1, 8, 32>}, {transform_indices = @transform_1, window_bounds = array<i64: 1, 16, 64>}, {transform_indices = @transform_2, window_bounds = array<i64: 1, 1, 8>}, {transform_indices = @transform_3, window_bounds = array<i64: 1, 1, 16>}, {pipeline_mode = #tpu.pipeline_mode<synchronous>, transform_indices = @transform_4, window_bounds = array<i64: 1, 32>}, {pipeline_mode = #tpu.pipeline_mode<synchronous>, transform_indices = @transform_5, window_bounds = array<i64: 1, 32>}, {pipeline_mode = #tpu.pipeline_mode<synchronous>, transform_indices = @transform_6, window_bounds = array<i64: 1, 64>}, {pipeline_mode = #tpu.pipeline_mode<synchronous>, transform_indices = @transform_7, window_bounds = array<i64: 1, 64>}, {pipeline_mode = #tpu.pipeline_mode<synchronous>, transform_indices = @transform_8, window_bounds = array<i64: 32, 32>}, {pipeline_mode = #tpu.pipeline_mode<synchronous>, transform_indices = @transform_9, window_bounds = array<i64: 1, 32>}, {pipeline_mode = #tpu.pipeline_mode<synchronous>, transform_indices = @transform_10, window_bounds = array<i64: 64, 64>}, {pipeline_mode = #tpu.pipeline_mode<synchronous>, transform_indices = @transform_11, window_bounds = array<i64: 1, 64>}, {pipeline_mode = #tpu.pipeline_mode<synchronous>, transform_indices = @transform_12, window_bounds = array<i64: 32, 32>}, {pipeline_mode = #tpu.pipeline_mode<synchronous>, transform_indices = @transform_13, window_bounds = array<i64: 1, 32>}, {pipeline_mode = #tpu.pipeline_mode<synchronous>, transform_indices = @transform_14, window_bounds = array<i64: 64, 64>}, {pipeline_mode = #tpu.pipeline_mode<synchronous>, transform_indices = @transform_15, window_bounds = array<i64: 1, 64>}, {pipeline_mode = #tpu.pipeline_mode<synchronous>, transform_indices = @transform_16, window_bounds = array<i64: 32, 128>}, {pipeline_mode = #tpu.pipeline_mode<synchronous>, transform_indices = @transform_17, window_bounds = array<i64: 1, 128>}, {pipeline_mode = #tpu.pipeline_mode<synchronous>, transform_indices = @transform_18, window_bounds = array<i64: 64, 64>}, {pipeline_mode = #tpu.pipeline_mode<synchronous>, transform_indices = @transform_19, window_bounds = array<i64: 1, 64>}, {pipeline_mode = #tpu.pipeline_mode<synchronous>, transform_indices = @transform_20, window_bounds = array<i64: 1, 32>}, {pipeline_mode = #tpu.pipeline_mode<synchronous>, transform_indices = @transform_21, window_bounds = array<i64: 1, 32>}, {pipeline_mode = #tpu.pipeline_mode<synchronous>, transform_indices = @transform_22, window_bounds = array<i64: 32, 64>}, {pipeline_mode = #tpu.pipeline_mode<synchronous>, transform_indices = @transform_23, window_bounds = array<i64: 1, 64>}, {pipeline_mode = #tpu.pipeline_mode<synchronous>, transform_indices = @transform_24, window_bounds = array<i64: 64, 32>}, {pipeline_mode = #tpu.pipeline_mode<synchronous>, transform_indices = @transform_25, window_bounds = array<i64: 1, 32>}, {pipeline_mode = #tpu.pipeline_mode<synchronous>, transform_indices = @transform_26, window_bounds = array<i64: 1, 64>}, {pipeline_mode = #tpu.pipeline_mode<synchronous>, transform_indices = @transform_27, window_bounds = array<i64: 1, 64>}, {pipeline_mode = #tpu.pipeline_mode<synchronous>, transform_indices = @transform_28, window_bounds = array<i64: 64, 128>}, {pipeline_mode = #tpu.pipeline_mode<synchronous>, transform_indices = @transform_29, window_bounds = array<i64: 1, 128>}, {pipeline_mode = #tpu.pipeline_mode<synchronous>, transform_indices = @transform_30, window_bounds = array<i64: 128, 64>}, {pipeline_mode = #tpu.pipeline_mode<synchronous>, transform_indices = @transform_31, window_bounds = array<i64: 1, 64>}, {transform_indices = @transform_32, window_bounds = array<i64: 1, 8, 32>}, {transform_indices = @transform_33, window_bounds = array<i64: 1, 16, 64>}, {transform_indices = @transform_34, window_bounds = array<i64: 1, 8, 16>}, {transform_indices = @transform_35, window_bounds = array<i64: 1, 16, 8>}]} {
    %c0 = arith.constant 0 : index
    %c0_0 = arith.constant 0 : index
    %c0_1 = arith.constant 0 : index
    %0 = vector.load %arg1[%c0, %c0_0, %c0_1] : memref<1x8x32xf32, #tpu.memory_space<vmem>>, vector<1x8x32xf32>
    %1 = vector.shape_cast %0 : vector<1x8x32xf32> to vector<8x32xf32>
    %c0_2 = arith.constant 0 : index
    %c0_3 = arith.constant 0 : index
    %c0_4 = arith.constant 0 : index
    %2 = vector.load %arg2[%c0_2, %c0_3, %c0_4] : memref<1x16x64xf32, #tpu.memory_space<vmem>>, vector<1x16x64xf32>
    %3 = vector.shape_cast %2 : vector<1x16x64xf32> to vector<16x64xf32>
    %c0_5 = arith.constant 0 : index
    %c0_6 = arith.constant 0 : index
    %4 = vector.load %arg5[%c0_5, %c0_6] : memref<1x32xf32, #tpu.memory_space<vmem>>, vector<1x32xf32>
    %c0_7 = arith.constant 0 : index
    %c0_8 = arith.constant 0 : index
    %5 = vector.load %arg6[%c0_7, %c0_8] : memref<1x32xf32, #tpu.memory_space<vmem>>, vector<1x32xf32>
    %cst = arith.constant dense<0.000000e+00> : vector<8xf32>
    %6 = vector.multi_reduction <add>, %1, %cst [1] : vector<8x32xf32> to vector<8xf32>
    %7 = vector.shape_cast %6 : vector<8xf32> to vector<8x1xf32>
    %cst_9 = arith.constant 3.200000e+01 : f32
    %8 = vector.broadcast %cst_9 : f32 to vector<8x1xf32>
    %9 = arith.divf %7, %8 : vector<8x1xf32>
    %10 = vector.broadcast %9 : vector<8x1xf32> to vector<8x32xf32>
    %11 = arith.subf %1, %10 : vector<8x32xf32>
    %12 = arith.mulf %11, %11 : vector<8x32xf32>
    %cst_10 = arith.constant dense<0.000000e+00> : vector<8xf32>
    %13 = vector.multi_reduction <add>, %12, %cst_10 [1] : vector<8x32xf32> to vector<8xf32>
    %14 = vector.shape_cast %13 : vector<8xf32> to vector<8x1xf32>
    %cst_11 = arith.constant 3.200000e+01 : f32
    %15 = vector.broadcast %cst_11 : f32 to vector<8x1xf32>
    %16 = arith.divf %14, %15 : vector<8x1xf32>
    %cst_12 = arith.constant 9.99999974E-6 : f32
    %17 = vector.broadcast %cst_12 : f32 to vector<8x1xf32>
    %18 = arith.addf %16, %17 : vector<8x1xf32>
    %19 = math.rsqrt %18 : vector<8x1xf32>
    %20 = vector.broadcast %19 : vector<8x1xf32> to vector<8x32xf32>
    %21 = arith.mulf %11, %20 : vector<8x32xf32>
    %22 = vector.broadcast %4 : vector<1x32xf32> to vector<8x32xf32>
    %23 = arith.mulf %21, %22 : vector<8x32xf32>
    %24 = vector.broadcast %5 : vector<1x32xf32> to vector<8x32xf32>
    %25 = arith.addf %23, %24 : vector<8x32xf32>
    %c0_13 = arith.constant 0 : index
    %c0_14 = arith.constant 0 : index
    %26 = vector.load %arg7[%c0_13, %c0_14] : memref<1x64xf32, #tpu.memory_space<vmem>>, vector<1x64xf32>
    %c0_15 = arith.constant 0 : index
    %c0_16 = arith.constant 0 : index
    %27 = vector.load %arg8[%c0_15, %c0_16] : memref<1x64xf32, #tpu.memory_space<vmem>>, vector<1x64xf32>
    %cst_17 = arith.constant dense<0.000000e+00> : vector<16xf32>
    %28 = vector.multi_reduction <add>, %3, %cst_17 [1] : vector<16x64xf32> to vector<16xf32>
    %29 = vector.shape_cast %28 : vector<16xf32> to vector<16x1xf32>
    %cst_18 = arith.constant 6.400000e+01 : f32
    %30 = vector.broadcast %cst_18 : f32 to vector<16x1xf32>
    %31 = arith.divf %29, %30 : vector<16x1xf32>
    %32 = vector.broadcast %31 : vector<16x1xf32> to vector<16x64xf32>
    %33 = arith.subf %3, %32 : vector<16x64xf32>
    %34 = arith.mulf %33, %33 : vector<16x64xf32>
    %cst_19 = arith.constant dense<0.000000e+00> : vector<16xf32>
    %35 = vector.multi_reduction <add>, %34, %cst_19 [1] : vector<16x64xf32> to vector<16xf32>
    %36 = vector.shape_cast %35 : vector<16xf32> to vector<16x1xf32>
    %cst_20 = arith.constant 6.400000e+01 : f32
    %37 = vector.broadcast %cst_20 : f32 to vector<16x1xf32>
    %38 = arith.divf %36, %37 : vector<16x1xf32>
    %cst_21 = arith.constant 9.99999974E-6 : f32
    %39 = vector.broadcast %cst_21 : f32 to vector<16x1xf32>
    %40 = arith.addf %38, %39 : vector<16x1xf32>
    %41 = math.rsqrt %40 : vector<16x1xf32>
    %42 = vector.broadcast %41 : vector<16x1xf32> to vector<16x64xf32>
    %43 = arith.mulf %33, %42 : vector<16x64xf32>
    %44 = vector.broadcast %26 : vector<1x64xf32> to vector<16x64xf32>
    %45 = arith.mulf %43, %44 : vector<16x64xf32>
    %46 = vector.broadcast %27 : vector<1x64xf32> to vector<16x64xf32>
    %47 = arith.addf %45, %46 : vector<16x64xf32>
    %48 = arith.truncf %25 : vector<8x32xf32> to vector<8x32xbf16>
    %49 = arith.truncf %47 : vector<16x64xf32> to vector<16x64xbf16>
    %c0_22 = arith.constant 0 : index
    %c0_23 = arith.constant 0 : index
    %c0_24 = arith.constant 0 : index
    %50 = vector.load %arg3[%c0_22, %c0_23, %c0_24] : memref<1x1x8xf32, #tpu.memory_space<vmem>>, vector<1x1x8xf32>
    %51 = vector.shape_cast %50 : vector<1x1x8xf32> to vector<1x8xf32>
    %cst_25 = arith.constant 5.000000e-01 : f32
    %52 = vector.broadcast %cst_25 : f32 to vector<1x8xf32>
    %53 = arith.cmpf ogt, %51, %52 : vector<1x8xf32>
    %cst_26 = arith.constant 0.000000e+00 : f32
    %cst_27 = arith.constant -1.000000e+30 : f32
    %54 = vector.broadcast %cst_26 : f32 to vector<1x8xf32>
    %55 = vector.broadcast %cst_27 : f32 to vector<1x8xf32>
    %56 = arith.select %53, %54, %55 : vector<1x8xi1>, vector<1x8xf32>
    %c0_28 = arith.constant 0 : index
    %c0_29 = arith.constant 0 : index
    %c0_30 = arith.constant 0 : index
    %57 = vector.load %arg4[%c0_28, %c0_29, %c0_30] : memref<1x1x16xf32, #tpu.memory_space<vmem>>, vector<1x1x16xf32>
    %58 = vector.shape_cast %57 : vector<1x1x16xf32> to vector<1x16xf32>
    %cst_31 = arith.constant 5.000000e-01 : f32
    %59 = vector.broadcast %cst_31 : f32 to vector<1x16xf32>
    %60 = arith.cmpf ogt, %58, %59 : vector<1x16xf32>
    %cst_32 = arith.constant 0.000000e+00 : f32
    %cst_33 = arith.constant -1.000000e+30 : f32
    %61 = vector.broadcast %cst_32 : f32 to vector<1x16xf32>
    %62 = vector.broadcast %cst_33 : f32 to vector<1x16xf32>
    %63 = arith.select %60, %61, %62 : vector<1x16xi1>, vector<1x16xf32>
    %c0_34 = arith.constant 0 : index
    %c0_35 = arith.constant 0 : index
    %64 = vector.load %arg9[%c0_34, %c0_35] : memref<32x32xbf16, #tpu.memory_space<vmem>>, vector<32x32xbf16>
    %c0_36 = arith.constant 0 : index
    %c0_37 = arith.constant 0 : index
    %65 = vector.load %arg10[%c0_36, %c0_37] : memref<1x32xf32, #tpu.memory_space<vmem>>, vector<1x32xf32>
    %c0_38 = arith.constant 0 : index
    %c0_39 = arith.constant 0 : index
    %66 = vector.load %arg11[%c0_38, %c0_39] : memref<64x64xbf16, #tpu.memory_space<vmem>>, vector<64x64xbf16>
    %c0_40 = arith.constant 0 : index
    %c0_41 = arith.constant 0 : index
    %67 = vector.load %arg12[%c0_40, %c0_41] : memref<1x64xf32, #tpu.memory_space<vmem>>, vector<1x64xf32>
    %c0_42 = arith.constant 0 : index
    %c0_43 = arith.constant 0 : index
    %68 = vector.load %arg13[%c0_42, %c0_43] : memref<32x32xbf16, #tpu.memory_space<vmem>>, vector<32x32xbf16>
    %c0_44 = arith.constant 0 : index
    %c0_45 = arith.constant 0 : index
    %69 = vector.load %arg14[%c0_44, %c0_45] : memref<1x32xf32, #tpu.memory_space<vmem>>, vector<1x32xf32>
    %cst_46 = arith.constant dense<0.000000e+00> : vector<8x32xf32>
    %70 = tpu.matmul %48, %64, %cst_46 {dimension_numbers = #tpu.dot_dimension_numbers<[1], [0], [0], [1], [0, 0, 1, 1], [], []>} : vector<8x32xbf16>, vector<32x32xbf16>, vector<8x32xf32> -> vector<8x32xf32>
    %71 = vector.broadcast %65 : vector<1x32xf32> to vector<8x32xf32>
    %72 = arith.addf %70, %71 : vector<8x32xf32>
    %cst_47 = arith.constant dense<0.000000e+00> : vector<16x64xf32>
    %73 = tpu.matmul %49, %66, %cst_47 {dimension_numbers = #tpu.dot_dimension_numbers<[1], [0], [0], [1], [0, 0, 1, 1], [], []>} : vector<16x64xbf16>, vector<64x64xbf16>, vector<16x64xf32> -> vector<16x64xf32>
    %74 = vector.broadcast %67 : vector<1x64xf32> to vector<16x64xf32>
    %75 = arith.addf %73, %74 : vector<16x64xf32>
    %76 = arith.truncf %72 : vector<8x32xf32> to vector<8x32xbf16>
    %77 = arith.truncf %75 : vector<16x64xf32> to vector<16x64xbf16>
    %78 = vector.shape_cast %63 : vector<1x16xf32> to vector<1x16xf32>
    %79 = vector.broadcast %78 : vector<1x16xf32> to vector<8x16xf32>
    %cst_48 = arith.constant 0.000000e+00 : f32
    %80 = vector.broadcast %cst_48 : f32 to vector<8x16xf32>
    %81 = vector.extract_strided_slice %76 {offsets = [0, 0], sizes = [8, 8], strides = [1, 1]} : vector<8x32xbf16> to vector<8x8xbf16>
    %82 = vector.extract_strided_slice %77 {offsets = [0, 0], sizes = [16, 8], strides = [1, 1]} : vector<16x64xbf16> to vector<16x8xbf16>
    %83 = vector.extract_strided_slice %77 {offsets = [0, 32], sizes = [16, 8], strides = [1, 1]} : vector<16x64xbf16> to vector<16x8xbf16>
    %cst_49 = arith.constant dense<0.000000e+00> : vector<8x16xf32>
    %84 = tpu.matmul %81, %82, %cst_49 {dimension_numbers = #tpu.dot_dimension_numbers<[1], [1], [0], [0], [0, 0, 1, 0], [], []>} : vector<8x8xbf16>, vector<16x8xbf16>, vector<8x16xf32> -> vector<8x16xf32>
    %85 = arith.addf %84, %79 : vector<8x16xf32>
    %cst_50 = arith.constant dense<0xFF800000> : vector<8xf32>
    %86 = vector.multi_reduction <maximumf>, %85, %cst_50 [1] : vector<8x16xf32> to vector<8xf32>
    %87 = vector.shape_cast %86 : vector<8xf32> to vector<8x1xf32>
    %88 = vector.broadcast %87 : vector<8x1xf32> to vector<8x16xf32>
    %89 = arith.subf %85, %88 : vector<8x16xf32>
    %90 = math.exp %89 : vector<8x16xf32>
    %cst_51 = arith.constant dense<0.000000e+00> : vector<8xf32>
    %91 = vector.multi_reduction <add>, %90, %cst_51 [1] : vector<8x16xf32> to vector<8xf32>
    %92 = vector.shape_cast %91 : vector<8xf32> to vector<8x1xf32>
    %93 = tpu.reciprocal %92 {approx = true} : vector<8x1xf32> -> vector<8x1xf32>
    %94 = vector.broadcast %93 : vector<8x1xf32> to vector<8x16xf32>
    %95 = arith.mulf %90, %94 : vector<8x16xf32>
    %96 = arith.truncf %95 : vector<8x16xf32> to vector<8x16xbf16>
    %cst_52 = arith.constant dense<0.000000e+00> : vector<8x8xf32>
    %97 = tpu.matmul %96, %83, %cst_52 {dimension_numbers = #tpu.dot_dimension_numbers<[1], [0], [0], [1], [0, 0, 1, 1], [], []>} : vector<8x16xbf16>, vector<16x8xbf16>, vector<8x8xf32> -> vector<8x8xf32>
    %98 = arith.addf %80, %95 : vector<8x16xf32>
    %99 = vector.extract_strided_slice %76 {offsets = [0, 8], sizes = [8, 8], strides = [1, 1]} : vector<8x32xbf16> to vector<8x8xbf16>
    %100 = vector.extract_strided_slice %77 {offsets = [0, 8], sizes = [16, 8], strides = [1, 1]} : vector<16x64xbf16> to vector<16x8xbf16>
    %101 = vector.extract_strided_slice %77 {offsets = [0, 40], sizes = [16, 8], strides = [1, 1]} : vector<16x64xbf16> to vector<16x8xbf16>
    %cst_53 = arith.constant dense<0.000000e+00> : vector<8x16xf32>
    %102 = tpu.matmul %99, %100, %cst_53 {dimension_numbers = #tpu.dot_dimension_numbers<[1], [1], [0], [0], [0, 0, 1, 0], [], []>} : vector<8x8xbf16>, vector<16x8xbf16>, vector<8x16xf32> -> vector<8x16xf32>
    %103 = arith.addf %102, %79 : vector<8x16xf32>
    %cst_54 = arith.constant dense<0xFF800000> : vector<8xf32>
    %104 = vector.multi_reduction <maximumf>, %103, %cst_54 [1] : vector<8x16xf32> to vector<8xf32>
    %105 = vector.shape_cast %104 : vector<8xf32> to vector<8x1xf32>
    %106 = vector.broadcast %105 : vector<8x1xf32> to vector<8x16xf32>
    %107 = arith.subf %103, %106 : vector<8x16xf32>
    %108 = math.exp %107 : vector<8x16xf32>
    %cst_55 = arith.constant dense<0.000000e+00> : vector<8xf32>
    %109 = vector.multi_reduction <add>, %108, %cst_55 [1] : vector<8x16xf32> to vector<8xf32>
    %110 = vector.shape_cast %109 : vector<8xf32> to vector<8x1xf32>
    %111 = tpu.reciprocal %110 {approx = true} : vector<8x1xf32> -> vector<8x1xf32>
    %112 = vector.broadcast %111 : vector<8x1xf32> to vector<8x16xf32>
    %113 = arith.mulf %108, %112 : vector<8x16xf32>
    %114 = arith.truncf %113 : vector<8x16xf32> to vector<8x16xbf16>
    %cst_56 = arith.constant dense<0.000000e+00> : vector<8x8xf32>
    %115 = tpu.matmul %114, %101, %cst_56 {dimension_numbers = #tpu.dot_dimension_numbers<[1], [0], [0], [1], [0, 0, 1, 1], [], []>} : vector<8x16xbf16>, vector<16x8xbf16>, vector<8x8xf32> -> vector<8x8xf32>
    %116 = arith.addf %98, %113 : vector<8x16xf32>
    %117 = vector.extract_strided_slice %76 {offsets = [0, 16], sizes = [8, 8], strides = [1, 1]} : vector<8x32xbf16> to vector<8x8xbf16>
    %118 = vector.extract_strided_slice %77 {offsets = [0, 16], sizes = [16, 8], strides = [1, 1]} : vector<16x64xbf16> to vector<16x8xbf16>
    %119 = vector.extract_strided_slice %77 {offsets = [0, 48], sizes = [16, 8], strides = [1, 1]} : vector<16x64xbf16> to vector<16x8xbf16>
    %cst_57 = arith.constant dense<0.000000e+00> : vector<8x16xf32>
    %120 = tpu.matmul %117, %118, %cst_57 {dimension_numbers = #tpu.dot_dimension_numbers<[1], [1], [0], [0], [0, 0, 1, 0], [], []>} : vector<8x8xbf16>, vector<16x8xbf16>, vector<8x16xf32> -> vector<8x16xf32>
    %121 = arith.addf %120, %79 : vector<8x16xf32>
    %cst_58 = arith.constant dense<0xFF800000> : vector<8xf32>
    %122 = vector.multi_reduction <maximumf>, %121, %cst_58 [1] : vector<8x16xf32> to vector<8xf32>
    %123 = vector.shape_cast %122 : vector<8xf32> to vector<8x1xf32>
    %124 = vector.broadcast %123 : vector<8x1xf32> to vector<8x16xf32>
    %125 = arith.subf %121, %124 : vector<8x16xf32>
    %126 = math.exp %125 : vector<8x16xf32>
    %cst_59 = arith.constant dense<0.000000e+00> : vector<8xf32>
    %127 = vector.multi_reduction <add>, %126, %cst_59 [1] : vector<8x16xf32> to vector<8xf32>
    %128 = vector.shape_cast %127 : vector<8xf32> to vector<8x1xf32>
    %129 = tpu.reciprocal %128 {approx = true} : vector<8x1xf32> -> vector<8x1xf32>
    %130 = vector.broadcast %129 : vector<8x1xf32> to vector<8x16xf32>
    %131 = arith.mulf %126, %130 : vector<8x16xf32>
    %132 = arith.truncf %131 : vector<8x16xf32> to vector<8x16xbf16>
    %cst_60 = arith.constant dense<0.000000e+00> : vector<8x8xf32>
    %133 = tpu.matmul %132, %119, %cst_60 {dimension_numbers = #tpu.dot_dimension_numbers<[1], [0], [0], [1], [0, 0, 1, 1], [], []>} : vector<8x16xbf16>, vector<16x8xbf16>, vector<8x8xf32> -> vector<8x8xf32>
    %134 = arith.addf %116, %131 : vector<8x16xf32>
    %135 = vector.extract_strided_slice %76 {offsets = [0, 24], sizes = [8, 8], strides = [1, 1]} : vector<8x32xbf16> to vector<8x8xbf16>
    %136 = vector.extract_strided_slice %77 {offsets = [0, 24], sizes = [16, 8], strides = [1, 1]} : vector<16x64xbf16> to vector<16x8xbf16>
    %137 = vector.extract_strided_slice %77 {offsets = [0, 56], sizes = [16, 8], strides = [1, 1]} : vector<16x64xbf16> to vector<16x8xbf16>
    %cst_61 = arith.constant dense<0.000000e+00> : vector<8x16xf32>
    %138 = tpu.matmul %135, %136, %cst_61 {dimension_numbers = #tpu.dot_dimension_numbers<[1], [1], [0], [0], [0, 0, 1, 0], [], []>} : vector<8x8xbf16>, vector<16x8xbf16>, vector<8x16xf32> -> vector<8x16xf32>
    %139 = arith.addf %138, %79 : vector<8x16xf32>
    %cst_62 = arith.constant dense<0xFF800000> : vector<8xf32>
    %140 = vector.multi_reduction <maximumf>, %139, %cst_62 [1] : vector<8x16xf32> to vector<8xf32>
    %141 = vector.shape_cast %140 : vector<8xf32> to vector<8x1xf32>
    %142 = vector.broadcast %141 : vector<8x1xf32> to vector<8x16xf32>
    %143 = arith.subf %139, %142 : vector<8x16xf32>
    %144 = math.exp %143 : vector<8x16xf32>
    %cst_63 = arith.constant dense<0.000000e+00> : vector<8xf32>
    %145 = vector.multi_reduction <add>, %144, %cst_63 [1] : vector<8x16xf32> to vector<8xf32>
    %146 = vector.shape_cast %145 : vector<8xf32> to vector<8x1xf32>
    %147 = tpu.reciprocal %146 {approx = true} : vector<8x1xf32> -> vector<8x1xf32>
    %148 = vector.broadcast %147 : vector<8x1xf32> to vector<8x16xf32>
    %149 = arith.mulf %144, %148 : vector<8x16xf32>
    %150 = arith.truncf %149 : vector<8x16xf32> to vector<8x16xbf16>
    %cst_64 = arith.constant dense<0.000000e+00> : vector<8x8xf32>
    %151 = tpu.matmul %150, %137, %cst_64 {dimension_numbers = #tpu.dot_dimension_numbers<[1], [0], [0], [1], [0, 0, 1, 1], [], []>} : vector<8x16xbf16>, vector<16x8xbf16>, vector<8x8xf32> -> vector<8x8xf32>
    %152 = arith.addf %134, %149 : vector<8x16xf32>
    %153 = tpu.concatenate %97, %115, %133, %151 in 1 : vector<8x8xf32>, vector<8x8xf32>, vector<8x8xf32>, vector<8x8xf32> -> vector<8x32xf32>
    %154 = arith.truncf %153 : vector<8x32xf32> to vector<8x32xbf16>
    %cst_65 = arith.constant dense<0.000000e+00> : vector<8x32xf32>
    %155 = tpu.matmul %154, %68, %cst_65 {dimension_numbers = #tpu.dot_dimension_numbers<[1], [0], [0], [1], [0, 0, 1, 1], [], []>} : vector<8x32xbf16>, vector<32x32xbf16>, vector<8x32xf32> -> vector<8x32xf32>
    %156 = vector.broadcast %69 : vector<1x32xf32> to vector<8x32xf32>
    %157 = arith.addf %155, %156 : vector<8x32xf32>
    %cst_66 = arith.constant 2.500000e-01 : f32
    %158 = vector.broadcast %cst_66 : f32 to vector<8x16xf32>
    %159 = arith.mulf %152, %158 : vector<8x16xf32>
    %c0_67 = arith.constant 0 : index
    %c0_68 = arith.constant 0 : index
    %160 = vector.load %arg15[%c0_67, %c0_68] : memref<64x64xbf16, #tpu.memory_space<vmem>>, vector<64x64xbf16>
    %c0_69 = arith.constant 0 : index
    %c0_70 = arith.constant 0 : index
    %161 = vector.load %arg16[%c0_69, %c0_70] : memref<1x64xf32, #tpu.memory_space<vmem>>, vector<1x64xf32>
    %c0_71 = arith.constant 0 : index
    %c0_72 = arith.constant 0 : index
    %162 = vector.load %arg17[%c0_71, %c0_72] : memref<32x128xbf16, #tpu.memory_space<vmem>>, vector<32x128xbf16>
    %c0_73 = arith.constant 0 : index
    %c0_74 = arith.constant 0 : index
    %163 = vector.load %arg18[%c0_73, %c0_74] : memref<1x128xf32, #tpu.memory_space<vmem>>, vector<1x128xf32>
    %c0_75 = arith.constant 0 : index
    %c0_76 = arith.constant 0 : index
    %164 = vector.load %arg19[%c0_75, %c0_76] : memref<64x64xbf16, #tpu.memory_space<vmem>>, vector<64x64xbf16>
    %c0_77 = arith.constant 0 : index
    %c0_78 = arith.constant 0 : index
    %165 = vector.load %arg20[%c0_77, %c0_78] : memref<1x64xf32, #tpu.memory_space<vmem>>, vector<1x64xf32>
    %cst_79 = arith.constant dense<0.000000e+00> : vector<16x64xf32>
    %166 = tpu.matmul %49, %160, %cst_79 {dimension_numbers = #tpu.dot_dimension_numbers<[1], [0], [0], [1], [0, 0, 1, 1], [], []>} : vector<16x64xbf16>, vector<64x64xbf16>, vector<16x64xf32> -> vector<16x64xf32>
    %167 = vector.broadcast %161 : vector<1x64xf32> to vector<16x64xf32>
    %168 = arith.addf %166, %167 : vector<16x64xf32>
    %cst_80 = arith.constant dense<0.000000e+00> : vector<8x128xf32>
    %169 = tpu.matmul %48, %162, %cst_80 {dimension_numbers = #tpu.dot_dimension_numbers<[1], [0], [0], [1], [0, 0, 1, 1], [], []>} : vector<8x32xbf16>, vector<32x128xbf16>, vector<8x128xf32> -> vector<8x128xf32>
    %170 = vector.broadcast %163 : vector<1x128xf32> to vector<8x128xf32>
    %171 = arith.addf %169, %170 : vector<8x128xf32>
    %172 = arith.truncf %168 : vector<16x64xf32> to vector<16x64xbf16>
    %173 = arith.truncf %171 : vector<8x128xf32> to vector<8x128xbf16>
    %174 = vector.shape_cast %56 : vector<1x8xf32> to vector<1x8xf32>
    %175 = vector.broadcast %174 : vector<1x8xf32> to vector<16x8xf32>
    %cst_81 = arith.constant 0.000000e+00 : f32
    %176 = vector.broadcast %cst_81 : f32 to vector<16x8xf32>
    %177 = vector.extract_strided_slice %172 {offsets = [0, 0], sizes = [16, 16], strides = [1, 1]} : vector<16x64xbf16> to vector<16x16xbf16>
    %178 = vector.extract_strided_slice %173 {offsets = [0, 0], sizes = [8, 16], strides = [1, 1]} : vector<8x128xbf16> to vector<8x16xbf16>
    %179 = vector.extract_strided_slice %173 {offsets = [0, 64], sizes = [8, 16], strides = [1, 1]} : vector<8x128xbf16> to vector<8x16xbf16>
    %cst_82 = arith.constant dense<0.000000e+00> : vector<16x8xf32>
    %180 = tpu.matmul %177, %178, %cst_82 {dimension_numbers = #tpu.dot_dimension_numbers<[1], [1], [0], [0], [0, 0, 1, 0], [], []>} : vector<16x16xbf16>, vector<8x16xbf16>, vector<16x8xf32> -> vector<16x8xf32>
    %181 = arith.addf %180, %175 : vector<16x8xf32>
    %cst_83 = arith.constant dense<0xFF800000> : vector<16xf32>
    %182 = vector.multi_reduction <maximumf>, %181, %cst_83 [1] : vector<16x8xf32> to vector<16xf32>
    %183 = vector.shape_cast %182 : vector<16xf32> to vector<16x1xf32>
    %184 = vector.broadcast %183 : vector<16x1xf32> to vector<16x8xf32>
    %185 = arith.subf %181, %184 : vector<16x8xf32>
    %186 = math.exp %185 : vector<16x8xf32>
    %cst_84 = arith.constant dense<0.000000e+00> : vector<16xf32>
    %187 = vector.multi_reduction <add>, %186, %cst_84 [1] : vector<16x8xf32> to vector<16xf32>
    %188 = vector.shape_cast %187 : vector<16xf32> to vector<16x1xf32>
    %189 = tpu.reciprocal %188 {approx = true} : vector<16x1xf32> -> vector<16x1xf32>
    %190 = vector.broadcast %189 : vector<16x1xf32> to vector<16x8xf32>
    %191 = arith.mulf %186, %190 : vector<16x8xf32>
    %192 = arith.truncf %191 : vector<16x8xf32> to vector<16x8xbf16>
    %cst_85 = arith.constant dense<0.000000e+00> : vector<16x16xf32>
    %193 = tpu.matmul %192, %179, %cst_85 {dimension_numbers = #tpu.dot_dimension_numbers<[1], [0], [0], [1], [0, 0, 1, 1], [], []>} : vector<16x8xbf16>, vector<8x16xbf16>, vector<16x16xf32> -> vector<16x16xf32>
    %194 = arith.addf %176, %191 : vector<16x8xf32>
    %195 = vector.extract_strided_slice %172 {offsets = [0, 16], sizes = [16, 16], strides = [1, 1]} : vector<16x64xbf16> to vector<16x16xbf16>
    %196 = vector.extract_strided_slice %173 {offsets = [0, 16], sizes = [8, 16], strides = [1, 1]} : vector<8x128xbf16> to vector<8x16xbf16>
    %197 = vector.extract_strided_slice %173 {offsets = [0, 80], sizes = [8, 16], strides = [1, 1]} : vector<8x128xbf16> to vector<8x16xbf16>
    %cst_86 = arith.constant dense<0.000000e+00> : vector<16x8xf32>
    %198 = tpu.matmul %195, %196, %cst_86 {dimension_numbers = #tpu.dot_dimension_numbers<[1], [1], [0], [0], [0, 0, 1, 0], [], []>} : vector<16x16xbf16>, vector<8x16xbf16>, vector<16x8xf32> -> vector<16x8xf32>
    %199 = arith.addf %198, %175 : vector<16x8xf32>
    %cst_87 = arith.constant dense<0xFF800000> : vector<16xf32>
    %200 = vector.multi_reduction <maximumf>, %199, %cst_87 [1] : vector<16x8xf32> to vector<16xf32>
    %201 = vector.shape_cast %200 : vector<16xf32> to vector<16x1xf32>
    %202 = vector.broadcast %201 : vector<16x1xf32> to vector<16x8xf32>
    %203 = arith.subf %199, %202 : vector<16x8xf32>
    %204 = math.exp %203 : vector<16x8xf32>
    %cst_88 = arith.constant dense<0.000000e+00> : vector<16xf32>
    %205 = vector.multi_reduction <add>, %204, %cst_88 [1] : vector<16x8xf32> to vector<16xf32>
    %206 = vector.shape_cast %205 : vector<16xf32> to vector<16x1xf32>
    %207 = tpu.reciprocal %206 {approx = true} : vector<16x1xf32> -> vector<16x1xf32>
    %208 = vector.broadcast %207 : vector<16x1xf32> to vector<16x8xf32>
    %209 = arith.mulf %204, %208 : vector<16x8xf32>
    %210 = arith.truncf %209 : vector<16x8xf32> to vector<16x8xbf16>
    %cst_89 = arith.constant dense<0.000000e+00> : vector<16x16xf32>
    %211 = tpu.matmul %210, %197, %cst_89 {dimension_numbers = #tpu.dot_dimension_numbers<[1], [0], [0], [1], [0, 0, 1, 1], [], []>} : vector<16x8xbf16>, vector<8x16xbf16>, vector<16x16xf32> -> vector<16x16xf32>
    %212 = arith.addf %194, %209 : vector<16x8xf32>
    %213 = vector.extract_strided_slice %172 {offsets = [0, 32], sizes = [16, 16], strides = [1, 1]} : vector<16x64xbf16> to vector<16x16xbf16>
    %214 = vector.extract_strided_slice %173 {offsets = [0, 32], sizes = [8, 16], strides = [1, 1]} : vector<8x128xbf16> to vector<8x16xbf16>
    %215 = vector.extract_strided_slice %173 {offsets = [0, 96], sizes = [8, 16], strides = [1, 1]} : vector<8x128xbf16> to vector<8x16xbf16>
    %cst_90 = arith.constant dense<0.000000e+00> : vector<16x8xf32>
    %216 = tpu.matmul %213, %214, %cst_90 {dimension_numbers = #tpu.dot_dimension_numbers<[1], [1], [0], [0], [0, 0, 1, 0], [], []>} : vector<16x16xbf16>, vector<8x16xbf16>, vector<16x8xf32> -> vector<16x8xf32>
    %217 = arith.addf %216, %175 : vector<16x8xf32>
    %cst_91 = arith.constant dense<0xFF800000> : vector<16xf32>
    %218 = vector.multi_reduction <maximumf>, %217, %cst_91 [1] : vector<16x8xf32> to vector<16xf32>
    %219 = vector.shape_cast %218 : vector<16xf32> to vector<16x1xf32>
    %220 = vector.broadcast %219 : vector<16x1xf32> to vector<16x8xf32>
    %221 = arith.subf %217, %220 : vector<16x8xf32>
    %222 = math.exp %221 : vector<16x8xf32>
    %cst_92 = arith.constant dense<0.000000e+00> : vector<16xf32>
    %223 = vector.multi_reduction <add>, %222, %cst_92 [1] : vector<16x8xf32> to vector<16xf32>
    %224 = vector.shape_cast %223 : vector<16xf32> to vector<16x1xf32>
    %225 = tpu.reciprocal %224 {approx = true} : vector<16x1xf32> -> vector<16x1xf32>
    %226 = vector.broadcast %225 : vector<16x1xf32> to vector<16x8xf32>
    %227 = arith.mulf %222, %226 : vector<16x8xf32>
    %228 = arith.truncf %227 : vector<16x8xf32> to vector<16x8xbf16>
    %cst_93 = arith.constant dense<0.000000e+00> : vector<16x16xf32>
    %229 = tpu.matmul %228, %215, %cst_93 {dimension_numbers = #tpu.dot_dimension_numbers<[1], [0], [0], [1], [0, 0, 1, 1], [], []>} : vector<16x8xbf16>, vector<8x16xbf16>, vector<16x16xf32> -> vector<16x16xf32>
    %230 = arith.addf %212, %227 : vector<16x8xf32>
    %231 = vector.extract_strided_slice %172 {offsets = [0, 48], sizes = [16, 16], strides = [1, 1]} : vector<16x64xbf16> to vector<16x16xbf16>
    %232 = vector.extract_strided_slice %173 {offsets = [0, 48], sizes = [8, 16], strides = [1, 1]} : vector<8x128xbf16> to vector<8x16xbf16>
    %233 = vector.extract_strided_slice %173 {offsets = [0, 112], sizes = [8, 16], strides = [1, 1]} : vector<8x128xbf16> to vector<8x16xbf16>
    %cst_94 = arith.constant dense<0.000000e+00> : vector<16x8xf32>
    %234 = tpu.matmul %231, %232, %cst_94 {dimension_numbers = #tpu.dot_dimension_numbers<[1], [1], [0], [0], [0, 0, 1, 0], [], []>} : vector<16x16xbf16>, vector<8x16xbf16>, vector<16x8xf32> -> vector<16x8xf32>
    %235 = arith.addf %234, %175 : vector<16x8xf32>
    %cst_95 = arith.constant dense<0xFF800000> : vector<16xf32>
    %236 = vector.multi_reduction <maximumf>, %235, %cst_95 [1] : vector<16x8xf32> to vector<16xf32>
    %237 = vector.shape_cast %236 : vector<16xf32> to vector<16x1xf32>
    %238 = vector.broadcast %237 : vector<16x1xf32> to vector<16x8xf32>
    %239 = arith.subf %235, %238 : vector<16x8xf32>
    %240 = math.exp %239 : vector<16x8xf32>
    %cst_96 = arith.constant dense<0.000000e+00> : vector<16xf32>
    %241 = vector.multi_reduction <add>, %240, %cst_96 [1] : vector<16x8xf32> to vector<16xf32>
    %242 = vector.shape_cast %241 : vector<16xf32> to vector<16x1xf32>
    %243 = tpu.reciprocal %242 {approx = true} : vector<16x1xf32> -> vector<16x1xf32>
    %244 = vector.broadcast %243 : vector<16x1xf32> to vector<16x8xf32>
    %245 = arith.mulf %240, %244 : vector<16x8xf32>
    %246 = arith.truncf %245 : vector<16x8xf32> to vector<16x8xbf16>
    %cst_97 = arith.constant dense<0.000000e+00> : vector<16x16xf32>
    %247 = tpu.matmul %246, %233, %cst_97 {dimension_numbers = #tpu.dot_dimension_numbers<[1], [0], [0], [1], [0, 0, 1, 1], [], []>} : vector<16x8xbf16>, vector<8x16xbf16>, vector<16x16xf32> -> vector<16x16xf32>
    %248 = arith.addf %230, %245 : vector<16x8xf32>
    %249 = tpu.concatenate %193, %211, %229, %247 in 1 : vector<16x16xf32>, vector<16x16xf32>, vector<16x16xf32>, vector<16x16xf32> -> vector<16x64xf32>
    %250 = arith.truncf %249 : vector<16x64xf32> to vector<16x64xbf16>
    %cst_98 = arith.constant dense<0.000000e+00> : vector<16x64xf32>
    %251 = tpu.matmul %250, %164, %cst_98 {dimension_numbers = #tpu.dot_dimension_numbers<[1], [0], [0], [1], [0, 0, 1, 1], [], []>} : vector<16x64xbf16>, vector<64x64xbf16>, vector<16x64xf32> -> vector<16x64xf32>
    %252 = vector.broadcast %165 : vector<1x64xf32> to vector<16x64xf32>
    %253 = arith.addf %251, %252 : vector<16x64xf32>
    %cst_99 = arith.constant 2.500000e-01 : f32
    %254 = vector.broadcast %cst_99 : f32 to vector<16x8xf32>
    %255 = arith.mulf %248, %254 : vector<16x8xf32>
    %256 = arith.addf %1, %157 : vector<8x32xf32>
    %257 = arith.addf %3, %253 : vector<16x64xf32>
    %c0_100 = arith.constant 0 : index
    %c0_101 = arith.constant 0 : index
    %258 = vector.load %arg21[%c0_100, %c0_101] : memref<1x32xf32, #tpu.memory_space<vmem>>, vector<1x32xf32>
    %c0_102 = arith.constant 0 : index
    %c0_103 = arith.constant 0 : index
    %259 = vector.load %arg22[%c0_102, %c0_103] : memref<1x32xf32, #tpu.memory_space<vmem>>, vector<1x32xf32>
    %c0_104 = arith.constant 0 : index
    %c0_105 = arith.constant 0 : index
    %260 = vector.load %arg23[%c0_104, %c0_105] : memref<32x64xbf16, #tpu.memory_space<vmem>>, vector<32x64xbf16>
    %c0_106 = arith.constant 0 : index
    %c0_107 = arith.constant 0 : index
    %261 = vector.load %arg24[%c0_106, %c0_107] : memref<1x64xf32, #tpu.memory_space<vmem>>, vector<1x64xf32>
    %c0_108 = arith.constant 0 : index
    %c0_109 = arith.constant 0 : index
    %262 = vector.load %arg25[%c0_108, %c0_109] : memref<64x32xbf16, #tpu.memory_space<vmem>>, vector<64x32xbf16>
    %c0_110 = arith.constant 0 : index
    %c0_111 = arith.constant 0 : index
    %263 = vector.load %arg26[%c0_110, %c0_111] : memref<1x32xf32, #tpu.memory_space<vmem>>, vector<1x32xf32>
    %cst_112 = arith.constant dense<0.000000e+00> : vector<8xf32>
    %264 = vector.multi_reduction <add>, %256, %cst_112 [1] : vector<8x32xf32> to vector<8xf32>
    %265 = vector.shape_cast %264 : vector<8xf32> to vector<8x1xf32>
    %cst_113 = arith.constant 3.200000e+01 : f32
    %266 = vector.broadcast %cst_113 : f32 to vector<8x1xf32>
    %267 = arith.divf %265, %266 : vector<8x1xf32>
    %268 = vector.broadcast %267 : vector<8x1xf32> to vector<8x32xf32>
    %269 = arith.subf %256, %268 : vector<8x32xf32>
    %270 = arith.mulf %269, %269 : vector<8x32xf32>
    %cst_114 = arith.constant dense<0.000000e+00> : vector<8xf32>
    %271 = vector.multi_reduction <add>, %270, %cst_114 [1] : vector<8x32xf32> to vector<8xf32>
    %272 = vector.shape_cast %271 : vector<8xf32> to vector<8x1xf32>
    %cst_115 = arith.constant 3.200000e+01 : f32
    %273 = vector.broadcast %cst_115 : f32 to vector<8x1xf32>
    %274 = arith.divf %272, %273 : vector<8x1xf32>
    %cst_116 = arith.constant 9.99999974E-6 : f32
    %275 = vector.broadcast %cst_116 : f32 to vector<8x1xf32>
    %276 = arith.addf %274, %275 : vector<8x1xf32>
    %277 = math.rsqrt %276 : vector<8x1xf32>
    %278 = vector.broadcast %277 : vector<8x1xf32> to vector<8x32xf32>
    %279 = arith.mulf %269, %278 : vector<8x32xf32>
    %280 = vector.broadcast %258 : vector<1x32xf32> to vector<8x32xf32>
    %281 = arith.mulf %279, %280 : vector<8x32xf32>
    %282 = vector.broadcast %259 : vector<1x32xf32> to vector<8x32xf32>
    %283 = arith.addf %281, %282 : vector<8x32xf32>
    %284 = arith.truncf %283 : vector<8x32xf32> to vector<8x32xbf16>
    %cst_117 = arith.constant dense<0.000000e+00> : vector<8x64xf32>
    %285 = tpu.matmul %284, %260, %cst_117 {dimension_numbers = #tpu.dot_dimension_numbers<[1], [0], [0], [1], [0, 0, 1, 1], [], []>} : vector<8x32xbf16>, vector<32x64xbf16>, vector<8x64xf32> -> vector<8x64xf32>
    %286 = vector.broadcast %261 : vector<1x64xf32> to vector<8x64xf32>
    %287 = arith.addf %285, %286 : vector<8x64xf32>
    %cst_118 = arith.constant 0.000000e+00 : f32
    %288 = vector.broadcast %cst_118 : f32 to vector<8x64xf32>
    %289 = arith.maximumf %287, %288 : vector<8x64xf32>
    %290 = arith.truncf %289 : vector<8x64xf32> to vector<8x64xbf16>
    %cst_119 = arith.constant dense<0.000000e+00> : vector<8x32xf32>
    %291 = tpu.matmul %290, %262, %cst_119 {dimension_numbers = #tpu.dot_dimension_numbers<[1], [0], [0], [1], [0, 0, 1, 1], [], []>} : vector<8x64xbf16>, vector<64x32xbf16>, vector<8x32xf32> -> vector<8x32xf32>
    %292 = vector.broadcast %263 : vector<1x32xf32> to vector<8x32xf32>
    %293 = arith.addf %291, %292 : vector<8x32xf32>
    %294 = arith.addf %256, %293 : vector<8x32xf32>
    %c0_120 = arith.constant 0 : index
    %c0_121 = arith.constant 0 : index
    %c0_122 = arith.constant 0 : index
    %295 = vector.load %arg33[%c0_120, %c0_121, %c0_122] : memref<1x8x32xf32, #tpu.memory_space<vmem>>, vector<1x8x32xf32>
    %296 = vector.shape_cast %295 : vector<1x8x32xf32> to vector<8x32xf32>
    %297 = vector.shape_cast %294 : vector<8x32xf32> to vector<1x8x32xf32>
    tpu.vector_store %arg33[%c0_120, %c0_121, %c0_122], %297 {strides = array<i32>} : memref<1x8x32xf32, #tpu.memory_space<vmem>>, vector<1x8x32xf32>,
    %c0_123 = arith.constant 0 : index
    %c0_124 = arith.constant 0 : index
    %298 = vector.load %arg27[%c0_123, %c0_124] : memref<1x64xf32, #tpu.memory_space<vmem>>, vector<1x64xf32>
    %c0_125 = arith.constant 0 : index
    %c0_126 = arith.constant 0 : index
    %299 = vector.load %arg28[%c0_125, %c0_126] : memref<1x64xf32, #tpu.memory_space<vmem>>, vector<1x64xf32>
    %c0_127 = arith.constant 0 : index
    %c0_128 = arith.constant 0 : index
    %300 = vector.load %arg29[%c0_127, %c0_128] : memref<64x128xbf16, #tpu.memory_space<vmem>>, vector<64x128xbf16>
    %c0_129 = arith.constant 0 : index
    %c0_130 = arith.constant 0 : index
    %301 = vector.load %arg30[%c0_129, %c0_130] : memref<1x128xf32, #tpu.memory_space<vmem>>, vector<1x128xf32>
    %c0_131 = arith.constant 0 : index
    %c0_132 = arith.constant 0 : index
    %302 = vector.load %arg31[%c0_131, %c0_132] : memref<128x64xbf16, #tpu.memory_space<vmem>>, vector<128x64xbf16>
    %c0_133 = arith.constant 0 : index
    %c0_134 = arith.constant 0 : index
    %303 = vector.load %arg32[%c0_133, %c0_134] : memref<1x64xf32, #tpu.memory_space<vmem>>, vector<1x64xf32>
    %cst_135 = arith.constant dense<0.000000e+00> : vector<16xf32>
    %304 = vector.multi_reduction <add>, %257, %cst_135 [1] : vector<16x64xf32> to vector<16xf32>
    %305 = vector.shape_cast %304 : vector<16xf32> to vector<16x1xf32>
    %cst_136 = arith.constant 6.400000e+01 : f32
    %306 = vector.broadcast %cst_136 : f32 to vector<16x1xf32>
    %307 = arith.divf %305, %306 : vector<16x1xf32>
    %308 = vector.broadcast %307 : vector<16x1xf32> to vector<16x64xf32>
    %309 = arith.subf %257, %308 : vector<16x64xf32>
    %310 = arith.mulf %309, %309 : vector<16x64xf32>
    %cst_137 = arith.constant dense<0.000000e+00> : vector<16xf32>
    %311 = vector.multi_reduction <add>, %310, %cst_137 [1] : vector<16x64xf32> to vector<16xf32>
    %312 = vector.shape_cast %311 : vector<16xf32> to vector<16x1xf32>
    %cst_138 = arith.constant 6.400000e+01 : f32
    %313 = vector.broadcast %cst_138 : f32 to vector<16x1xf32>
    %314 = arith.divf %312, %313 : vector<16x1xf32>
    %cst_139 = arith.constant 9.99999974E-6 : f32
    %315 = vector.broadcast %cst_139 : f32 to vector<16x1xf32>
    %316 = arith.addf %314, %315 : vector<16x1xf32>
    %317 = math.rsqrt %316 : vector<16x1xf32>
    %318 = vector.broadcast %317 : vector<16x1xf32> to vector<16x64xf32>
    %319 = arith.mulf %309, %318 : vector<16x64xf32>
    %320 = vector.broadcast %298 : vector<1x64xf32> to vector<16x64xf32>
    %321 = arith.mulf %319, %320 : vector<16x64xf32>
    %322 = vector.broadcast %299 : vector<1x64xf32> to vector<16x64xf32>
    %323 = arith.addf %321, %322 : vector<16x64xf32>
    %324 = arith.truncf %323 : vector<16x64xf32> to vector<16x64xbf16>
    %cst_140 = arith.constant dense<0.000000e+00> : vector<16x128xf32>
    %325 = tpu.matmul %324, %300, %cst_140 {dimension_numbers = #tpu.dot_dimension_numbers<[1], [0], [0], [1], [0, 0, 1, 1], [], []>} : vector<16x64xbf16>, vector<64x128xbf16>, vector<16x128xf32> -> vector<16x128xf32>
    %326 = vector.broadcast %301 : vector<1x128xf32> to vector<16x128xf32>
    %327 = arith.addf %325, %326 : vector<16x128xf32>
    %cst_141 = arith.constant 0.000000e+00 : f32
    %328 = vector.broadcast %cst_141 : f32 to vector<16x128xf32>
    %329 = arith.maximumf %327, %328 : vector<16x128xf32>
    %330 = arith.truncf %329 : vector<16x128xf32> to vector<16x128xbf16>
    %cst_142 = arith.constant dense<0.000000e+00> : vector<16x64xf32>
    %331 = tpu.matmul %330, %302, %cst_142 {dimension_numbers = #tpu.dot_dimension_numbers<[1], [0], [0], [1], [0, 0, 1, 1], [], []>} : vector<16x128xbf16>, vector<128x64xbf16>, vector<16x64xf32> -> vector<16x64xf32>
    %332 = vector.broadcast %303 : vector<1x64xf32> to vector<16x64xf32>
    %333 = arith.addf %331, %332 : vector<16x64xf32>
    %334 = arith.addf %257, %333 : vector<16x64xf32>
    %c0_143 = arith.constant 0 : index
    %c0_144 = arith.constant 0 : index
    %c0_145 = arith.constant 0 : index
    %335 = vector.load %arg34[%c0_143, %c0_144, %c0_145] : memref<1x16x64xf32, #tpu.memory_space<vmem>>, vector<1x16x64xf32>
    %336 = vector.shape_cast %335 : vector<1x16x64xf32> to vector<16x64xf32>
    %337 = vector.shape_cast %334 : vector<16x64xf32> to vector<1x16x64xf32>
    tpu.vector_store %arg34[%c0_143, %c0_144, %c0_145], %337 {strides = array<i32>} : memref<1x16x64xf32, #tpu.memory_space<vmem>>, vector<1x16x64xf32>,
    %c0_146 = arith.constant 0 : index
    %c0_147 = arith.constant 0 : index
    %c0_148 = arith.constant 0 : index
    %338 = vector.load %arg35[%c0_146, %c0_147, %c0_148] : memref<1x8x16xf32, #tpu.memory_space<vmem>>, vector<1x8x16xf32>
    %339 = vector.shape_cast %338 : vector<1x8x16xf32> to vector<8x16xf32>
    %340 = vector.shape_cast %159 : vector<8x16xf32> to vector<1x8x16xf32>
    tpu.vector_store %arg35[%c0_146, %c0_147, %c0_148], %340 {strides = array<i32>} : memref<1x8x16xf32, #tpu.memory_space<vmem>>, vector<1x8x16xf32>,
    %c0_149 = arith.constant 0 : index
    %c0_150 = arith.constant 0 : index
    %c0_151 = arith.constant 0 : index
    %341 = vector.load %arg36[%c0_149, %c0_150, %c0_151] : memref<1x16x8xf32, #tpu.memory_space<vmem>>, vector<1x16x8xf32>
    %342 = vector.shape_cast %341 : vector<1x16x8xf32> to vector<16x8xf32>
    %343 = vector.shape_cast %255 : vector<16x8xf32> to vector<1x16x8xf32>
    tpu.vector_store %arg36[%c0_149, %c0_150, %c0_151], %343 {strides = array<i32>} : memref<1x16x8xf32, #tpu.memory_space<vmem>>, vector<1x16x8xf32>,
    return
  }
  func.func @transform_0(%arg0: i32) -> (i32, i32, i32) {
    %c0_i32 = arith.constant 0 : i32
    %c0_i32_0 = arith.constant 0 : i32
    %c0_i32_1 = arith.constant 0 : i32
    return %arg0, %c0_i32, %c0_i32_0 : i32, i32, i32
  }
  func.func @transform_1(%arg0: i32) -> (i32, i32, i32) {
    %c0_i32 = arith.constant 0 : i32
    %c0_i32_0 = arith.constant 0 : i32
    %c0_i32_1 = arith.constant 0 : i32
    return %arg0, %c0_i32, %c0_i32_0 : i32, i32, i32
  }
  func.func @transform_2(%arg0: i32) -> (i32, i32, i32) {
    %c0_i32 = arith.constant 0 : i32
    %c0_i32_0 = arith.constant 0 : i32
    %c0_i32_1 = arith.constant 0 : i32
    return %arg0, %c0_i32, %c0_i32_0 : i32, i32, i32
  }
  func.func @transform_3(%arg0: i32) -> (i32, i32, i32) {
    %c0_i32 = arith.constant 0 : i32
    %c0_i32_0 = arith.constant 0 : i32
    %c0_i32_1 = arith.constant 0 : i32
    return %arg0, %c0_i32, %c0_i32_0 : i32, i32, i32
  }
  func.func @transform_4(%arg0: i32) -> (i32, i32) {
    %c0_i32 = arith.constant 0 : i32
    %c0_i32_0 = arith.constant 0 : i32
    %c0_i32_1 = arith.constant 0 : i32
    return %c0_i32, %c0_i32_0 : i32, i32
  }
  func.func @transform_5(%arg0: i32) -> (i32, i32) {
    %c0_i32 = arith.constant 0 : i32
    %c0_i32_0 = arith.constant 0 : i32
    %c0_i32_1 = arith.constant 0 : i32
    return %c0_i32, %c0_i32_0 : i32, i32
  }
  func.func @transform_6(%arg0: i32) -> (i32, i32) {
    %c0_i32 = arith.constant 0 : i32
    %c0_i32_0 = arith.constant 0 : i32
    %c0_i32_1 = arith.constant 0 : i32
    return %c0_i32, %c0_i32_0 : i32, i32
  }
  func.func @transform_7(%arg0: i32) -> (i32, i32) {
    %c0_i32 = arith.constant 0 : i32
    %c0_i32_0 = arith.constant 0 : i32
    %c0_i32_1 = arith.constant 0 : i32
    return %c0_i32, %c0_i32_0 : i32, i32
  }
  func.func @transform_8(%arg0: i32) -> (i32, i32) {
    %c0_i32 = arith.constant 0 : i32
    %c0_i32_0 = arith.constant 0 : i32
    %c0_i32_1 = arith.constant 0 : i32
    return %c0_i32, %c0_i32_0 : i32, i32
  }
  func.func @transform_9(%arg0: i32) -> (i32, i32) {
    %c0_i32 = arith.constant 0 : i32
    %c0_i32_0 = arith.constant 0 : i32
    %c0_i32_1 = arith.constant 0 : i32
    return %c0_i32, %c0_i32_0 : i32, i32
  }
  func.func @transform_10(%arg0: i32) -> (i32, i32) {
    %c0_i32 = arith.constant 0 : i32
    %c0_i32_0 = arith.constant 0 : i32
    %c0_i32_1 = arith.constant 0 : i32
    return %c0_i32, %c0_i32_0 : i32, i32
  }
  func.func @transform_11(%arg0: i32) -> (i32, i32) {
    %c0_i32 = arith.constant 0 : i32
    %c0_i32_0 = arith.constant 0 : i32
    %c0_i32_1 = arith.constant 0 : i32
    return %c0_i32, %c0_i32_0 : i32, i32
  }
  func.func @transform_12(%arg0: i32) -> (i32, i32) {
    %c0_i32 = arith.constant 0 : i32
    %c0_i32_0 = arith.constant 0 : i32
    %c0_i32_1 = arith.constant 0 : i32
    return %c0_i32, %c0_i32_0 : i32, i32
  }
  func.func @transform_13(%arg0: i32) -> (i32, i32) {
    %c0_i32 = arith.constant 0 : i32
    %c0_i32_0 = arith.constant 0 : i32
    %c0_i32_1 = arith.constant 0 : i32
    return %c0_i32, %c0_i32_0 : i32, i32
  }
  func.func @transform_14(%arg0: i32) -> (i32, i32) {
    %c0_i32 = arith.constant 0 : i32
    %c0_i32_0 = arith.constant 0 : i32
    %c0_i32_1 = arith.constant 0 : i32
    return %c0_i32, %c0_i32_0 : i32, i32
  }
  func.func @transform_15(%arg0: i32) -> (i32, i32) {
    %c0_i32 = arith.constant 0 : i32
    %c0_i32_0 = arith.constant 0 : i32
    %c0_i32_1 = arith.constant 0 : i32
    return %c0_i32, %c0_i32_0 : i32, i32
  }
  func.func @transform_16(%arg0: i32) -> (i32, i32) {
    %c0_i32 = arith.constant 0 : i32
    %c0_i32_0 = arith.constant 0 : i32
    %c0_i32_1 = arith.constant 0 : i32
    return %c0_i32, %c0_i32_0 : i32, i32
  }
  func.func @transform_17(%arg0: i32) -> (i32, i32) {
    %c0_i32 = arith.constant 0 : i32
    %c0_i32_0 = arith.constant 0 : i32
    %c0_i32_1 = arith.constant 0 : i32
    return %c0_i32, %c0_i32_0 : i32, i32
  }
  func.func @transform_18(%arg0: i32) -> (i32, i32) {
    %c0_i32 = arith.constant 0 : i32
    %c0_i32_0 = arith.constant 0 : i32
    %c0_i32_1 = arith.constant 0 : i32
    return %c0_i32, %c0_i32_0 : i32, i32
  }
  func.func @transform_19(%arg0: i32) -> (i32, i32) {
    %c0_i32 = arith.constant 0 : i32
    %c0_i32_0 = arith.constant 0 : i32
    %c0_i32_1 = arith.constant 0 : i32
    return %c0_i32, %c0_i32_0 : i32, i32
  }
  func.func @transform_20(%arg0: i32) -> (i32, i32) {
    %c0_i32 = arith.constant 0 : i32
    %c0_i32_0 = arith.constant 0 : i32
    %c0_i32_1 = arith.constant 0 : i32
    return %c0_i32, %c0_i32_0 : i32, i32
  }
  func.func @transform_21(%arg0: i32) -> (i32, i32) {
    %c0_i32 = arith.constant 0 : i32
    %c0_i32_0 = arith.constant 0 : i32
    %c0_i32_1 = arith.constant 0 : i32
    return %c0_i32, %c0_i32_0 : i32, i32
  }
  func.func @transform_22(%arg0: i32) -> (i32, i32) {
    %c0_i32 = arith.constant 0 : i32
    %c0_i32_0 = arith.constant 0 : i32
    %c0_i32_1 = arith.constant 0 : i32
    return %c0_i32, %c0_i32_0 : i32, i32
  }
  func.func @transform_23(%arg0: i32) -> (i32, i32) {
    %c0_i32 = arith.constant 0 : i32
    %c0_i32_0 = arith.constant 0 : i32
    %c0_i32_1 = arith.constant 0 : i32
    return %c0_i32, %c0_i32_0 : i32, i32
  }
  func.func @transform_24(%arg0: i32) -> (i32, i32) {
    %c0_i32 = arith.constant 0 : i32
    %c0_i32_0 = arith.constant 0 : i32
    %c0_i32_1 = arith.constant 0 : i32
    return %c0_i32, %c0_i32_0 : i32, i32
  }
  func.func @transform_25(%arg0: i32) -> (i32, i32) {
    %c0_i32 = arith.constant 0 : i32
    %c0_i32_0 = arith.constant 0 : i32
    %c0_i32_1 = arith.constant 0 : i32
    return %c0_i32, %c0_i32_0 : i32, i32
  }
  func.func @transform_26(%arg0: i32) -> (i32, i32) {
    %c0_i32 = arith.constant 0 : i32
    %c0_i32_0 = arith.constant 0 : i32
    %c0_i32_1 = arith.constant 0 : i32
    return %c0_i32, %c0_i32_0 : i32, i32
  }
  func.func @transform_27(%arg0: i32) -> (i32, i32) {
    %c0_i32 = arith.constant 0 : i32
    %c0_i32_0 = arith.constant 0 : i32
    %c0_i32_1 = arith.constant 0 : i32
    return %c0_i32, %c0_i32_0 : i32, i32
  }
  func.func @transform_28(%arg0: i32) -> (i32, i32) {
    %c0_i32 = arith.constant 0 : i32
    %c0_i32_0 = arith.constant 0 : i32
    %c0_i32_1 = arith.constant 0 : i32
    return %c0_i32, %c0_i32_0 : i32, i32
  }
  func.func @transform_29(%arg0: i32) -> (i32, i32) {
    %c0_i32 = arith.constant 0 : i32
    %c0_i32_0 = arith.constant 0 : i32
    %c0_i32_1 = arith.constant 0 : i32
    return %c0_i32, %c0_i32_0 : i32, i32
  }
  func.func @transform_30(%arg0: i32) -> (i32, i32) {
    %c0_i32 = arith.constant 0 : i32
    %c0_i32_0 = arith.constant 0 : i32
    %c0_i32_1 = arith.constant 0 : i32
    return %c0_i32, %c0_i32_0 : i32, i32
  }
  func.func @transform_31(%arg0: i32) -> (i32, i32) {
    %c0_i32 = arith.constant 0 : i32
    %c0_i32_0 = arith.constant 0 : i32
    %c0_i32_1 = arith.constant 0 : i32
    return %c0_i32, %c0_i32_0 : i32, i32
  }
  func.func @transform_32(%arg0: i32) -> (i32, i32, i32) {
    %c0_i32 = arith.constant 0 : i32
    %c0_i32_0 = arith.constant 0 : i32
    %c0_i32_1 = arith.constant 0 : i32
    return %arg0, %c0_i32, %c0_i32_0 : i32, i32, i32
  }
  func.func @transform_33(%arg0: i32) -> (i32, i32, i32) {
    %c0_i32 = arith.constant 0 : i32
    %c0_i32_0 = arith.constant 0 : i32
    %c0_i32_1 = arith.constant 0 : i32
    return %arg0, %c0_i32, %c0_i32_0 : i32, i32, i32
  }
  func.func @transform_34(%arg0: i32) -> (i32, i32, i32) {
    %c0_i32 = arith.constant 0 : i32
    %c0_i32_0 = arith.constant 0 : i32
    %c0_i32_1 = arith.constant 0 : i32
    return %arg0, %c0_i32, %c0_i32_0 : i32, i32, i32
  }
  func.func @transform_35(%arg0: i32) -> (i32, i32, i32) {
    %c0_i32 = arith.constant 0 : i32
    %c0_i32_0 = arith.constant 0 : i32
    %c0_i32_1 = arith.constant 0 : i32
    return %arg0, %c0_i32, %c0_i32_0 : i32, i32, i32
  }
}

</mosaic_0001>

<bundles_post_ra>
// kernel: cross_attention_module_forward.1
= control target key start
LH: loop header
LB: loop body
LE: loop exit
PB: predicated region body
PF: predicated region fallthrough
CT: control target
= control target key end

     0   :  { %s5245_s6 = smov 1   ;;  %s5246_s10 = smov 2   ;;  %s6177_s0 = inlined_call_operand.smem [shape: u32[36], index: -1, kind: input, shape index: {}] }
   0x1   :  { %s5328_s5 = sld [smem:[%s6177_s0]]   ;;  %s5247_s14 = smov 3  }
   0x2   :  { %s5333_s9 = sld [smem:[%s6177_s0 + %s5245_s6]]   ;;  %s5248_s18 = smov 4  }
   0x3   :  { %s5338_s13 = sld [smem:[%s6177_s0 + %s5246_s10]]   ;;  %s5249_s22 = smov 5  }
   0x4   :  { %s5343_s17 = sld [smem:[%s6177_s0 + %s5247_s14]]   ;;  %s5250_s26 = smov 6  }
   0x5   :  { %s5348_s21 = sld [smem:[%s6177_s0 + %s5248_s18]]   ;;  %s5251_s30 = smov 7  }
   0x6   :  { %s5353_s25 = sld [smem:[%s6177_s0 + %s5249_s22]]   ;;  %s5252_s4 = smov 8  }
   0x7   :  { %6208 = sst [smem:[#allocation47_spill]] %s5328_s5  ;;  %s5253_s10 = smov 9  }
   0x8   :  { %6209 = sst [smem:[#allocation48_spill]] %s5333_s9  ;;  %s5254_s15 = smov 10  }
   0x9   :  { %6210 = sst [smem:[#allocation49_spill]] %s5338_s13  ;;  %s5255_s20 = smov 11  }
   0xa   :  { %6211 = sst [smem:[#allocation50_spill]] %s5343_s17  ;;  %s5257_s1 = smov 13  }
   0xb   :  { %6212 = sst [smem:[#allocation51_spill]] %s5348_s21  ;;  %s5258_s7 = smov 14  }
   0xc   :  { %6213 = sst [smem:[#allocation52_spill]] %s5353_s25  ;;  %s5260_s22 = smov 16  }
   0xd   :  { %s5358_s29 = sld [smem:[%s6177_s0 + %s5250_s26]]   ;;  %s5256_s26 = smov 12  }
   0xe   :  { %s5363_s3 = sld [smem:[%s6177_s0 + %s5251_s30]]   ;;  %s5261_s28 = smov 17  }
   0xf   :  { %s5368_s8 = sld [smem:[%s6177_s0 + %s5252_s4]]  }
  0x10   :  { %s5373_s14 = sld [smem:[%s6177_s0 + %s5253_s10]]  }
  0x11   :  { %s5378_s19 = sld [smem:[%s6177_s0 + %s5254_s15]]   ;;  %s5259_s15 = smov 15  }
  0x12   :  { %s5383_s24 = sld [smem:[%s6177_s0 + %s5255_s20]]  }
  0x13   :  { %6214 = sst [smem:[#allocation53_spill]] %s5358_s29 }
  0x14   :  { %6215 = sst [smem:[#allocation54_spill]] %s5363_s3 }
  0x15   :  { %6216 = sst [smem:[#allocation55_spill]] %s5368_s8 }
  0x16   :  { %6217 = sst [smem:[#allocation56_spill]] %s5373_s14 }
  0x17   :  { %6218 = sst [smem:[#allocation57_spill]] %s5378_s19 }
  0x18   :  { %6219 = sst [smem:[#allocation58_spill]] %s5383_s24 }
  0x19   :  { %s5388_s30 = sld [smem:[%s6177_s0 + %s5256_s26]]  }
  0x1a   :  { %s5393_s6 = sld [smem:[%s6177_s0 + %s5257_s1]]  }
  0x1b   :  { %s5398_s12 = sld [smem:[%s6177_s0 + %s5258_s7]]   ;;  %s5262_s7 = smov 18  }
  0x1c   :  { %s5403_s20 = sld [smem:[%s6177_s0 + %s5259_s15]]   ;;  %s5263_s15 = smov 19  }
  0x1d   :  { %s5408_s27 = sld [smem:[%s6177_s0 + %s5260_s22]]   ;;  %s5264_s22 = smov 20  }
  0x1e   :  { %s5413_s4 = sld [smem:[%s6177_s0 + %s5261_s28]]   ;;  %s5265_s28 = smov 21  }
  0x1f   :  { %s5423_s17 = sld [smem:[%s6177_s0 + %s5263_s15]]   ;;  %s5267_s15 = smov 23  }
  0x20   :  { %6220 = sst [smem:[#allocation59_spill]] %s5393_s6 }
  0x21   :  { %6221 = sst [smem:[#allocation60_spill]] %s5398_s12 }
  0x22   :  { %s5418_s12 = sld [smem:[%s6177_s0 + %s5262_s7]]   ;;  %s5266_s7 = smov 22  }
  0x23   :  { %s5428_s13 = sld [smem:[%s6177_s0 + %s5264_s22]]   ;;  %s5268_s22 = smov 24  }
  0x24   :  { %6222 = sst [smem:[#allocation61_spill]] %s5413_s4 }
  0x25   :  { %s5433_s25 = sld [smem:[%s6177_s0 + %s5265_s28]]   ;;  %s5269_s28 = smov 25  }
  0x26   :  { %s5443_s3 = sld [smem:[%s6177_s0 + %s5267_s15]]   ;;  %s5271_s15 = smov 27  }
  0x27   :  { %s5448_s21 = sld [smem:[%s6177_s0 + %s5268_s22]]   ;;  %s5272_s22 = smov 28  }
  0x28   :  { %6223 = sst [smem:[#allocation62_spill]] %s5418_s12 }
  0x29   :  { %6224 = sst [smem:[#allocation63_spill]] %s5428_s13 }
  0x2a   :  { %s5438_s12 = sld [smem:[%s6177_s0 + %s5266_s7]]   ;;  %s5270_s7 = smov 26  }
  0x2b   :  { %s5453_s29 = sld [smem:[%s6177_s0 + %s5269_s28]]   ;;  %s5273_s28 = smov 29  }
  0x2c   :  { %6226 = sst [smem:[#allocation65_spill]] %s5443_s3 }
  0x2d   :  { %6227 = sst [smem:[#allocation66_spill]] %s5448_s21 }
  0x2e   :  { %s5458_s19 = sld [smem:[%s6177_s0 + %s5270_s7]]   ;;  %s5274_s7 = smov 30  }
  0x2f   :  { %s5463_s9 = sld [smem:[%s6177_s0 + %s5271_s15]]   ;;  %s5275_s15 = smov 31  }
  0x30   :  { %6225 = sst [smem:[#allocation64_spill]] %s5438_s12 }
  0x31   :  { %6228 = sst [smem:[#allocation67_spill]] %s5453_s29 }
  0x32   :  { %s5468_s21 = sld [smem:[%s6177_s0 + %s5272_s22]]   ;;  %s5276_s22 = smov 32  }
  0x33   :  { %s5473_s5 = sld [smem:[%s6177_s0 + %s5273_s28]]   ;;  %s5277_s28 = smov 33  }
  0x34   :  { %6229 = sst [smem:[#allocation68_spill]] %s5458_s19 }
  0x35   :  { %6230 = sst [smem:[#allocation69_spill]] %s5463_s9 }
  0x36   :  { %s5478_s19 = sld [smem:[%s6177_s0 + %s5274_s7]]   ;;  %s5278_s7 = smov 34  }
  0x37   :  { %s5483_s29 = sld [smem:[%s6177_s0 + %s5275_s15]]   ;;  %s5279_s15 = smov 35  }
  0x38   :  { %6231 = sst [smem:[#allocation70_spill]] %s5468_s21 }
  0x39   :  { %6232 = sst [smem:[#allocation71_spill]] %s5473_s5 }
  0x3a   :  { %s5488_s21 = sld [smem:[%s6177_s0 + %s5276_s22]]  }
  0x3b   :  { %s5493_s5 = sld [smem:[%s6177_s0 + %s5277_s28]]  }
  0x3c   :  { %6233 = sst [smem:[#allocation72_spill]] %s5478_s19 }
  0x3d   :  { %6234 = sst [smem:[#allocation73_spill]] %s5483_s29 }
  0x3e   :  { %s5498_s19 = sld [smem:[%s6177_s0 + %s5278_s7]]  }
  0x3f   :  { %s5503_s29 = sld [smem:[%s6177_s0 + %s5279_s15]]  }
  0x40   :  { %6235 = sst [smem:[#allocation74_spill]] %s5488_s21 }
  0x41   :  { %6236 = sst [smem:[#allocation75_spill]] %s5493_s5 }
  0x44   :  { %6237 = sst [smem:[#allocation76_spill]] %s5498_s19 }
  0x45   :  { %77 = vsyncpa [#allocation3], 0 }
  0x46   :  { %79 = vsyncpa [#allocation3 + $0x1], 0 }
  0x47   :  { %80 = vsyncpa [#allocation6], 0 }
  0x48   :  { %81 = vsyncpa [#allocation9], 0 }
  0x49   :  { %82 = vsyncpa [#allocation12], 0 }
  0x4a   :  { %83 = vsyncpa [#allocation15], 0 }
  0x4b   :  { %84 = vsyncpa [#allocation18], 0 }
  0x4c   :  { %85 = vsyncpa [#allocation21], 0 }
  0x4d   :  { %86 = vsyncpa [#allocation24], 0 }
  0x4e   :  { %87 = vsyncpa [#allocation27], 0 }
  0x4f   :  { %88 = vsyncpa [#allocation30], 0 }
  0x50   :  { %89 = vsyncpa [#allocation4], 0 }
  0x51   :  { %91 = vsyncpa [#allocation4 + $0x1], 0 }
  0x52   :  { %92 = vsyncpa [#allocation33], 0 }
  0x53   :  { %94 = vsyncpa [#allocation33 + $0x1], 0  ;;  %s5505_s22 = smov 0   ;;  %s5507_s23 = smov 0  }
  0x54   :  { %s5509_s0 = smov 0   ;;  %s5511_s26 = smov 0  }
  0x55 LB: > { %s5280_s28 = smov [#allocation5]   ;;  %s5526_s2 = sadd.s32 4294967295, %s5243_s26   ;;  %s5243_s26 = sphi %s5511_s26, %s6310_s26   ;;  %s5239_s0 = sphi %s5509_s0, %s6309_s0   ;;  %s5235_s23 = sphi %s5507_s23, %s6308_s23   ;;  %s5231_s22 = sphi %s5505_s22, %s6307_s22  }
  0x56   : > { %s925_s1 = sshll.u32 %s5280_s28, 4  ;;  %p3798_p0 = scmp.ge.s32.totalorder %s5243_s26, 1  ;;  %s926_s1 = int_to_ptr.vmem [resolvable:$true] %s925_s1 }
  0x57   : > { %p6192_p1 = scmp.eq.s32.totalorder %s5526_s2, 0  ;;  %p901_p2 = scmp.lt.s32.totalorder %s5243_s26, 3 }
  0x58   : > { %s5281_s10 = smov [#allocation8]   ;;  %s5282_s16 = smov [#allocation11]  }
  0x59   : > { %p5531_p3 = pnand %p3798_p0, %p901_p2  ;;  %s953_s11 = sshll.u32 %s5281_s10, 4  ;;  %s954_s11 = int_to_ptr.vmem [resolvable:$true] %s953_s11 }
  0x5a   : > { %s977_s18 = sshll.u32 %s5282_s16, 4  ;;  %s4628_s19 = scalar_lea.vmem %s926_s1, 256  ;;  %s5544_s18 = int_to_ptr.vmem [resolvable:$true] %s977_s18 }
  0x5b   : > { %s6238_s7 = scalar_select %p5531_p3, 1, 0 }
  0x5c   : > { %p4298_p5 = pneg %p5531_p3  ;;  %p4629_p8 = scmp.ne.s32.totalorder %s926_s1, %s4628_s19 }
  0x5d   : > { %p4636_p11 = scmp.lt.s32.totalorder %s926_s1, %s926_s1  ;;  %p4637_p12 = scmp.lt.s32.totalorder %s4628_s19, %s4628_s19 }
  0x5e   : > { %p5540_p6 = pnand %p4298_p5, %p6192_p1 }
  0x5f   : > { %p4638_p13 = por %p4637_p12, %p4636_p11 }
  0x60   : > { %p5548_p7 = pneg %p5540_p6 }
  0x62   : > { %p4631_p9 = pnand %p4629_p8, %p5548_p7 }
  0x64   : > { %p4632_p10 = pneg %p4631_p9 }
  0x66   : > { %p4639_p0 = pnand %p4638_p13, %p4632_p10 }
  0x68   : > { %4642 = shalt.err (!%p4639_p0)
}
  0x69   : > { %s6188_s10 = smov 64   ;;  %s6241_s8 = sld [smem:[#allocation55_spill]] }
  0x6a   : > { %s6190_s16 = smov 4   ;;  %s4654_s5 = scalar_lea.vmem %s954_s11, 16 }
  0x6b   : > { %p4655_p2 = scmp.ne.s32.totalorder %s954_s11, %s4654_s5  ;;  %s4661_s21 = scalar_lea.vmem %s954_s11, 32 }
  0x6c   : > { %p4662_p9 = scmp.lt.s32.totalorder %s954_s11, %s954_s11  ;;  %p4663_p11 = scmp.lt.s32.totalorder %s4661_s21, %s4654_s5 }
  0x6d   : > { %p4657_p5 = pnand %p4655_p2, %p5548_p7 }
  0x6e   : > { %p4664_p10 = por %p4663_p11, %p4662_p9 }
  0x6f   : > { %4301 = dma.hbm_to_vmem [thread:$0]  (!%p5540_p6), %s6241_s8, 256, %s926_s1, [#allocation6], %s6188_s10, %s6188_s10, %s6190_s16  }
  0x70   : > { %p4658_p8 = pneg %p4657_p5 }
  0x72   : > { %p4665_p12 = pnand %p4664_p10, %p4658_p8 }
  0x74   : > { %4668 = shalt.err (!%p4665_p12)
}
  0x75   : > { %s6242_s24 = sld [smem:[#allocation58_spill]]  ;;  %s4680_s19 = scalar_lea.vmem %s5544_s18, 16 }
  0x76   : > { %p4681_p13 = scmp.ne.s32.totalorder %s5544_s18, %s4680_s19  ;;  %s4687_s1 = scalar_lea.vmem %s5544_s18, 32 }
  0x77   : > { %p4688_p5 = scmp.lt.s32.totalorder %s5544_s18, %s5544_s18  ;;  %p4689_p9 = scmp.lt.s32.totalorder %s4687_s1, %s4680_s19 }
  0x78   : > { %p4683_p0 = pnand %p4681_p13, %p5548_p7 }
  0x79   : > { %p4690_p8 = por %p4689_p9, %p4688_p5 }
  0x7a   : > { %p4684_p2 = pneg %p4683_p0 }
  0x7b   : > { %4307 = dma.hbm_to_vmem [thread:$0]  (!%p5540_p6), %s6242_s24, 16, %s954_s11, [#allocation9]  }
  0x7c   : > { %p4691_p11 = pnand %p4690_p8, %p4684_p2 }
  0x7e   : > { %4694 = shalt.err (!%p4691_p11)
}
  0x7f   : > { %s6243_s6 = sld [smem:[#allocation59_spill]]  ;;  %s5285_s5 = smov [#allocation14]  }
  0x80   : > { %s1001_s21 = sshll.u32 %s5285_s5, 4  ;;  %s5286_s11 = smov [#allocation17]   ;;  %s1002_s21 = int_to_ptr.vmem [resolvable:$true] %s1001_s21 }
  0x81   : > { %s1029_s10 = sshll.u32 %s5286_s11, 4  ;;  %s4706_s16 = scalar_lea.vmem %s1002_s21, 256  ;;  %s1030_s10 = int_to_ptr.vmem [resolvable:$true] %s1029_s10 }
  0x82   : > { %p4707_p10 = scmp.ne.s32.totalorder %s1002_s21, %s4706_s16  ;;  %p4714_p0 = scmp.lt.s32.totalorder %s1002_s21, %s1002_s21 }
  0x83   : > { %p4715_p5 = scmp.lt.s32.totalorder %s4706_s16, %s4706_s16 }
  0x84   : > { %p4709_p12 = pnand %p4707_p10, %p5548_p7 }
  0x85   : > { %4313 = dma.hbm_to_vmem [thread:$0]  (!%p5540_p6), %s6243_s6, 16, %s5544_s18, [#allocation12]  }
  0x86   : > { %p4710_p13 = pneg %p4709_p12  ;;  %p4716_p2 = por %p4715_p5, %p4714_p0 }
  0x88   : > { %p4717_p9 = pnand %p4716_p2, %p4710_p13 }
  0x8a   : > { %4720 = shalt.err (!%p4717_p9)
}
  0x8b   : > { %s6244_s19 = smov 4   ;;  %s6245_s1 = smov 64  }
  0x8c   : > { %4319 = dma.hbm_to_vmem [thread:$0]  (!%p5540_p6), %s5408_s27, 256, %s1002_s21, [#allocation15], %s6245_s1, %s6245_s1, %s6244_s19  }
  0x8d   : > { %s4732_s18 = scalar_lea.vmem %s1030_s10, 16  ;;  %s4739_s5 = scalar_lea.vmem %s1030_s10, 32 }
  0x8e   : > { %p4733_p8 = scmp.ne.s32.totalorder %s1030_s10, %s4732_s18  ;;  %p4740_p12 = scmp.lt.s32.totalorder %s1030_s10, %s1030_s10 }
  0x8f   : > { %p4741_p4 = scmp.lt.s32.totalorder %s4739_s5, %s4732_s18 }
  0x90   : > { %p4735_p11 = pnand %p4733_p8, %p5548_p7 }
  0x91   : > { %p4742_p0 = por %p4741_p4, %p4740_p12 }
  0x92   : > { %p4736_p10 = pneg %p4735_p11 }
  0x94   : > { %p4743_p13 = pnand %p4742_p0, %p4736_p10 }
  0x96   : > { %4746 = shalt.err (!%p4743_p13)
}
  0x97   : > { %4325 = dma.hbm_to_vmem [thread:$0]  (!%p5540_p6), %s5423_s17, 16, %s1030_s10, [#allocation18]  }
  0x98   : > { %s5287_s16 = smov [#allocation20]   ;;  %s5288_s21 = smov [#allocation23]  }
  0x99   : > { %s1051_s11 = sshll.u32 %s5287_s16, 4  ;;  %s1075_s6 = sshll.u32 %s5288_s21, 4  ;;  %s1052_s11 = int_to_ptr.vmem [resolvable:$true] %s1051_s11  ;;  %s1076_s6 = int_to_ptr.vmem [resolvable:$true] %s1075_s6 }
  0x9a   : > { %s4758_s8 = scalar_lea.vmem %s1052_s11, 16  ;;  %s4765_s24 = scalar_lea.vmem %s1052_s11, 32 }
  0x9b   : > { %p4759_p5 = scmp.ne.s32.totalorder %s1052_s11, %s4758_s8  ;;  %p4766_p8 = scmp.lt.s32.totalorder %s1052_s11, %s1052_s11 }
  0x9c   : > { %p4767_p4 = scmp.lt.s32.totalorder %s4765_s24, %s4758_s8 }
  0x9d   : > { %p4761_p2 = pnand %p4759_p5, %p5548_p7 }
  0x9e   : > { %p4768_p11 = por %p4767_p4, %p4766_p8 }
  0x9f   : > { %p4762_p9 = pneg %p4761_p2 }
  0xa1   : > { %p4769_p10 = pnand %p4768_p11, %p4762_p9 }
  0xa3   : > { %4772 = shalt.err (!%p4769_p10)
}
  0xa4   : > { %4331 = dma.hbm_to_vmem [thread:$0]  (!%p5540_p6), %s5433_s25, 16, %s1052_s11, [#allocation21]  }
  0xa5   : > { %s4784_s10 = scalar_lea.vmem %s1076_s6, 16  ;;  %s4791_s18 = scalar_lea.vmem %s1076_s6, 32 }
  0xa6   : > { %p4785_p12 = scmp.ne.s32.totalorder %s1076_s6, %s4784_s10  ;;  %p4792_p5 = scmp.lt.s32.totalorder %s1076_s6, %s1076_s6 }
  0xa7   : > { %p4793_p2 = scmp.lt.s32.totalorder %s4791_s18, %s4784_s10 }
  0xa8   : > { %p4787_p0 = pnand %p4785_p12, %p5548_p7 }
  0xa9   : > { %p4794_p1 = por %p4793_p2, %p4792_p5 }
  0xaa   : > { %p4788_p13 = pneg %p4787_p0 }
  0xac   : > { %p4795_p3 = pnand %p4794_p1, %p4788_p13 }
  0xae   : > { %4798 = shalt.err (!%p4795_p3)
}
  0xaf   : > { %s6246_s3 = sld [smem:[#allocation65_spill]]  ;;  %s5289_s8 = smov [#allocation26]  }
  0xb0   : > { %s1103_s24 = sshll.u32 %s5289_s8, 4  ;;  %s5290_s5 = smov [#allocation7]   ;;  %s1104_s24 = int_to_ptr.vmem [resolvable:$true] %s1103_s24 }
  0xb1   : > { %s939_s16 = sshll.u32 %s5290_s5, 4  ;;  %s4810_s11 = scalar_lea.vmem %s1104_s24, 16  ;;  %s940_s16 = int_to_ptr.vmem [resolvable:$true] %s939_s16 }
  0xb2   : > { %p4811_p9 = scmp.ne.s32.totalorder %s1104_s24, %s4810_s11  ;;  %s4817_s21 = scalar_lea.vmem %s1104_s24, 32 }
  0xb3   : > { %p4818_p11 = scmp.lt.s32.totalorder %s1104_s24, %s1104_s24  ;;  %p4819_p10 = scmp.lt.s32.totalorder %s4817_s21, %s4810_s11 }
  0xb4   : > { %p4813_p8 = pnand %p4811_p9, %p5548_p7 }
  0xb5   : > { %4337 = dma.hbm_to_vmem [thread:$0]  (!%p5540_p6), %s6246_s3, 16, %s1076_s6, [#allocation24]  }
  0xb6   : > { %p4814_p4 = pneg %p4813_p8  ;;  %p4820_p1 = por %p4819_p10, %p4818_p11 }
  0xb8   : > { %p4821_p3 = pnand %p4820_p1, %p4814_p4 }
  0xba   : > { %4824 = shalt.err (!%p4821_p3)
}
  0xbb   : > { %s6247_s9 = sld [smem:[#allocation69_spill]]  ;;  %s4836_s6 = scalar_lea.vmem %s940_s16, 16 }
  0xbc   : > { %p4837_p12 = scmp.ne.s32.totalorder %s940_s16, %s4836_s6  ;;  %s4843_s10 = scalar_lea.vmem %s940_s16, 32 }
  0xbd   : > { %p4844_p5 = scmp.lt.s32.totalorder %s940_s16, %s940_s16  ;;  %p4845_p2 = scmp.lt.s32.totalorder %s4843_s10, %s4836_s6 }
  0xbe   : > { %p4839_p0 = pnand %p4837_p12, %p5548_p7 }
  0xbf   : > { %p4846_p9 = por %p4845_p2, %p4844_p5 }
  0xc0   : > { %p4840_p13 = pneg %p4839_p0 }
  0xc1   : > { %4343 = dma.hbm_to_vmem [thread:$0]  (!%p5540_p6), %s6247_s9, 16, %s1104_s24, [#allocation27]  }
  0xc2   : > { %p4847_p8 = pnand %p4846_p9, %p4840_p13 }
  0xc4   : > { %4850 = shalt.err (!%p4847_p8)
}
  0xc5   : > { %s6248_s14 = sld [smem:[#allocation56_spill]]  ;;  %s5291_s18 = smov [#allocation10]  }
  0xc6   : > { %s963_s8 = sshll.u32 %s5291_s18, 4  ;;  %s5292_s24 = smov [#allocation13]   ;;  %s964_s8 = int_to_ptr.vmem [resolvable:$true] %s963_s8 }
  0xc7   : > { %s991_s5 = sshll.u32 %s5292_s24, 4  ;;  %s4862_s11 = scalar_lea.vmem %s964_s8, 256  ;;  %s992_s5 = int_to_ptr.vmem [resolvable:$true] %s991_s5 }
  0xc8   : > { %p4863_p4 = scmp.ne.s32.totalorder %s964_s8, %s4862_s11  ;;  %p4870_p1 = scmp.lt.s32.totalorder %s964_s8, %s964_s8 }
  0xc9   : > { %p4871_p3 = scmp.lt.s32.totalorder %s4862_s11, %s4862_s11 }
  0xca   : > { %p4865_p11 = pnand %p4863_p4, %p5548_p7 }
  0xcb   : > { %4304 = dma.hbm_to_vmem [thread:$0]  (!%p5540_p6), %s6248_s14, 16, %s940_s16, [#allocation6]  }
  0xcc   : > { %p4866_p10 = pneg %p4865_p11  ;;  %p4872_p12 = por %p4871_p3, %p4870_p1 }
  0xce   : > { %p4873_p0 = pnand %p4872_p12, %p4866_p10 }
  0xd0   : > { %4876 = shalt.err (!%p4873_p0)
}
  0xd1   : > { %4310 = dma.hbm_to_vmem [thread:$0]  (!%p5540_p6), %s5388_s30, 256, %s964_s8, [#allocation9], %s6245_s1, %s6245_s1, %s6244_s19  }
  0xd2   : > { %s4888_s16 = scalar_lea.vmem %s992_s5, 16  ;;  %s4895_s21 = scalar_lea.vmem %s992_s5, 32 }
  0xd3   : > { %p4889_p13 = scmp.ne.s32.totalorder %s992_s5, %s4888_s16  ;;  %p4896_p9 = scmp.lt.s32.totalorder %s992_s5, %s992_s5 }
  0xd4   : > { %p4897_p8 = scmp.lt.s32.totalorder %s4895_s21, %s4888_s16 }
  0xd5   : > { %p4891_p5 = pnand %p4889_p13, %p5548_p7 }
  0xd6   : > { %p4898_p4 = por %p4897_p8, %p4896_p9 }
  0xd7   : > { %p4892_p2 = pneg %p4891_p5 }
  0xd9   : > { %p4899_p11 = pnand %p4898_p4, %p4892_p2 }
  0xdb   : > { %4902 = shalt.err (!%p4899_p11)
}
  0xdc   : > { %4316 = dma.hbm_to_vmem [thread:$0]  (!%p5540_p6), %s5403_s20, 16, %s992_s5, [#allocation12]  }
  0xdd   : > { %s5293_s6 = smov [#allocation16]   ;;  %s5294_s18 = smov [#allocation19]  }
  0xde   : > { %s1015_s10 = sshll.u32 %s5293_s6, 4  ;;  %s1040_s8 = sshll.u32 %s5294_s18, 4  ;;  %s1016_s10 = int_to_ptr.vmem [resolvable:$true] %s1015_s10  ;;  %s1041_s8 = int_to_ptr.vmem [resolvable:$true] %s1040_s8 }
  0xdf   : > { %s4914_s24 = scalar_lea.vmem %s1016_s10, 16  ;;  %s4921_s11 = scalar_lea.vmem %s1016_s10, 32 }
  0xe0   : > { %p4915_p10 = scmp.ne.s32.totalorder %s1016_s10, %s4914_s24  ;;  %p4922_p12 = scmp.lt.s32.totalorder %s1016_s10, %s1016_s10 }
  0xe1   : > { %p4923_p0 = scmp.lt.s32.totalorder %s4921_s11, %s4914_s24 }
  0xe2   : > { %p4917_p1 = pnand %p4915_p10, %p5548_p7 }
  0xe3   : > { %p4924_p13 = por %p4923_p0, %p4922_p12 }
  0xe4   : > { %p4918_p3 = pneg %p4917_p1 }
  0xe6   : > { %p4925_p5 = pnand %p4924_p13, %p4918_p3 }
  0xe8   : > { %4928 = shalt.err (!%p4925_p5)
}
  0xe9   : > { %s6249_s4 = sld [smem:[#allocation61_spill]]  ;;  %s4940_s5 = scalar_lea.vmem %s1041_s8, 16 }
  0xea   : > { %p4941_p2 = scmp.ne.s32.totalorder %s1041_s8, %s4940_s5  ;;  %s4947_s16 = scalar_lea.vmem %s1041_s8, 32 }
  0xeb   : > { %p4948_p4 = scmp.lt.s32.totalorder %s1041_s8, %s1041_s8  ;;  %p4949_p11 = scmp.lt.s32.totalorder %s4947_s16, %s4940_s5 }
  0xec   : > { %p4943_p9 = pnand %p4941_p2, %p5548_p7 }
  0xed   : > { %p4950_p10 = por %p4949_p11, %p4948_p4 }
  0xee   : > { %p4944_p8 = pneg %p4943_p9 }
  0xef   : > { %4322 = dma.hbm_to_vmem [thread:$0]  (!%p5540_p6), %s6249_s4, 16, %s1016_s10, [#allocation15]  }
  0xf0   : > { %p4951_p1 = pnand %p4950_p10, %p4944_p8 }
  0xf2   : > { %4954 = shalt.err (!%p4951_p1)
}
  0xf3   : > { %s6250_s13 = sld [smem:[#allocation63_spill]]  ;;  %s5295_s21 = smov [#allocation22]  }
  0xf4   : > { %s1061_s6 = sshll.u32 %s5295_s21, 4  ;;  %s5296_s10 = smov [#allocation25]   ;;  %s1062_s6 = int_to_ptr.vmem [resolvable:$true] %s1061_s6 }
  0xf5   : > { %s1089_s18 = sshll.u32 %s5296_s10, 4  ;;  %s4966_s24 = scalar_lea.vmem %s1062_s6, 256  ;;  %s1090_s18 = int_to_ptr.vmem [resolvable:$true] %s1089_s18 }
  0xf6   : > { %p4967_p3 = scmp.ne.s32.totalorder %s1062_s6, %s4966_s24  ;;  %p4974_p13 = scmp.lt.s32.totalorder %s1062_s6, %s1062_s6 }
  0xf7   : > { %p4975_p5 = scmp.lt.s32.totalorder %s4966_s24, %s4966_s24 }
  0xf8   : > { %p4969_p12 = pnand %p4967_p3, %p5548_p7 }
  0xf9   : > { %4328 = dma.hbm_to_vmem [thread:$0]  (!%p5540_p6), %s6250_s13, 16, %s1041_s8, [#allocation18]  }
  0xfa   : > { %p4970_p0 = pneg %p4969_p12  ;;  %p4976_p2 = por %p4975_p5, %p4974_p13 }
  0xfc   : > { %p4977_p9 = pnand %p4976_p2, %p4970_p0 }
  0xfe   : > { %4980 = shalt.err (!%p4977_p9)
}
  0xff   : > { %s6251_s12 = sld [smem:[#allocation64_spill]]  ;;  %s4992_s8 = scalar_lea.vmem %s1090_s18, 16 }
 0x100   : > { %p4993_p8 = scmp.ne.s32.totalorder %s1090_s18, %s4992_s8  ;;  %s4999_s11 = scalar_lea.vmem %s1090_s18, 32 }
 0x101   : > { %p5000_p10 = scmp.lt.s32.totalorder %s1090_s18, %s1090_s18  ;;  %p5001_p1 = scmp.lt.s32.totalorder %s4999_s11, %s4992_s8 }
 0x102   : > { %p4995_p4 = pnand %p4993_p8, %p5548_p7 }
 0x103   : > { %p5002_p3 = por %p5001_p1, %p5000_p10 }
 0x104   : > { %p4996_p11 = pneg %p4995_p4 }
 0x105   : > { %4334 = dma.hbm_to_vmem [thread:$0]  (!%p5540_p6), %s6251_s12, 256, %s1062_s6, [#allocation21], %s6245_s1, %s6245_s1, %s6244_s19  }
 0x106   : > { %p5003_p12 = pnand %p5002_p3, %p4996_p11 }
 0x108   : > { %5006 = shalt.err (!%p5003_p12)
}
 0x109   : > { %s6252_s5 = sld [smem:[#allocation67_spill]]  ;;  %s5297_s16 = smov [#allocation28]  }
 0x10a   : > { %s1117_s21 = sshll.u32 %s5297_s16, 4  ;;  %s5298_s19 = smov [#allocation29]   ;;  %s1118_s21 = int_to_ptr.vmem [resolvable:$true] %s1117_s21 }
 0x10b   : > { %s1131_s1 = sshll.u32 %s5298_s19, 4  ;;  %s5018_s6 = scalar_lea.vmem %s1118_s21, 16  ;;  %s1132_s1 = int_to_ptr.vmem [resolvable:$true] %s1131_s1 }
 0x10c   : > { %p5019_p0 = scmp.ne.s32.totalorder %s1118_s21, %s5018_s6  ;;  %s5025_s10 = scalar_lea.vmem %s1118_s21, 32 }
 0x10d   : > { %p5026_p2 = scmp.lt.s32.totalorder %s1118_s21, %s1118_s21  ;;  %p5027_p9 = scmp.lt.s32.totalorder %s5025_s10, %s5018_s6 }
 0x10e   : > { %p5021_p13 = pnand %p5019_p0, %p5548_p7 }
 0x10f   : > { %4340 = dma.hbm_to_vmem [thread:$0]  (!%p5540_p6), %s6252_s5, 16, %s1090_s18, [#allocation24]  }
 0x110   : > { %p5022_p5 = pneg %p5021_p13  ;;  %p5028_p8 = por %p5027_p9, %p5026_p2 }
 0x112   : > { %p5029_p4 = pnand %p5028_p8, %p5022_p5 }
 0x114   : > { %5032 = shalt.err (!%p5029_p4)
}
 0x115   : > { %s6253_s24 = sld [smem:[#allocation71_spill]]  ;;  %s5044_s18 = scalar_lea.vmem %s1132_s1, 16 }
 0x116   : > { %p5045_p11 = scmp.ne.s32.totalorder %s1132_s1, %s5044_s18  ;;  %s5051_s8 = scalar_lea.vmem %s1132_s1, 32 }
 0x117   : > { %p5052_p3 = scmp.lt.s32.totalorder %s1132_s1, %s1132_s1  ;;  %p5053_p12 = scmp.lt.s32.totalorder %s5051_s8, %s5044_s18 }
 0x118   : > { %p5047_p10 = pnand %p5045_p11, %p5548_p7 }
 0x119   : > { %p5054_p0 = por %p5053_p12, %p5052_p3 }
 0x11a   : > { %p5048_p1 = pneg %p5047_p10 }
 0x11b   : > { %4346 = dma.hbm_to_vmem [thread:$0]  (!%p5540_p6), %s6253_s24, 16, %s1118_s21, [#allocation27]  }
 0x11c   : > { %p5055_p13 = pnand %p5054_p0, %p5048_p1 }
 0x11e   : > { %5058 = shalt.err (!%p5055_p13)
}
 0x11f   : > { %s6254_s11 = sld [smem:[#allocation73_spill]]  ;;  %s6194_s28 = sadd.s32 4294967294, %s5243_s26  }
 0x120   : > { %s5657_s5 = sadd.s32 1, %s5243_s26   ;;  %s107_s15 = sadd.s32 1, %s5239_s0 }
 0x121   : > { %s104_s16 = ssub.s32 %s5243_s26, %s5657_s5  ;;  %s6255_s21 = sld [smem:[#allocation47_spill]] }
 0x122   : > { %p114_p7 = scmp.ne.s32.totalorder %s5239_s0, %s5235_s23  ;;  %p105_p5 = scmp.eq.s32.totalorder %s104_s16, 0 }
 0x123   : > { %p115_p2 = scmp.eq.s32.totalorder %s5243_s26, 0  ;;  %p120_p9 = scmp.ne.s32.totalorder %s5235_s23, %s5231_s22 }
 0x124   : > { %p810_p8 = scmp.eq.s32.totalorder %s5526_s2, 1  ;;  %p6256_p11 = scmp.eq.s32.totalorder %s5526_s2, 0 }
 0x125   : > { %4349 = dma.hbm_to_vmem [thread:$0]  (!%p5540_p6), %s6254_s11, 16, %s1132_s1, [#allocation30]  }
 0x126   : > { %s5669_s19 = scalar_select %p105_p5, %s5239_s0, %s107_s15  }
 0x127   : > { %p116_p4 = por %p115_p2, %p114_p7  ;;  %p5673_p10 = por %p6256_p11, %p120_p9 }
 0x128   : > { %p5677_p6 = por %p810_p8, %p114_p7  ;;  %p816_p1 = scmp.eq.s32.totalorder %s6194_s28, 1 }
 0x129   : > { %s6257_s1 = scalar_select %p5673_p10, 1, 0 }
 0x12a   : > { %s6258_s6 = scalar_select %p5677_p6, 1, 0 }
 0x12b   : > { %p4381_p3 = scmp.lt.s32.totalorder %s5243_s26, 2  ;;  %s1142_s10 = sand.u32 1, %s5239_s0  }
 0x12c   : > { %p5685_p12 = por %p816_p1, %p120_p9  ;;  %s3817_s18 = sshll.u32 %s1142_s10, 3 }
 0x12d   : > { %s3818_s8 = sshll.u32 %s5243_s26, 7  ;;  %s1146_s15 = scalar_lea.vmem [#allocation2], %s3817_s18 }
 0x12e   : > { %s6259_s24 = scalar_select %p5685_p12, 1, 0 }
 0x12f   : > { %s5691_s11 = scalar_lea.hbm %s6255_s21, %s3818_s8  ;;  %s1153_s16 = sshll.u32 %s1146_s15, 4  ;;  %s1154_s16 = int_to_ptr.vmem [resolvable:$true] %s1153_s16 }
 0x130   : > { %p5693_p0 = pnand %p4381_p3, %p116_p4  ;;  %s1143_s28 = scalar_lea.sflag [#allocation3], %s1142_s10 }
 0x131   : > { %s5059_s4 = scalar_lea.hbm %s5691_s11, 128  ;;  %s5064_s8 = scalar_lea.hbm %s6255_s21, 256 }
 0x132   : > { %s6260_s3 = scalar_select %p5693_p0, 1, 0 }
 0x133   : > { %p5060_p13 = scmp.ne.s32.totalorder %s5691_s11, %s5059_s4  ;;  %p5061_p7 = pneg %p5693_p0 }
 0x134   : > { %p5065_p9 = scmp.lt.s32.totalorder %s5691_s11, %s6255_s21  ;;  %p5066_p8 = scmp.lt.s32.totalorder %s5064_s8, %s5059_s4 }
 0x135   : > { %p5062_p5 = pnand %p5061_p7, %p5060_p13 }
 0x136   : > { %p5067_p11 = por %p5066_p8, %p5065_p9 }
 0x137   : > { %p5063_p2 = pneg %p5062_p5 }
 0x139   : > { %p5068_p1 = pnand %p5067_p11, %p5063_p2 }
 0x13b   : > { %5071 = shalt.err (!%p5068_p1)
}
 0x13c   : > { %s5072_s18 = scalar_lea.vmem %s1154_s16, 128  ;;  %s5299_s15 = smov [#allocation2]  }
 0x13d   : > { %p5073_p4 = scmp.ne.s32.totalorder %s1154_s16, %s5072_s18  ;;  %s5077_s9 = sshll.u32 %s5299_s15, 4  ;;  %s5078_s9 = int_to_ptr.vmem [resolvable:$false] %s5077_s9 }
 0x13e   : > { %s5079_s10 = scalar_lea.vmem %s5078_s9, 256  ;;  %p5080_p6 = scmp.lt.s32.totalorder %s1154_s16, %s5078_s9 }
 0x13f   : > { %p5075_p3 = pnand %p5073_p4, %p5061_p7  ;;  %p5081_p10 = scmp.lt.s32.totalorder %s5079_s10, %s5072_s18 }
 0x141   : > { %p5076_p12 = pneg %p5075_p3  ;;  %p5082_p0 = por %p5081_p10, %p5080_p6 }
 0x143   : > { %p5083_p13 = pnand %p5082_p0, %p5076_p12 }
 0x145   : > { %5086 = shalt.err (!%p5083_p13)
}
 0x146   : > { %p6261_p5 = scmp.ne.s32.totalorder %s6260_s3, 0  ;;  %p6262_p2 = scmp.ne.s32.totalorder %s6238_s7, 0 }
 0x147   : > { %s5710_s4 = sand.u32 (!%p6262_p2), 1, %s5235_s23   ;;  %p6263_p10 = scmp.ne.s32.totalorder (!%p6262_p2), %s6257_s1, 0 }
 0x148   : > { %4353 = dma.hbm_to_vmem [thread:$0]  (!%p6261_p5), %s5691_s11, 128, %s1154_s16, %s1143_s28  }
 0x149   : > { %1182 = sbr.rel (%p6262_p2) target bundleno = 4033 (0xfc1), region = 148  ;;  %s5713_s8 = sshll.u32 (!%p6262_p2), %s5710_s4, 3 }
 0x14a   : > { %s1185_s9 = scalar_lea.sflag (!%p6262_p2), [#allocation3], %s5710_s4  ;;  %s6199_s18 = scalar_lea.vmem (!%p6262_p2), [#allocation2], %s5713_s8 }
 0x14e   : > { %5182 = dma.done.wait (%p6263_p10), %s1185_s9, 128  }
 0x14f   : > { %5184 = vsyncadd (%p6263_p10), %s1185_s9, 4294967168  ;;  %p6264_p6 = scmp.eq.s32.totalorder %s5526_s2, 0 }
 0x151   : > { %5186 = dma.done.wait (%p6264_p6), [#allocation6], 272   ;;  %p6265_p12 = pmov %p6264_p6 }
 0x152   : > { %p6266_p0 = pmov %p6264_p6 }
 0x153   : > { %5188 = vsyncadd (%p6265_p12), [#allocation6], 4294967024 }
 0x154   : > { %5190 = dma.done.wait (%p6266_p0), [#allocation9], 272   ;;  %p6267_p7 = pmov %p6266_p0 }
 0x155   : > { %p6268_p9 = pmov %p6266_p0 }
 0x156   : > { %5192 = vsyncadd (%p6267_p7), [#allocation9], 4294967024 }
 0x157   : > { %5194 = dma.done.wait (%p6268_p9), [#allocation12], 32   ;;  %p6269_p8 = pmov %p6266_p0 }
 0x158   : > { %p6270_p11 = pmov %p6266_p0 }
 0x159   : > { %5196 = vsyncadd (%p6269_p8), [#allocation12], 4294967264 }
 0x15a   : > { %5198 = dma.done.wait (%p6270_p11), [#allocation15], 272   ;;  %p6271_p1 = pmov %p6266_p0 }
 0x15b   : > { %p6272_p4 = pmov %p6266_p0 }
 0x15c   : > { %5200 = vsyncadd (%p6271_p1), [#allocation15], 4294967024 }
 0x15d   : > { %5202 = dma.done.wait (%p6272_p4), [#allocation18], 32   ;;  %p6273_p3 = pmov %p6266_p0 }
 0x15e   : > { %p6274_p13 = pmov %p6266_p0 }
 0x15f   : > { %5204 = vsyncadd (%p6273_p3), [#allocation18], 4294967264 }
 0x160   : > { %5206 = dma.done.wait (%p6274_p13), [#allocation21], 272   ;;  %p6275_p5 = pmov %p6266_p0 }
 0x161   : > { %p6276_p2 = pmov %p6266_p0 }
 0x162   : > { %5208 = vsyncadd (%p6275_p5), [#allocation21], 4294967024 }
 0x163   : > { %5210 = dma.done.wait (%p6276_p2), [#allocation24], 32   ;;  %p6277_p10 = pmov %p6266_p0 }
 0x164   : > { %p6278_p6 = pmov %p6266_p0 }
 0x165   : > { %5212 = vsyncadd (%p6277_p10), [#allocation24], 4294967264 }
 0x166   : > { %5214 = dma.done.wait (%p6278_p6), [#allocation27], 32   ;;  %p6279_p12 = pmov %p6266_p0 }
 0x168   : > { %5216 = vsyncadd (%p6279_p12), [#allocation27], 4294967264 }
 0x169   : > { %5218 = dma.done.wait (%p6266_p0), [#allocation30], 16   ;;  %p6280_p7 = pmov %p6266_p0 }
 0x16a   : > { %s6281_s3 = sld [smem:[#allocation48_spill]]  ;;  %p1369_p9 = scmp.lt.s32.totalorder %s5526_s2, 1  ;;  %vm1422_vm0 = vcmask 523264   ;;  %vm1391_vm1 = vcmask 261120   ;;  %v1386_v2 = vld [vmem:[%s6199_s18] sm:$0xff]  ;;  %v4520_v22 = vld [vmem:[#allocation5 + $0x8] sm:$0xff]  }
 0x16b   : > { %5220 = vsyncadd (%p6280_p7), [#allocation30], 4294967280  ;;  %v1392_v5 = vsel %vm1391_vm1, %v1386_v2, 0.0  ;;  %s6282_s11 = sld [smem:[#allocation57_spill]]  ;;  %v5300_v23 = vmov 0.0   ;;  %v4522_v25 = vld [vmem:[#allocation5] sm:$0xff]  }
 0x16c   : > { %s5759_s7 = scalar_select %p1369_p9, %s5526_s2, 1  ;;  %1393 = vadd.xlane.f32.xlu1 %v1392_v5  ;;  %4022 = vmatprep.subr.bf16.mxu1 %v5300_v23  ;;  %vm5301_vm2 = vmmov 0   ;;  %v3849_v55 = vld [vmem:[#allocation7] ss:$0 sm:$0xff]  ;;  %v3853_v59 = vld [vmem:[#allocation8] ss:$0 sm:$0xff] }
 0x16d   : > { %4014 = vmatprep.subr.bf16.mxu0 %v5300_v23  ;;  %4018 = vmatprep.mubr.msk.bf16.mxu0 %vm5301_vm2, %v5300_v23  ;;  %s6283_s16 = sld [smem:[#allocation53_spill]]  ;;  %vm1636_vm3 = vcmask 64512   ;;  %vm1683_vm6 = vcmask 130048   ;;  %vm2086_vm7 = vcmask 195584   ;;  %vm2387_vm8 = vcmask 1043456   ;;  %p6298_p11 = scmp.ne.s32.totalorder %s6258_s6, 0 }
 0x16e   : > { %s6200_s28 = sshll.u32 %s5759_s7, 4  ;;  %4015 = vmatpush3.bf16.msra.mxu0 %v4520_v22  ;;  %4030 = vmatprep.mubr.msk.bf16.mxu1 %vm5301_vm2, %v5300_v23  ;;  %s6284_s15 = sld [smem:[#allocation51_spill]]  ;;  %vm2838_vm9 = vcmask 392192  }
 0x16f   : > { %4016 = vmatprep.subr.bf16.mxu0 %v5300_v23  ;;  %s6285_s10 = sld [smem:[#allocation54_spill]] }
 0x170   : > { %s5765_s1 = scalar_lea.vmem %s6281_s3, %s6200_s28  ;;  %s6286_s9 = sld [smem:[#allocation52_spill]] }
 0x171   : > { %v1387_v0 = vld [vmem:[%s5765_s1] sm:$0xff]  ;;  %v1388_v1 = vld [vmem:[%s5765_s1 + $0x8] sm:$0xff]  ;;  %v4518_v21 = vld [vmem:[%s6282_s11 + $0x18] sm:$0xff]   ;;  %s5302_s3 = smov 120   ;;  %s6289_s18 = sld [smem:[#allocation60_spill]] }
 0x172   : > { %v1423_v3 = vsel %vm1422_vm0, %v1387_v0, 0.0  ;;  %v1426_v4 = vsel %vm1422_vm0, %v1388_v1, 0.0  ;;  %4023 = vmatpush3.bf16.msra.mxu1 %v4518_v21  ;;  %v4519_v24 = vld [vmem:[%s6282_s11 + $0x10] sm:$0xff]   ;;  %v4521_v26 = vld [vmem:[%s6282_s11 + $0x8] sm:$0xff]   ;;  %4017 = vmatpush3.bf16.msra.mxu0 %v4522_v25  ;;  %v4523_v27 = vld [vmem:[%s6282_s11] sm:$0xff]   ;;  %s5312_s28 = smov 24  }
 0x173   : > { %1424 = vadd.xlane.f32.xlu0 %v1423_v3  ;;  %4024 = vmatprep.subr.bf16.mxu1 %v5300_v23  ;;  %v3847_v39 = vld [vmem:[%s6283_s16] ss:$0 sm:$0xff]  ;;  %s6287_s16 = sld [smem:[#allocation49_spill]]  ;;  %s5316_s11 = smov [#allocation31]  }
 0x174   : > { %4034 = vmatprep.subr.bf16.mxu0 %v5300_v23  ;;  %v3845_v42 = vld [vmem:[%s6284_s15] ss:$0 sm:$0xff]  ;;  %s5303_s15 = smov 112   ;;  %s5091_s12 = sshll.u32 %s5316_s11, 4  ;;  %s5092_s12 = int_to_ptr.vmem [resolvable:$false] %s5091_s12 }
 0x175   : > { %v3848_v46 = vld [vmem:[%s6285_s10] ss:$0 sm:$0xff]  ;;  %s5304_s10 = smov 104   ;;  %s5093_s13 = scalar_lea.vmem %s5092_s12, 256 }
 0x176   : > { %4025 = vmatpush3.bf16.msra.mxu1 %v4519_v24  ;;  %v3846_v47 = vld [vmem:[%s6286_s9] ss:$0 sm:$0xff] }
 0x177   : > { %1427 = vadd.xlane.f32.xlu0 %v1426_v4  ;;  %4026 = vmatprep.subr.bf16.mxu1 %v5300_v23 }
 0x179   : > { %s1376_s9 = scalar_lea.vmem %s6287_s16, %s5759_s7 }
 0x17a   : > { %4027 = vmatpush3.bf16.msra.mxu1 %v4521_v26 }
 0x17b   : > { %4028 = vmatprep.subr.bf16.mxu1 %v5300_v23 }
 0x17e   : > { %4029 = vmatpush3.bf16.msra.mxu1 %v4523_v27 }
 0x17f   : > { %4046 = vmatprep.subr.bf16.mxu1 %v5300_v23 }
 0x1f5   : > { %v1394_v7 = vpop.xlane.xlu1 %1393 }
 0x1f6   : > { %v1396_v9 = vmul.f32 0.03125, %v1394_v7  ;;  %v1631_v7 = vlaneseq }
 0x1f8   : > { %v1397_v11 = vsub.f32 %v1386_v2, %v1396_v9  ;;  %v1632_v9 = vshrl.u32 %v1631_v7, 7 }
 0x1fa   : > { %v1398_v15 = vmul.f32 %v1397_v11, %v1397_v11 }
 0x1fc   : > { %v1425_v6 = vpop.xlane.xlu0 %1424  ;;  %v1399_v19 = vsel %vm1391_vm1, %v1398_v15, 0.0 }
 0x1fd   : > { %v1430_v8 = vmul.f32 0.015625, %v1425_v6 }
 0x1ff   : > { %v1432_v10 = vsub.f32 %v1387_v0, %v1430_v8  ;;  %v1468_v8 = vld [vmem:[%s1376_s9] sm:$0x1]  ;;  %s5307_s9 = smov 80  }
 0x200   : > { %v1428_v12 = vpop.xlane.xlu0 %1427  ;;  %vm1469_vm4 = vcmp.gt.f32.partialorder %v1468_v8, 0.5 }
 0x201   : > { %v1431_v13 = vmul.f32 0.015625, %v1428_v12  ;;  %v1434_v14 = vmul.f32 %v1432_v10, %v1432_v10  ;;  %v1633_v12 = vsub.s32 0, %v1632_v9 }
 0x203   : > { %v1433_v16 = vsub.f32 %v1388_v1, %v1431_v13  ;;  %v1436_v17 = vsel %vm1422_vm0, %v1434_v14, 0.0 }
 0x204   : > { %1437 = vadd.xlane.f32.xlu1 %v1436_v17 }
 0x205   : > { %v1435_v18 = vmul.f32 %v1433_v16, %v1433_v16 }
 0x207   : > { %v1439_v20 = vsel %vm1422_vm0, %v1435_v18, 0.0 }
 0x208   : > { %1440 = vadd.xlane.f32.xlu0 %v1439_v20  ;;  %1400 = vadd.xlane.f32.xlu1 %v1399_v19 }
 0x28d   : > { %v1438_v28 = vpop.xlane.xlu1 %1437 }
 0x28e   : > { %v1442_v29 = vmul.f32 0.015625, %v1438_v28 }
 0x290   : > { %v1444_v30 = vadd.f32 1e-05, %v1442_v29 }
 0x291   : > { %v1441_v31 = vpop.xlane.xlu0 %1440  ;;  %v1401_v32 = vpop.xlane.xlu1 %1400 }
 0x292   : > { %4554 = vrsqrt.f32 %v1444_v30  ;;  %v1443_v33 = vmul.f32 0.015625, %v1441_v31  ;;  %v1402_v34 = vmul.f32 0.03125, %v1401_v32 }
 0x294   : > { %v1445_v35 = vadd.f32 1e-05, %v1443_v33  ;;  %v1403_v36 = vadd.f32 1e-05, %v1402_v34 }
 0x296   : > { %4556 = vrsqrt.f32 %v1445_v35 }
 0x297   : > { %4558 = vrsqrt.f32 %v1403_v36 }
 0x29f   : > { %v4555_v37 = vpop.eup %4554 }
 0x2a0   : > { %v1448_v38 = vmul.f32 %v4555_v37, %v1432_v10  ;;  %v5305_v10 = vmov -1e+30  }
 0x2a2   : > { %v1456_v44 = vmul.f32 %v3847_v39, %v1448_v38 }
 0x2a3   : > { %v4557_v40 = vpop.eup %4556 }
 0x2a4   : > { %v4559_v41 = vpop.eup %4558  ;;  %v1449_v43 = vmul.f32 %v4557_v40, %v1433_v16  ;;  %v1464_v50 = vadd.f32 %v3848_v46, %v1456_v44 }
 0x2a5   : > { %v1405_v45 = vmul.f32 %v4559_v41, %v1397_v11  ;;  %v1470_v11 = vsel %vm1469_vm4, 0.0, %v5305_v10 }
 0x2a6   : > { %v1457_v48 = vmul.f32 %v3847_v39, %v1449_v43  ;;  %v5824_v13 = vrot.slane %v1470_v11, %v1633_v12 }
 0x2a7   : > { %v1412_v49 = vmul.f32 %v3845_v42, %v1405_v45 }
 0x2a8   : > { %v1465_v51 = vadd.f32 %v3848_v46, %v1457_v48 }
 0x2a9   : > { %v1419_v52 = vadd.f32 %v3846_v47, %v1412_v49 }
 0x2aa   : > { %v5797_v53 = vpack.c.bf16 %v1465_v51, %v1464_v50 }
 0x2ab   : > { %v5799_v54 = vpack.c.bf16 %v1419_v52, %v1419_v52 }
 0x2ac   : > { %4031 = vmatmul.mubr.msk.bf16.vlgmr.msra.gmra.mxu1 %vm1422_vm0, %v5797_v53 }
 0x2ad   : > { %4019 = vmatmul.mubr.msk.bf16.vlgmr.msra.gmra.mxu0 %vm1391_vm1, %v5799_v54  ;;  %4048 = vmatprep.mubr.msk.bf16.mxu1 %vm5301_vm2, %v5300_v23 }
 0x2ae   : > { %4036 = vmatprep.mubr.msk.bf16.mxu0 %vm5301_vm2, %v5300_v23 }
 0x36c   : > { %v1621_v56 = vpop.f32.mrf.mxu1 }
 0x36d   : > { %v1548_v57 = vpop.f32.mrf.mxu0  ;;  %v1622_v0 = vadd.f32 %v3853_v59, %v1621_v56 }
 0x36e   : > { %v1549_v58 = vadd.f32 %v3849_v55, %v1548_v57  ;;  %v4032_v60 = vpop.f32.mrf.mxu1 }
 0x36f   : > { %v4020_v61 = vpop.f32.mrf.mxu0 }
 0x370   : > { %v1628_v62 = vpack.c.bf16 %v1549_v58, %v1549_v58  ;;  %v1624_v63 = vpop.f32.mrf.mxu1 }
 0x371   : > { %v1551_v1 = vpop.f32.mrf.mxu0  ;;  %v1625_v2 = vadd.f32 %v3853_v59, %v1624_v63 }
 0x372   : > { %1745 = vrot.lane.b32.xlu1 %v1628_v62, %s5302_s3  ;;  %v4033_v3 = vpop.f32.mrf.mxu1 }
 0x373   : > { %v5809_v4 = vpack.c.bf16 %v1625_v2, %v1622_v0  ;;  %v4021_v5 = vpop.f32.mrf.mxu0 }
 0x375   : > { %1747 = vrot.lane.b32.xlu0 %v5809_v4, %s5302_s3  ;;  %v1641_v6 = vsel %vm1636_vm3, %v5809_v4, 0  ;;  %s6288_s3 = sld [smem:[#allocation50_spill]] }
 0x376   : > { %1856 = vrot.lane.b32.xlu1 %v5809_v4, %s5303_s15  ;;  %4035 = vmatpush3.bf16.xpose.msra.mxu0 %v1641_v6 }
 0x377   : > { %4040 = vmatprep.subr.bf16.mxu0 %v5300_v23 }
 0x379   : > { %1965 = vrot.lane.b32.xlu0 %v5809_v4, %s5304_s10 }
 0x37a   : > { %1854 = vrot.lane.b32.xlu1 %v1628_v62, %s5303_s15 }
 0x37b   : > { %s1379_s16 = scalar_lea.vmem %s6288_s3, %s5759_s7  ;;  %s5308_s3 = smov 96  }
 0x37c   : > { %v1471_v24 = vld [vmem:[%s1379_s16] sm:$0x1]  ;;  %s5309_s16 = smov 72  }
 0x37d   : > { %4037 = vmatmul.mubr.msk.bf16.vlgmr.msra.gmra.mxu0 %vm1636_vm3, %v1628_v62  ;;  %vm1472_vm5 = vcmp.gt.f32.partialorder %v1471_v24, 0.5 }
 0x37e   : > { %1963 = vrot.lane.b32.xlu1 %v1628_v62, %s5304_s10  ;;  %4042 = vmatprep.mubr.msk.bf16.mxu0 %vm5301_vm2, %v5300_v23  ;;  %v1473_v25 = vsel %vm1472_vm5, 0.0, %v5305_v10  ;;  %s5306_s10 = smov 88  }
 0x37f   : > { %v1634_v26 = vrot.slane %v1473_v25, %v1633_v12 }
 0x3e4   : > { %v1746_v14 = vpop.permute.xlu1 %1745 }
 0x3e7   : > { %v1748_v15 = vpop.permute.xlu0 %1747 }
 0x3e8   : > { %v1753_v16 = vsel %vm1636_vm3, %v1748_v15, 0  ;;  %v1857_v17 = vpop.permute.xlu1 %1856 }
 0x3e9   : > { %4047 = vmatpush3.bf16.xpose.msra.mxu1 %v1753_v16  ;;  %v1862_v18 = vsel %vm1636_vm3, %v1857_v17, 0 }
 0x3ea   : > { %4058 = vmatprep.subr.bf16.mxu1 %v5300_v23 }
 0x3eb   : > { %v1966_v19 = vpop.permute.xlu0 %1965 }
 0x3ec   : > { %v1855_v20 = vpop.permute.xlu1 %1854  ;;  %v1971_v21 = vsel %vm1636_vm3, %v1966_v19, 0 }
 0x3f0   : > { %4049 = vmatmul.mubr.msk.bf16.vlgmr.msra.gmra.mxu1 %vm1636_vm3, %v1746_v14  ;;  %v1964_v22 = vpop.permute.xlu1 %1963 }
 0x3f1   : > { %4059 = vmatpush3.bf16.xpose.msra.mxu1 %v1862_v18  ;;  %4060 = vmatprep.mubr.msk.bf16.mxu1 %vm5301_vm2, %v5300_v23 }
 0x3f2   : > { %4070 = vmatprep.subr.bf16.mxu1 %v5300_v23 }
 0x3f8   : > { %4061 = vmatmul.mubr.msk.bf16.vlgmr.msra.gmra.mxu1 %vm1636_vm3, %v1855_v20 }
 0x3f9   : > { %4071 = vmatpush3.bf16.xpose.msra.mxu1 %v1971_v21  ;;  %4072 = vmatprep.mubr.msk.bf16.mxu1 %vm5301_vm2, %v5300_v23 }
 0x3fa   : > { %4082 = vmatprep.subr.bf16.mxu1 %v5300_v23 }
 0x400   : > { %4073 = vmatmul.mubr.msk.bf16.vlgmr.msra.gmra.mxu1 %vm1636_vm3, %v1964_v22 }
 0x401   : > { %4086 = vmatprep.mubr.msk.bf16.mxu1 %vm5301_vm2, %v5300_v23 }
 0x43d   : > { %v1677_v27 = vpop.f32.mrf.mxu0 }
 0x43e   : > { %v1678_v28 = vadd.f32 %v1677_v27, %v1634_v26 }
 0x43f   : > { %v4038_v29 = vpop.f32.mrf.mxu0 }
 0x440   : > { %v1684_v30 = vsel %vm1683_vm6, %v1678_v28, -inf }
 0x441   : > { %1685 = vmax.xlane.f32.xlu0 %v1684_v30  ;;  %v1680_v31 = vpop.f32.mrf.mxu0 }
 0x443   : > { %v4039_v32 = vpop.f32.mrf.mxu0 }
 0x4b0   : > { %v1789_v33 = vpop.f32.mrf.mxu1 }
 0x4b1   : > { %v1790_v34 = vadd.f32 %v1789_v33, %v1634_v26 }
 0x4b2   : > { %v4050_v35 = vpop.f32.mrf.mxu1 }
 0x4b3   : > { %v1795_v36 = vsel %vm1683_vm6, %v1790_v34, -inf }
 0x4b4   : > { %1796 = vmax.xlane.f32.xlu1 %v1795_v36  ;;  %v1792_v37 = vpop.f32.mrf.mxu1 }
 0x4b6   : > { %v4051_v38 = vpop.f32.mrf.mxu1 }
 0x4b7   : > { %v4524_v38 = vld [vmem:[#allocation10 + $0x8] sm:$0xff]  }
 0x4b8   : > { %v1898_v39 = vpop.f32.mrf.mxu1  ;;  %4083 = vmatpush3.bf16.msra.mxu1 %v4524_v38 }
 0x4b9   : > { %v1899_v40 = vadd.f32 %v1898_v39, %v1634_v26  ;;  %4084 = vmatprep.subr.bf16.mxu1 %v5300_v23 }
 0x4ba   : > { %v4062_v41 = vpop.f32.mrf.mxu1 }
 0x4bb   : > { %v1904_v42 = vsel %vm1683_vm6, %v1899_v40, -inf }
 0x4bc   : > { %v1901_v43 = vpop.f32.mrf.mxu1  ;;  %1905 = vmax.xlane.f32.xlu0 %v1904_v42 }
 0x4be   : > { %v4063_v44 = vpop.f32.mrf.mxu1 }
 0x4c0   : > { %v2007_v45 = vpop.f32.mrf.mxu1 }
 0x4c1   : > { %v2008_v46 = vadd.f32 %v2007_v45, %v1634_v26 }
 0x4c2   : > { %v4074_v47 = vpop.f32.mrf.mxu1 }
 0x4c3   : > { %v2013_v48 = vsel %vm1683_vm6, %v2008_v46, -inf }
 0x4c4   : > { %v2010_v49 = vpop.f32.mrf.mxu1  ;;  %2014 = vmax.xlane.f32.xlu0 %v2013_v48 }
 0x4c6   : > { %v4075_v50 = vpop.f32.mrf.mxu1 }
 0x4ca   : > { %v1686_v51 = vpop.xlane.xlu0 %1685 }
 0x4cb   : > { %v1687_v52 = vsub.f32 %v1678_v28, %v1686_v51 }
 0x4cd   : > { %v1688_v55 = vmul.f32 1.442695, %v1687_v52 }
 0x4cf   : > { %4560 = vpow2.f32 %v1688_v55 }
 0x4dc   : > { %v4561_v56 = vpop.eup %4560 }
 0x4dd   : > { %v1690_v57 = vsel %vm1683_vm6, %v4561_v56, 0.0 }
 0x4de   : > { %1691 = vadd.xlane.f32.xlu0 %v1690_v57 }
 0x53d   : > { %v1797_v58 = vpop.xlane.xlu1 %1796 }
 0x53e   : > { %v1798_v59 = vsub.f32 %v1790_v34, %v1797_v58 }
 0x540   : > { %v1799_v60 = vmul.f32 1.442695, %v1798_v59 }
 0x542   : > { %4562 = vpow2.f32 %v1799_v60 }
 0x545   : > { %v1906_v61 = vpop.xlane.xlu0 %1905 }
 0x546   : > { %v1907_v62 = vsub.f32 %v1899_v40, %v1906_v61  ;;  %v4525_v40 = vld [vmem:[#allocation10] sm:$0xff]   ;;  %v4526_v61 = vld [vmem:[%s6289_s18 + $0x18] sm:$0xff]  }
 0x547   : > { %4085 = vmatpush3.bf16.msra.mxu1 %v4525_v40 }
 0x548   : > { %v1908_v63 = vmul.f32 1.442695, %v1907_v62  ;;  %4090 = vmatprep.subr.bf16.mxu1 %v5300_v23 }
 0x54a   : > { %4564 = vpow2.f32 %v1908_v63  ;;  %v4527_v63 = vld [vmem:[%s6289_s18 + $0x10] sm:$0xff]  }
 0x54d   : > { %v2015_v5 = vpop.xlane.xlu0 %2014 }
 0x54e   : > { %v2016_v6 = vsub.f32 %v2008_v46, %v2015_v5 }
 0x54f   : > { %v4563_v0 = vpop.eup %4562 }
 0x550   : > { %v1801_v1 = vsel %vm1683_vm6, %v4563_v0, 0.0  ;;  %v2017_v7 = vmul.f32 1.442695, %v2016_v6 }
 0x551   : > { %1802 = vadd.xlane.f32.xlu1 %v1801_v1  ;;  %v4529_v1 = vld [vmem:[%s6289_s18] sm:$0xff]  }
 0x552   : > { %4566 = vpow2.f32 %v2017_v7 }
 0x557   : > { %v4565_v2 = vpop.eup %4564 }
 0x558   : > { %v1910_v3 = vsel %vm1683_vm6, %v4565_v2, 0.0 }
 0x559   : > { %1911 = vadd.xlane.f32.xlu0 %v1910_v3  ;;  %v4531_v3 = vld [vmem:[#allocation14] sm:$0xff]  }
 0x55f   : > { %v4567_v8 = vpop.eup %4566 }
 0x560   : > { %v2019_v9 = vsel %vm1683_vm6, %v4567_v8, 0.0 }
 0x562   : > { %1807 = vrot.lane.b32.xlu1 %v5809_v4, %s5306_s10  ;;  %s6198_s10 = scalar_lea.vmem [#allocation34], %s5713_s8 }
 0x566   : > { %1916 = vrot.lane.b32.xlu1 %v5809_v4, %s5307_s9 }
 0x567   : > { %v1692_v10 = vpop.xlane.xlu0 %1691 }
 0x568   : > { %4568 = vrcp.f32 %v1692_v10 }
 0x56f   : > { %1697 = vrot.lane.b32.xlu0 %v5809_v4, %s5308_s3 }
 0x575   : > { %v4569_v12 = vpop.eup %4568 }
 0x576   : > { %v1694_v15 = vmul.f32 %v4569_v12, %v4561_v56 }
 0x578   : > { %v1695_v17 = vpack.c.bf16 %v1694_v15, %v1694_v15 }
 0x58a   : > { %2020 = vadd.xlane.f32.xlu1 %v2019_v9  ;;  %v3871_v9 = vld [vmem:[#allocation13] ss:$0 sm:$0xff] }
 0x59b   : > { %2025 = vrot.lane.b32.xlu1 %v5809_v4, %s5309_s16  ;;  %s6201_s16 = smov 8  }
 0x5da   : > { %v1803_v11 = vpop.xlane.xlu1 %1802 }
 0x5db   : > { %4570 = vrcp.f32 %v1803_v11 }
 0x5de   : > { %v1808_v19 = vpop.permute.xlu1 %1807 }
 0x5e2   : > { %v1912_v14 = vpop.xlane.xlu0 %1911  ;;  %v1917_v22 = vpop.permute.xlu1 %1916 }
 0x5e3   : > { %4572 = vrcp.f32 %v1912_v14 }
 0x5e6   : > { %v1698_v16 = vpop.permute.xlu0 %1697 }
 0x5e7   : > { %4041 = vmatpush3.bf16.msra.mxu0 %v1698_v16  ;;  %v3877_v16 = vld [vmem:[#allocation16] ss:$0 sm:$0xff] }
 0x5e8   : > { %4052 = vmatprep.subr.bf16.mxu0 %v5300_v23  ;;  %v4571_v18 = vpop.eup %4570 }
 0x5e9   : > { %v1805_v4 = vmul.f32 %v4571_v18, %v4563_v0  ;;  %v4528_v0 = vld [vmem:[%s6289_s18 + $0x8] sm:$0xff]  }
 0x5ea   : > { %4043 = vmatmul.mubr.msk.bf16.vlgmr.msra.gmra.mxu0 %vm1683_vm6, %v1695_v17 }
 0x5eb   : > { %4053 = vmatpush3.bf16.msra.mxu0 %v1808_v19  ;;  %4054 = vmatprep.mubr.msk.bf16.mxu0 %vm5301_vm2, %v5300_v23  ;;  %v1806_v20 = vpack.c.bf16 %v1805_v4, %v1805_v4  ;;  %v1853_v28 = vadd.f32 %v1805_v4, %v1694_v15 }
 0x5ec   : > { %4064 = vmatprep.subr.bf16.mxu0 %v5300_v23 }
 0x5f0   : > { %v4573_v21 = vpop.eup %4572 }
 0x5f1   : > { %v1914_v24 = vmul.f32 %v4573_v21, %v4565_v2  ;;  %v4530_v2 = vld [vmem:[#allocation14 + $0x8] sm:$0xff]  }
 0x5f2   : > { %4055 = vmatmul.mubr.msk.bf16.vlgmr.msra.gmra.mxu0 %vm1683_vm6, %v1806_v20 }
 0x5f3   : > { %4065 = vmatpush3.bf16.msra.mxu0 %v1917_v22  ;;  %4066 = vmatprep.mubr.msk.bf16.mxu0 %vm5301_vm2, %v5300_v23  ;;  %v1915_v25 = vpack.c.bf16 %v1914_v24, %v1914_v24  ;;  %v1962_v30 = vadd.f32 %v1914_v24, %v1853_v28 }
 0x5f4   : > { %4076 = vmatprep.subr.bf16.mxu0 %v5300_v23 }
 0x5fa   : > { %4067 = vmatmul.mubr.msk.bf16.vlgmr.msra.gmra.mxu0 %vm1683_vm6, %v1915_v25 }
 0x5fb   : > { %4078 = vmatprep.mubr.msk.bf16.mxu0 %vm5301_vm2, %v5300_v23 }
 0x613   : > { %v2021_v26 = vpop.xlane.xlu1 %2020 }
 0x614   : > { %4574 = vrcp.f32 %v2021_v26 }
 0x617   : > { %v2026_v27 = vpop.permute.xlu1 %2025 }
 0x618   : > { %4077 = vmatpush3.bf16.msra.mxu0 %v2026_v27 }
 0x619   : > { %4116 = vmatprep.subr.bf16.mxu0 %v5300_v23 }
 0x621   : > { %v4575_v29 = vpop.eup %4574 }
 0x622   : > { %v2023_v31 = vmul.f32 %v4575_v29, %v4567_v8 }
 0x624   : > { %v2024_v32 = vpack.c.bf16 %v2023_v31, %v2023_v31  ;;  %v2071_v33 = vadd.f32 %v2023_v31, %v1962_v30 }
 0x626   : > { %4079 = vmatmul.mubr.msk.bf16.vlgmr.msra.gmra.mxu0 %vm1683_vm6, %v2024_v32  ;;  %v2150_v34 = vmul.f32 0.25, %v2071_v33 }
 0x627   : > { %4118 = vmatprep.mubr.msk.bf16.mxu0 %vm5301_vm2, %v5300_v23 }
 0x628   : > { %3350 = vst.msk [vmem:[%s6198_s10] sm:$0xff] %vm1683_vm6, %v2150_v34  ;;  %s5311_s10 = smov 16  }
 0x6aa   : > { %v1737_v35 = vpop.f32.mrf.mxu0 }
 0x6ac   : > { %v4044_v36 = vpop.f32.mrf.mxu0 }
 0x6ae   : > { %v1740_v37 = vpop.f32.mrf.mxu0 }
 0x6b0   : > { %v4045_v39 = vpop.f32.mrf.mxu0 }
 0x6b2   : > { %v1847_v41 = vpop.f32.mrf.mxu0 }
 0x6b3   : > { %2073 = vrot.lane.b32.xlu0 %v1847_v41, %s6201_s16  ;;  %s6291_s16 = sld [smem:[#allocation62_spill]] }
 0x6b4   : > { %v4056_v42 = vpop.f32.mrf.mxu0 }
 0x6b6   : > { %v1850_v43 = vpop.f32.mrf.mxu0 }
 0x6b8   : > { %v4057_v44 = vpop.f32.mrf.mxu0 }
 0x6ba   : > { %v1956_v45 = vpop.f32.mrf.mxu0 }
 0x6bb   : > { %2077 = vrot.lane.b32.xlu1 %v1956_v45, %s5311_s10 }
 0x6bc   : > { %v4068_v46 = vpop.f32.mrf.mxu0 }
 0x6be   : > { %v1959_v47 = vpop.f32.mrf.mxu0 }
 0x6c0   : > { %v4069_v48 = vpop.f32.mrf.mxu0 }
 0x6e6   : > { %v2065_v49 = vpop.f32.mrf.mxu0 }
 0x6e7   : > { %2081 = vrot.lane.b32.xlu0 %v2065_v49, %s5312_s28  ;;  %s5313_s28 = smov 64  }
 0x6e8   : > { %v4080_v50 = vpop.f32.mrf.mxu0 }
 0x6ea   : > { %v2068_v51 = vpop.f32.mrf.mxu0 }
 0x6ec   : > { %v4081_v52 = vpop.f32.mrf.mxu0 }
 0x725   : > { %v2074_v55 = vpop.permute.xlu0 %2073 }
 0x726   : > { %v2084_v57 = vsel %vm1636_vm3, %v1737_v35, %v2074_v55 }
 0x72d   : > { %v2078_v56 = vpop.permute.xlu1 %2077 }
 0x72e   : > { %v2085_v58 = vsel %vm1683_vm6, %v2084_v57, %v2078_v56 }
 0x759   : > { %v2082_v59 = vpop.permute.xlu0 %2081 }
 0x75a   : > { %v2087_v60 = vsel %vm2086_vm7, %v2085_v58, %v2082_v59 }
 0x75b   : > { %v2088_v62 = vpack.c.bf16 %v2087_v60, %v2087_v60 }
 0x75d   : > { %4087 = vmatmul.mubr.msk.bf16.vlgmr.msra.gmra.mxu1 %vm1391_vm1, %v2088_v62 }
 0x75e   : > { %4091 = vmatpush3.bf16.msra.mxu1 %v4526_v61  ;;  %4098 = vmatprep.mubr.msk.bf16.mxu1 %vm5301_vm2, %v5300_v23 }
 0x75f   : > { %4092 = vmatprep.subr.bf16.mxu1 %v5300_v23 }
 0x762   : > { %4093 = vmatpush3.bf16.msra.mxu1 %v4527_v63 }
 0x763   : > { %4094 = vmatprep.subr.bf16.mxu1 %v5300_v23 }
 0x766   : > { %4095 = vmatpush3.bf16.msra.mxu1 %v4528_v0 }
 0x767   : > { %4096 = vmatprep.subr.bf16.mxu1 %v5300_v23 }
 0x76a   : > { %4097 = vmatpush3.bf16.msra.mxu1 %v4529_v1 }
 0x76b   : > { %4102 = vmatprep.subr.bf16.mxu1 %v5300_v23 }
 0x76d   : > { %4099 = vmatmul.mubr.msk.bf16.vlgmr.msra.gmra.mxu1 %vm1422_vm0, %v5797_v53 }
 0x76e   : > { %4103 = vmatpush3.bf16.msra.mxu1 %v4530_v2  ;;  %4106 = vmatprep.mubr.msk.bf16.mxu1 %vm5301_vm2, %v5300_v23 }
 0x76f   : > { %4104 = vmatprep.subr.bf16.mxu1 %v5300_v23 }
 0x772   : > { %4105 = vmatpush3.bf16.msra.mxu1 %v4531_v3 }
 0x773   : > { %4110 = vmatprep.subr.bf16.mxu1 %v5300_v23 }
 0x775   : > { %4107 = vmatmul.mubr.msk.bf16.vlgmr.msra.gmra.mxu1 %vm1391_vm1, %v5799_v54 }
 0x776   : > { %4112 = vmatprep.mubr.msk.bf16.mxu1 %vm5301_vm2, %v5300_v23 }
 0x81d   : > { %v5904_v5 = vpop.f32.mrf.mxu1 }
 0x81f   : > { %v4088_v6 = vpop.f32.mrf.mxu1 }
 0x821   : > { %v2147_v53 = vpop.f32.mrf.mxu1 }
 0x823   : > { %v4089_v7 = vpop.f32.mrf.mxu1 }
 0x82d   : > { %v2238_v8 = vpop.f32.mrf.mxu1 }
 0x82e   : > { %v2239_v12 = vadd.f32 %v3871_v9, %v2238_v8 }
 0x82f   : > { %v4100_v10 = vpop.f32.mrf.mxu1 }
 0x831   : > { %v2241_v11 = vpop.f32.mrf.mxu1 }
 0x832   : > { %v2242_v14 = vadd.f32 %v3871_v9, %v2241_v11 }
 0x833   : > { %v4101_v15 = vpop.f32.mrf.mxu1 }
 0x834   : > { %v2303_v17 = vpack.c.bf16 %v2242_v14, %v2239_v12 }
 0x835   : > { %v2297_v18 = vpop.f32.mrf.mxu1 }
 0x836   : > { %v2298_v19 = vadd.f32 %v3877_v16, %v2297_v18  ;;  %2435 = vrot.lane.b32.xlu0 %v2303_v17, %s5303_s15 }
 0x837   : > { %v4108_v54 = vpop.f32.mrf.mxu1 }
 0x838   : > { %v5907_v4 = vpack.c.bf16 %v2298_v19, %v2298_v19 }
 0x839   : > { %v2300_v20 = vpop.f32.mrf.mxu1 }
 0x83a   : > { %2560 = vrot.lane.b32.xlu0 %v2303_v17, %s5308_s3  ;;  %2437 = vrot.lane.b32.xlu1 %v5907_v4, %s5303_s15  ;;  %v2315_v21 = vsel %vm1683_vm6, %v5907_v4, 0  ;;  %s5314_s15 = smov 32  }
 0x83b   : > { %v4109_v22 = vpop.f32.mrf.mxu1  ;;  %4111 = vmatpush3.bf16.xpose.msra.mxu1 %v2315_v21 }
 0x83c   : > { %4122 = vmatprep.subr.bf16.mxu1 %v5300_v23 }
 0x83e   : > { %2685 = vrot.lane.b32.xlu0 %v2303_v17, %s5307_s9  ;;  %2562 = vrot.lane.b32.xlu1 %v5907_v4, %s5308_s3  ;;  %s6290_s3 = sshll.u32 %s5759_s7, 4  ;;  %s6292_s7 = scalar_lea.vmem [#allocation2], %s5713_s8 }
 0x842   : > { %2687 = vrot.lane.b32.xlu1 %v5907_v4, %s5307_s9  ;;  %4113 = vmatmul.mubr.msk.bf16.vlgmr.msra.gmra.mxu1 %vm1683_vm6, %v2303_v17  ;;  %s5315_s9 = smov 48  }
 0x843   : > { %4124 = vmatprep.mubr.msk.bf16.mxu1 %vm5301_vm2, %v5300_v23 }
 0x8a8   : > { %v2436_v27 = vpop.permute.xlu0 %2435 }
 0x8ac   : > { %v2438_v24 = vpop.permute.xlu1 %2437  ;;  %v2561_v30 = vpop.permute.xlu0 %2560 }
 0x8ad   : > { %v2443_v25 = vsel %vm1683_vm6, %v2438_v24, 0 }
 0x8ae   : > { %4123 = vmatpush3.bf16.xpose.msra.mxu1 %v2443_v25 }
 0x8af   : > { %4134 = vmatprep.subr.bf16.mxu1 %v5300_v23 }
 0x8b0   : > { %v2563_v26 = vpop.permute.xlu1 %2562  ;;  %v2686_v32 = vpop.permute.xlu0 %2685 }
 0x8b1   : > { %v2568_v28 = vsel %vm1683_vm6, %v2563_v26, 0 }
 0x8b4   : > { %v2688_v29 = vpop.permute.xlu1 %2687 }
 0x8b5   : > { %4125 = vmatmul.mubr.msk.bf16.vlgmr.msra.gmra.mxu1 %vm1683_vm6, %v2436_v27  ;;  %v2693_v31 = vsel %vm1683_vm6, %v2688_v29, 0 }
 0x8b6   : > { %4135 = vmatpush3.bf16.xpose.msra.mxu1 %v2568_v28  ;;  %4136 = vmatprep.mubr.msk.bf16.mxu1 %vm5301_vm2, %v5300_v23 }
 0x8b7   : > { %4146 = vmatprep.subr.bf16.mxu1 %v5300_v23 }
 0x8bd   : > { %4137 = vmatmul.mubr.msk.bf16.vlgmr.msra.gmra.mxu1 %vm1683_vm6, %v2561_v30 }
 0x8be   : > { %4147 = vmatpush3.bf16.xpose.msra.mxu1 %v2693_v31  ;;  %4148 = vmatprep.mubr.msk.bf16.mxu1 %vm5301_vm2, %v5300_v23 }
 0x8bf   : > { %4158 = vmatprep.subr.bf16.mxu1 %v5300_v23 }
 0x8c5   : > { %4149 = vmatmul.mubr.msk.bf16.vlgmr.msra.gmra.mxu1 %vm1683_vm6, %v2686_v32 }
 0x8c6   : > { %4166 = vmatprep.mubr.msk.bf16.mxu1 %vm5301_vm2, %v5300_v23 }
 0x902   : > { %v2351_v33 = vpop.f32.mrf.mxu1 }
 0x903   : > { %v2352_v34 = vadd.f32 %v2351_v33, %v5824_v13 }
 0x904   : > { %v4114_v35 = vpop.f32.mrf.mxu1 }
 0x905   : > { %v2358_v36 = vsel %vm1636_vm3, %v2352_v34, -inf }
 0x906   : > { %2359 = vmax.xlane.f32.xlu1 %v2358_v36  ;;  %v2354_v37 = vpop.f32.mrf.mxu1 }
 0x907   : > { %v2355_v38 = vadd.f32 %v2354_v37, %v5824_v13 }
 0x908   : > { %v4115_v39 = vpop.f32.mrf.mxu1 }
 0x909   : > { %v2361_v40 = vsel %vm1636_vm3, %v2355_v38, -inf }
 0x90a   : > { %2362 = vmax.xlane.f32.xlu0 %v2361_v40 }
 0x975   : > { %v2479_v41 = vpop.f32.mrf.mxu1 }
 0x976   : > { %v2480_v42 = vadd.f32 %v2479_v41, %v5824_v13 }
 0x977   : > { %v4126_v43 = vpop.f32.mrf.mxu1 }
 0x978   : > { %v2486_v44 = vsel %vm1636_vm3, %v2480_v42, -inf }
 0x979   : > { %2487 = vmax.xlane.f32.xlu0 %v2486_v44  ;;  %v2482_v45 = vpop.f32.mrf.mxu1 }
 0x97a   : > { %v2483_v46 = vadd.f32 %v2482_v45, %v5824_v13 }
 0x97b   : > { %v4127_v47 = vpop.f32.mrf.mxu1 }
 0x97c   : > { %v2489_v48 = vsel %vm1636_vm3, %v2483_v46, -inf }
 0x97d   : > { %2490 = vmax.xlane.f32.xlu0 %v2489_v48  ;;  %v2604_v49 = vpop.f32.mrf.mxu1 }
 0x97e   : > { %v2605_v50 = vadd.f32 %v2604_v49, %v5824_v13 }
 0x97f   : > { %v4138_v51 = vpop.f32.mrf.mxu1 }
 0x980   : > { %v2611_v52 = vsel %vm1636_vm3, %v2605_v50, -inf }
 0x981   : > { %2612 = vmax.xlane.f32.xlu1 %v2611_v52  ;;  %v2607_v55 = vpop.f32.mrf.mxu1 }
 0x982   : > { %v2608_v56 = vadd.f32 %v2607_v55, %v5824_v13 }
 0x983   : > { %v4139_v57 = vpop.f32.mrf.mxu1 }
 0x984   : > { %v2614_v58 = vsel %vm1636_vm3, %v2608_v56, -inf }
 0x985   : > { %2615 = vmax.xlane.f32.xlu0 %v2614_v58  ;;  %v2729_v59 = vpop.f32.mrf.mxu1 }
 0x986   : > { %v2730_v60 = vadd.f32 %v2729_v59, %v5824_v13 }
 0x987   : > { %v4150_v61 = vpop.f32.mrf.mxu1 }
 0x988   : > { %v2736_v62 = vsel %vm1636_vm3, %v2730_v60, -inf }
 0x989   : > { %2737 = vmax.xlane.f32.xlu1 %v2736_v62  ;;  %v2732_v63 = vpop.f32.mrf.mxu1 }
 0x98a   : > { %v2733_v0 = vadd.f32 %v2732_v63, %v5824_v13 }
 0x98b   : > { %v4151_v1 = vpop.f32.mrf.mxu1 }
 0x98c   : > { %v2739_v2 = vsel %vm1636_vm3, %v2733_v0, -inf }
 0x98d   : > { %2740 = vmax.xlane.f32.xlu0 %v2739_v2 }
 0x98f   : > { %v2360_v7 = vpop.xlane.xlu1 %2359 }
 0x990   : > { %v2364_v9 = vsub.f32 %v2352_v34, %v2360_v7 }
 0x992   : > { %v2366_v13 = vmul.f32 1.442695, %v2364_v9 }
 0x993   : > { %v2363_v3 = vpop.xlane.xlu0 %2362 }
 0x994   : > { %v2365_v6 = vsub.f32 %v2355_v38, %v2363_v3 }
 0x996   : > { %v2368_v53 = vmul.f32 1.442695, %v2365_v6 }
 0x998   : > { %4576 = vpow2.f32 %v2368_v53 }
 0x999   : > { %4578 = vpow2.f32 %v2366_v13 }
 0x99a   : > { %2382 = vrot.lane.b32.xlu1 %v5907_v4, %s5313_s28  ;;  %s1384_s28 = scalar_lea.vmem %s5503_s29, %s6290_s3  ;;  %s6297_s3 = sld [smem:[#allocation74_spill]] }
 0x9a5   : > { %v5955_v8 = vpop.eup %4576 }
 0x9a6   : > { %v2373_v10 = vsel %vm1636_vm3, %v5955_v8, 0.0  ;;  %v4579_v11 = vpop.eup %4578 }
 0x9a7   : > { %2374 = vadd.xlane.f32.xlu0 %v2373_v10  ;;  %v2370_v12 = vsel %vm1636_vm3, %v4579_v11, 0.0 }
 0x9be   : > { %2371 = vadd.xlane.f32.xlu1 %v2370_v12 }
 0xa02   : > { %v2488_v14 = vpop.xlane.xlu0 %2487 }
 0xa03   : > { %v2492_v15 = vsub.f32 %v2480_v42, %v2488_v14 }
 0xa05   : > { %v2494_v16 = vmul.f32 1.442695, %v2492_v15 }
 0xa06   : > { %v2491_v17 = vpop.xlane.xlu0 %2490 }
 0xa07   : > { %4580 = vpow2.f32 %v2494_v16  ;;  %v2493_v18 = vsub.f32 %v2483_v46, %v2491_v17 }
 0xa09   : > { %v2496_v19 = vmul.f32 1.442695, %v2493_v18 }
 0xa0a   : > { %v2613_v54 = vpop.xlane.xlu1 %2612 }
 0xa0b   : > { %4582 = vpow2.f32 %v2496_v19  ;;  %v2617_v20 = vsub.f32 %v2605_v50, %v2613_v54 }
 0xa0d   : > { %v2619_v21 = vmul.f32 1.442695, %v2617_v20 }
 0xa0e   : > { %v2616_v22 = vpop.xlane.xlu0 %2615 }
 0xa0f   : > { %4584 = vpow2.f32 %v2619_v21  ;;  %v2618_v24 = vsub.f32 %v2608_v56, %v2616_v22 }
 0xa11   : > { %v2621_v25 = vmul.f32 1.442695, %v2618_v24 }
 0xa12   : > { %v2738_v26 = vpop.xlane.xlu1 %2737 }
 0xa13   : > { %4586 = vpow2.f32 %v2621_v25  ;;  %v2742_v27 = vsub.f32 %v2730_v60, %v2738_v26 }
 0xa14   : > { %v5960_v28 = vpop.eup %4580 }
 0xa15   : > { %v2744_v29 = vmul.f32 1.442695, %v2742_v27  ;;  %v2498_v30 = vsel %vm1636_vm3, %v5960_v28, 0.0 }
 0xa16   : > { %2499 = vadd.xlane.f32.xlu1 %v2498_v30  ;;  %v2383_v31 = vpop.permute.xlu1 %2382  ;;  %v2741_v32 = vpop.xlane.xlu0 %2740  ;;  %v4532_v30 = vld [vmem:[%s6291_s16 + $0x18] sm:$0xff]  }
 0xa17   : > { %4588 = vpow2.f32 %v2744_v29  ;;  %v2389_v33 = vsel %vm2387_vm8, %v2383_v31, 0  ;;  %v2743_v34 = vsub.f32 %v2733_v0, %v2741_v32  ;;  %4159 = vmatpush3.bf16.msra.mxu1 %v4532_v30 }
 0xa18   : > { %v4583_v35 = vpop.eup %4582  ;;  %4117 = vmatpush3.bf16.msra.mxu0 %v2389_v33  ;;  %4160 = vmatprep.subr.bf16.mxu1 %v5300_v23  ;;  %v4533_v33 = vld [vmem:[%s6291_s16 + $0x10] sm:$0xff]  }
 0xa19   : > { %v2746_v36 = vmul.f32 1.442695, %v2743_v34  ;;  %v2501_v37 = vsel %vm1636_vm3, %v4583_v35, 0.0  ;;  %4128 = vmatprep.subr.bf16.mxu0 %v5300_v23 }
 0xa1a   : > { %2502 = vadd.xlane.f32.xlu0 %v2501_v37 }
 0xa1b   : > { %4590 = vpow2.f32 %v2746_v36  ;;  %4161 = vmatpush3.bf16.msra.mxu1 %v4533_v33  ;;  %v4534_v36 = vld [vmem:[%s6291_s16 + $0x8] sm:$0xff]  }
 0xa1c   : > { %v4585_v38 = vpop.eup %4584  ;;  %4162 = vmatprep.subr.bf16.mxu1 %v5300_v23 }
 0xa1d   : > { %v2623_v39 = vsel %vm1636_vm3, %v4585_v38, 0.0 }
 0xa1e   : > { %2624 = vadd.xlane.f32.xlu1 %v2623_v39 }
 0xa1f   : > { %4163 = vmatpush3.bf16.msra.mxu1 %v4534_v36 }
 0xa20   : > { %v4587_v40 = vpop.eup %4586  ;;  %4164 = vmatprep.subr.bf16.mxu1 %v5300_v23 }
 0xa21   : > { %v2626_v41 = vsel %vm1636_vm3, %v4587_v40, 0.0 }
 0xa22   : > { %2627 = vadd.xlane.f32.xlu0 %v2626_v41 }
 0xa24   : > { %v4589_v42 = vpop.eup %4588 }
 0xa25   : > { %v2748_v43 = vsel %vm1636_vm3, %v4589_v42, 0.0 }
 0xa26   : > { %2749 = vadd.xlane.f32.xlu1 %v2748_v43 }
 0xa28   : > { %v4591_v44 = vpop.eup %4590 }
 0xa29   : > { %v2751_v45 = vsel %vm1636_vm3, %v4591_v44, 0.0 }
 0xa2a   : > { %2752 = vadd.xlane.f32.xlu0 %v2751_v45 }
 0xa30   : > { %v2375_v46 = vpop.xlane.xlu0 %2374 }
 0xa31   : > { %4592 = vrcp.f32 %v2375_v46 }
 0xa37   : > { %2634 = vrot.lane.b32.xlu1 %v5907_v4, %s5314_s15 }
 0xa3b   : > { %2759 = vrot.lane.b32.xlu1 %v5907_v4, %s5311_s10 }
 0xa3e   : > { %v4593_v48 = vpop.eup %4592 }
 0xa3f   : > { %v2379_v51 = vmul.f32 %v4593_v48, %v5955_v8 }
 0xa40   : > { %2509 = vrot.lane.b32.xlu0 %v5907_v4, %s5315_s9 }
 0xa47   : > { %v2372_v47 = vpop.xlane.xlu1 %2371 }
 0xa48   : > { %4594 = vrcp.f32 %v2372_v47 }
 0xa55   : > { %v4595_v49 = vpop.eup %4594 }
 0xa56   : > { %v2378_v50 = vmul.f32 %v4595_v49, %v4579_v11  ;;  %v3867_v49 = vld [vmem:[#allocation11] ss:$0 sm:$0xff] }
 0xa58   : > { %v2380_v52 = vpack.c.bf16 %v2379_v51, %v2378_v50 }
 0xa5a   : > { %4119 = vmatmul.mubr.msk.bf16.vlgmr.msra.gmra.mxu0 %vm1636_vm3, %v2380_v52 }
 0xa5b   : > { %4130 = vmatprep.mubr.msk.bf16.mxu0 %vm5301_vm2, %v5300_v23 }
 0xa9f   : > { %v2500_v55 = vpop.xlane.xlu1 %2499 }
 0xaa3   : > { %v2503_v56 = vpop.xlane.xlu0 %2502 }
 0xaa4   : > { %4596 = vrcp.f32 %v2503_v56 }
 0xaa5   : > { %4598 = vrcp.f32 %v2500_v55 }
 0xaa7   : > { %v2625_v57 = vpop.xlane.xlu1 %2624 }
 0xaa8   : > { %4600 = vrcp.f32 %v2625_v57 }
 0xaab   : > { %v2628_v4 = vpop.xlane.xlu0 %2627 }
 0xaac   : > { %4602 = vrcp.f32 %v2628_v4 }
 0xaaf   : > { %v2750_v58 = vpop.xlane.xlu1 %2749 }
 0xab0   : > { %4604 = vrcp.f32 %v2750_v58 }
 0xab1   : > { %v4597_v59 = vpop.eup %4596 }
 0xab2   : > { %v4599_v61 = vpop.eup %4598  ;;  %v2507_v62 = vmul.f32 %v4597_v59, %v4583_v35 }
 0xab3   : > { %v2753_v60 = vpop.xlane.xlu0 %2752  ;;  %v2506_v2 = vmul.f32 %v4599_v61, %v5960_v28  ;;  %v2635_v3 = vpop.permute.xlu1 %2634 }
 0xab4   : > { %4606 = vrcp.f32 %v2753_v60  ;;  %v2640_v8 = vsel %vm2387_vm8, %v2635_v3, 0  ;;  %v2559_v14 = vadd.f32 %v2507_v62, %v2379_v51  ;;  %v4614_v51 = vld [vmem:[%s6292_s7] sm:$0xff]  ;;  %s6206_s7 = sshll.u32 %s5526_s2, 7 }
 0xab5   : > { %v4601_v63 = vpop.eup %4600  ;;  %v2508_v6 = vpack.c.bf16 %v2507_v62, %v2506_v2  ;;  %v2558_v9 = vadd.f32 %v2506_v2, %v2378_v50  ;;  %v2145_v50 = vadd.f32 %v3867_v49, %v5904_v5 }
 0xab6   : > { %v2631_v53 = vmul.f32 %v4601_v63, %v4585_v38 }
 0xab7   : > { %v2510_v0 = vpop.permute.xlu0 %2509  ;;  %v2760_v17 = vpop.permute.xlu1 %2759  ;;  %v6016_v52 = vadd.f32 %v4614_v51, %v2145_v50 }
 0xab8   : > { %v2515_v1 = vsel %vm2387_vm8, %v2510_v0, 0  ;;  %v2683_v11 = vadd.f32 %v2631_v53, %v2558_v9  ;;  %v2765_v21 = vsel %vm2387_vm8, %v2760_v17, 0 }
 0xab9   : > { %4129 = vmatpush3.bf16.msra.mxu0 %v2515_v1  ;;  %v4603_v7 = vpop.eup %4602  ;;  %v2937_v55 = vsel %vm1391_vm1, %v6016_v52, 0.0 }
 0xaba   : > { %4140 = vmatprep.subr.bf16.mxu0 %v5300_v23  ;;  %v2632_v13 = vmul.f32 %v4603_v7, %v4587_v40  ;;  %v4535_v40 = vld [vmem:[%s6291_s16] sm:$0xff]  }
 0xabb   : > { %4165 = vmatpush3.bf16.msra.mxu1 %v4535_v40 }
 0xabc   : > { %4131 = vmatmul.mubr.msk.bf16.vlgmr.msra.gmra.mxu0 %vm1636_vm3, %v2508_v6  ;;  %v2633_v18 = vpack.c.bf16 %v2632_v13, %v2631_v53  ;;  %v2684_v19 = vadd.f32 %v2632_v13, %v2559_v14  ;;  %4190 = vmatprep.subr.bf16.mxu1 %v5300_v23 }
 0xabd   : > { %v4605_v10 = vpop.eup %4604  ;;  %4141 = vmatpush3.bf16.msra.mxu0 %v2640_v8  ;;  %4142 = vmatprep.mubr.msk.bf16.mxu0 %vm5301_vm2, %v5300_v23  ;;  %v3889_v8 = vld [vmem:[#allocation17] ss:$0 sm:$0xff] }
 0xabe   : > { %4152 = vmatprep.subr.bf16.mxu0 %v5300_v23  ;;  %v2756_v12 = vmul.f32 %v4605_v10, %v4589_v42 }
 0xac0   : > { %v2808_v15 = vadd.f32 %v2756_v12, %v2683_v11 }
 0xac1   : > { %v4607_v16 = vpop.eup %4606 }
 0xac2   : > { %v2757_v54 = vmul.f32 %v4607_v16, %v4591_v44  ;;  %v2916_v20 = vmul.f32 0.25, %v2808_v15 }
 0xac4   : > { %4143 = vmatmul.mubr.msk.bf16.vlgmr.msra.gmra.mxu0 %vm1636_vm3, %v2633_v18  ;;  %v2809_v22 = vadd.f32 %v2757_v54, %v2684_v19  ;;  %3351 = vst.msk [vmem:[%s1384_s28] sm:$0xff] %vm1636_vm3, %v2916_v20  ;;  %v2758_v25 = vpack.c.bf16 %v2757_v54, %v2756_v12  ;;  %v4615_v12 = vld [vmem:[%s5765_s1] sm:$0xff]  ;;  %v4616_v54 = vld [vmem:[%s5765_s1 + $0x8] sm:$0xff]  ;;  %s6293_s1 = sld [smem:[#allocation70_spill]] }
 0xac5   : > { %4153 = vmatpush3.bf16.msra.mxu0 %v2765_v21  ;;  %4154 = vmatprep.mubr.msk.bf16.mxu0 %vm5301_vm2, %v5300_v23 }
 0xac6   : > { %v2917_v24 = vmul.f32 0.25, %v2809_v22  ;;  %4170 = vmatprep.subr.bf16.mxu0 %v5300_v23 }
 0xac8   : > { %3352 = vst.msk [vmem:[%s1384_s28 + $0x8] sm:$0xff] %vm1636_vm3, %v2917_v24  ;;  %s1347_s28 = scalar_lea.vmem [#allocation31], %s5713_s8 }
 0xaca   : > { %v4540_v49 = vld [vmem:[%s6293_s1 + $0x8] sm:$0xff]   ;;  %v4541_v50 = vld [vmem:[%s6293_s1] sm:$0xff]  }
 0xacc   : > { %4155 = vmatmul.mubr.msk.bf16.vlgmr.msra.gmra.mxu0 %vm1636_vm3, %v2758_v25  ;;  %v4536_v25 = vld [vmem:[#allocation22 + $0x8] sm:$0xff]  }
 0xacd   : > { %4174 = vmatprep.mubr.msk.bf16.mxu0 %vm5301_vm2, %v5300_v23  ;;  %4171 = vmatpush3.bf16.msra.mxu0 %v4536_v25 }
 0xace   : > { %4172 = vmatprep.subr.bf16.mxu0 %v5300_v23 }
 0xb1a   : > { %v2425_v26 = vpop.f32.mrf.mxu0 }
 0xb1c   : > { %v4120_v27 = vpop.f32.mrf.mxu0 }
 0xb1e   : > { %v2428_v28 = vpop.f32.mrf.mxu0 }
 0xb20   : > { %v4121_v29 = vpop.f32.mrf.mxu0 }
 0xb7c   : > { %v2551_v31 = vpop.f32.mrf.mxu0 }
 0xb7e   : > { %v4132_v32 = vpop.f32.mrf.mxu0 }
 0xb80   : > { %v2554_v34 = vpop.f32.mrf.mxu0 }
 0xb81   : > { %v4503_v35 = vpack.i.bf16 %v2554_v34, %v2551_v31 }
 0xb82   : > { %v4133_v37 = vpop.f32.mrf.mxu0 }
 0xb83   : > { %4504 = vrot.lane.b32.xlu1 %v4503_v35, %s5311_s10  ;;  %s6294_s10 = sld [smem:[#allocation66_spill]] }
 0xb84   : > { %v2676_v38 = vpop.f32.mrf.mxu0 }
 0xb86   : > { %v4144_v39 = vpop.f32.mrf.mxu0 }
 0xb88   : > { %v2679_v41 = vpop.f32.mrf.mxu0 }
 0xb89   : > { %v4508_v42 = vpack.i.bf16 %v2679_v41, %v2676_v38  ;;  %v3895_v41 = vld [vmem:[#allocation19] ss:$0 sm:$0xff]  ;;  %v4542_v51 = vld [vmem:[%s6294_s10 + $0x18] sm:$0xff]  }
 0xb8a   : > { %v4145_v43 = vpop.f32.mrf.mxu0 }
 0xb8b   : > { %4509 = vrot.lane.b32.xlu0 %v4508_v42, %s5314_s15  ;;  %v3896_v43 = vld [vmem:[#allocation20] ss:$0 sm:$0xff]  ;;  %s6295_s15 = sld [smem:[#allocation68_spill]] }
 0xb8c   : > { %v2801_v44 = vpop.f32.mrf.mxu0 }
 0xb8e   : > { %v4156_v45 = vpop.f32.mrf.mxu0 }
 0xb90   : > { %v2804_v46 = vpop.f32.mrf.mxu0 }
 0xb91   : > { %v4513_v47 = vpack.i.bf16 %v2804_v46, %v2801_v44  ;;  %v4538_v46 = vld [vmem:[%s6293_s1 + $0x18] sm:$0xff]  }
 0xb92   : > { %v4157_v48 = vpop.f32.mrf.mxu0 }
 0xb93   : > { %4514 = vrot.lane.b32.xlu1 %v4513_v47, %s5315_s9  ;;  %v4539_v48 = vld [vmem:[%s6293_s1 + $0x10] sm:$0xff]   ;;  %s6296_s9 = sld [smem:[#allocation72_spill]]  ;;  %s3380_s1 = scalar_lea.hbm %s6297_s3, %s6206_s7 }
 0xb99   : > { %v4551_v25 = vld [vmem:[%s6296_s9 + $0x10] sm:$0xff]  }
 0xbaa   : > { %2938 = vadd.xlane.f32.xlu0 %v2937_v55  ;;  %v4543_v55 = vld [vmem:[%s6294_s10 + $0x10] sm:$0xff]  }
 0xbf5   : > { %v4505_v56 = vpop.permute.xlu1 %4504 }
 0xbf6   : > { %v4507_v4 = vunpack.i.h.bf16 %v4505_v56  ;;  %v4506_v58 = vunpack.i.l.bf16 %v4505_v56  ;;  %v4544_v56 = vld [vmem:[%s6294_s10 + $0x8] sm:$0xff]  }
 0xbf8   : > { %v2835_v62 = vsel %vm1683_vm6, %v2428_v28, %v4507_v4  ;;  %v2834_v5 = vsel %vm1683_vm6, %v2425_v26, %v4506_v58  ;;  %v4537_v26 = vld [vmem:[#allocation22] sm:$0xff]  }
 0xbf9   : > { %4173 = vmatpush3.bf16.msra.mxu0 %v4537_v26  ;;  %v4552_v26 = vld [vmem:[%s6296_s9 + $0x8] sm:$0xff]  }
 0xbfa   : > { %4178 = vmatprep.subr.bf16.mxu0 %v5300_v23 }
 0xbfd   : > { %v4510_v57 = vpop.permute.xlu0 %4509 }
 0xbfe   : > { %v4512_v59 = vunpack.i.h.bf16 %v4510_v57  ;;  %v4511_v60 = vunpack.i.l.bf16 %v4510_v57  ;;  %v4545_v57 = vld [vmem:[%s6294_s10] sm:$0xff]  }
 0xc00   : > { %v2837_v1 = vsel %vm1391_vm1, %v2835_v62, %v4512_v59  ;;  %v2836_v2 = vsel %vm1391_vm1, %v2834_v5, %v4511_v60 }
 0xc05   : > { %v4515_v61 = vpop.permute.xlu1 %4514 }
 0xc06   : > { %v4517_v63 = vunpack.i.h.bf16 %v4515_v61  ;;  %v4516_v0 = vunpack.i.l.bf16 %v4515_v61 }
 0xc08   : > { %v2840_v3 = vsel %vm2838_vm9, %v2837_v1, %v4517_v63  ;;  %v2839_v6 = vsel %vm2838_vm9, %v2836_v2, %v4516_v0  ;;  %v3907_v0 = vld [vmem:[%s6295_s15] ss:$0 sm:$0xff]  ;;  %s3382_s15 = sshll.u32 %s1347_s28, 4  ;;  %s3383_s15 = int_to_ptr.vmem [resolvable:$true] %s3382_s15 }
 0xc09   : > { %v2841_v53 = vpack.c.bf16 %v2840_v3, %v2839_v6  ;;  %v3908_v6 = vld [vmem:[#allocation26] ss:$0 sm:$0xff]  ;;  %s5087_s10 = scalar_lea.vmem %s3383_s15, 128  ;;  %p5094_p3 = scmp.lt.s32.totalorder %s3383_s15, %s5092_s12 }
 0xc0a   : > { %p5088_p8 = scmp.ne.s32.totalorder %s3383_s15, %s5087_s10  ;;  %p5095_p13 = scmp.lt.s32.totalorder %s5093_s13, %s5087_s10 }
 0xc0b   : > { %4167 = vmatmul.mubr.msk.bf16.vlgmr.msra.gmra.mxu1 %vm1422_vm0, %v2841_v53 }
 0xc0c   : > { %4198 = vmatprep.mubr.msk.bf16.mxu1 %vm5301_vm2, %v5300_v23  ;;  %4191 = vmatpush3.bf16.msra.mxu1 %v4538_v46  ;;  %p5089_p1 = pnand %p5088_p8, %p6298_p11  ;;  %p5096_p5 = por %p5095_p13, %p5094_p3 }
 0xc0d   : > { %4192 = vmatprep.subr.bf16.mxu1 %v5300_v23 }
 0xc0e   : > { %p5090_p4 = pneg %p5089_p1 }
 0xc10   : > { %4193 = vmatpush3.bf16.msra.mxu1 %v4539_v48  ;;  %p5097_p2 = pnand %p5096_p5, %p5090_p4 }
 0xc11   : > { %4194 = vmatprep.subr.bf16.mxu1 %v5300_v23 }
 0xc14   : > { %4195 = vmatpush3.bf16.msra.mxu1 %v4540_v49 }
 0xc15   : > { %4196 = vmatprep.subr.bf16.mxu1 %v5300_v23 }
 0xc18   : > { %4197 = vmatpush3.bf16.msra.mxu1 %v4541_v50 }
 0xc33   : > { %v2939_v7 = vpop.xlane.xlu0 %2938 }
 0xc34   : > { %v2940_v10 = vmul.f32 0.03125, %v2939_v7 }
 0xc36   : > { %v2941_v16 = vsub.f32 %v6016_v52, %v2940_v10  ;;  %v3897_v10 = vld [vmem:[#allocation23] ss:$0 sm:$0xff] }
 0xc38   : > { %v2942_v22 = vmul.f32 %v2941_v16, %v2941_v16 }
 0xc3a   : > { %v2943_v24 = vsel %vm1391_vm1, %v2942_v22, 0.0  ;;  %v4549_v22 = vld [vmem:[%s6296_s9 + $0x20] sm:$0xff]  }
 0xccb   : > { %v2909_v9 = vpop.f32.mrf.mxu1 }
 0xccc   : > { %v2910_v13 = vadd.f32 %v3889_v8, %v2909_v9 }
 0xccd   : > { %v4168_v11 = vpop.f32.mrf.mxu1 }
 0xcce   : > { %v6028_v14 = vadd.f32 %v4615_v12, %v2910_v13 }
 0xccf   : > { %v2912_v15 = vpop.f32.mrf.mxu1 }
 0xcd0   : > { %v2913_v17 = vadd.f32 %v3889_v8, %v2912_v15  ;;  %v3131_v18 = vsel %vm1422_vm0, %v6028_v14, 0.0 }
 0xcd1   : > { %3132 = vadd.xlane.f32.xlu1 %v3131_v18  ;;  %v4169_v19 = vpop.f32.mrf.mxu1 }
 0xcd2   : > { %v6034_v20 = vadd.f32 %v4616_v54, %v2913_v17  ;;  %v4546_v17 = vld [vmem:[%s6296_s9 + $0x38] sm:$0xff]   ;;  %v4547_v54 = vld [vmem:[%s6296_s9 + $0x30] sm:$0xff]  }
 0xcd4   : > { %v3134_v21 = vsel %vm1422_vm0, %v6034_v20, 0.0 }
 0xcd5   : > { %3135 = vadd.xlane.f32.xlu0 %v3134_v21  ;;  %v4548_v21 = vld [vmem:[%s6296_s9 + $0x28] sm:$0xff]  }
 0xcd9   : > { %2944 = vadd.xlane.f32.xlu0 %v2943_v24  ;;  %v4550_v24 = vld [vmem:[%s6296_s9 + $0x18] sm:$0xff]  }
 0xd5a   : > { %v3133_v27 = vpop.xlane.xlu1 %3132 }
 0xd5b   : > { %v3137_v28 = vmul.f32 0.015625, %v3133_v27  ;;  %v4553_v27 = vld [vmem:[%s6296_s9] sm:$0xff]   ;;  %s3354_s9 = scalar_lea.sflag [#allocation4], %s5710_s4 }
 0xd5d   : > { %v3139_v29 = vsub.f32 %v6028_v14, %v3137_v28  ;;  %v3909_v28 = vld [vmem:[#allocation28] ss:$0 sm:$0xff] }
 0xd5e   : > { %v3136_v30 = vpop.xlane.xlu0 %3135 }
 0xd5f   : > { %v3138_v31 = vmul.f32 0.015625, %v3136_v30  ;;  %v3141_v32 = vmul.f32 %v3139_v29, %v3139_v29 }
 0xd61   : > { %v3140_v33 = vsub.f32 %v6034_v20, %v3138_v31  ;;  %v3143_v34 = vsel %vm1422_vm0, %v3141_v32, 0.0 }
 0xd62   : > { %3144 = vadd.xlane.f32.xlu0 %v3143_v34  ;;  %v2945_v35 = vpop.xlane.xlu0 %2944 }
 0xd63   : > { %v2946_v36 = vmul.f32 0.03125, %v2945_v35  ;;  %v3142_v37 = vmul.f32 %v3140_v33, %v3140_v33 }
 0xd65   : > { %v2947_v38 = vadd.f32 1e-05, %v2946_v36  ;;  %v3146_v39 = vsel %vm1422_vm0, %v3142_v37, 0.0 }
 0xd66   : > { %3147 = vadd.xlane.f32.xlu1 %v3146_v39 }
 0xd67   : > { %4608 = vrsqrt.f32 %v2947_v38  ;;  %v3901_v38 = vld [vmem:[#allocation25] ss:$0 sm:$0xff] }
 0xd74   : > { %v4609_v40 = vpop.eup %4608 }
 0xd75   : > { %v2949_v42 = vmul.f32 %v4609_v40, %v2941_v16 }
 0xd77   : > { %v2956_v44 = vmul.f32 %v3895_v41, %v2949_v42 }
 0xd79   : > { %v2963_v45 = vadd.f32 %v3896_v43, %v2956_v44 }
 0xd7b   : > { %v2964_v47 = vpack.c.bf16 %v2963_v45, %v2963_v45 }
 0xd7d   : > { %4175 = vmatmul.mubr.msk.bf16.vlgmr.msra.gmra.mxu0 %vm1391_vm1, %v2964_v47 }
 0xd7e   : > { %4186 = vmatprep.mubr.msk.bf16.mxu0 %vm5301_vm2, %v5300_v23  ;;  %4179 = vmatpush3.bf16.msra.mxu0 %v4542_v51 }
 0xd7f   : > { %4180 = vmatprep.subr.bf16.mxu0 %v5300_v23 }
 0xd82   : > { %4181 = vmatpush3.bf16.msra.mxu0 %v4543_v55 }
 0xd83   : > { %4182 = vmatprep.subr.bf16.mxu0 %v5300_v23 }
 0xd86   : > { %4183 = vmatpush3.bf16.msra.mxu0 %v4544_v56 }
 0xd87   : > { %4184 = vmatprep.subr.bf16.mxu0 %v5300_v23 }
 0xd8a   : > { %4185 = vmatpush3.bf16.msra.mxu0 %v4545_v57 }
 0xd8b   : > { %4202 = vmatprep.subr.bf16.mxu0 %v5300_v23 }
 0xdeb   : > { %v3145_v4 = vpop.xlane.xlu0 %3144 }
 0xdec   : > { %v3149_v58 = vmul.f32 0.015625, %v3145_v4 }
 0xdee   : > { %v3151_v59 = vadd.f32 1e-05, %v3149_v58 }
 0xdef   : > { %v3148_v60 = vpop.xlane.xlu1 %3147 }
 0xdf0   : > { %4610 = vrsqrt.f32 %v3151_v59  ;;  %v3150_v61 = vmul.f32 0.015625, %v3148_v60 }
 0xdf2   : > { %v3152_v62 = vadd.f32 1e-05, %v3150_v61 }
 0xdf4   : > { %4612 = vrsqrt.f32 %v3152_v62 }
 0xdfd   : > { %v4611_v5 = vpop.eup %4610 }
 0xdfe   : > { %v3155_v63 = vmul.f32 %v4611_v5, %v3139_v29 }
 0xe00   : > { %v3163_v3 = vmul.f32 %v3907_v0, %v3155_v63 }
 0xe01   : > { %v4613_v1 = vpop.eup %4612 }
 0xe02   : > { %v3156_v2 = vmul.f32 %v4613_v1, %v3140_v33  ;;  %v3171_v7 = vadd.f32 %v3908_v6, %v3163_v3 }
 0xe04   : > { %v3164_v53 = vmul.f32 %v3907_v0, %v3156_v2 }
 0xe06   : > { %v3172_v8 = vadd.f32 %v3908_v6, %v3164_v53 }
 0xe08   : > { %v3173_v9 = vpack.c.bf16 %v3172_v8, %v3171_v7 }
 0xe0a   : > { %4199 = vmatmul.mubr.msk.bf16.vlgmr.msra.gmra.mxu1 %vm1422_vm0, %v3173_v9 }
 0xe3d   : > { %v3020_v13 = vpop.f32.mrf.mxu0 }
 0xe3e   : > { %v3021_v11 = vadd.f32 %v3897_v10, %v3020_v13 }
 0xe3f   : > { %v4176_v12 = vpop.f32.mrf.mxu0 }
 0xe40   : > { %v3026_v15 = vmax.f32 %v3021_v11, 0.0 }
 0xe41   : > { %v3023_v16 = vpop.f32.mrf.mxu0 }
 0xe42   : > { %v3027_v18 = vpack.c.bf16 %v3026_v15, %v3026_v15 }
 0xe43   : > { %v4177_v19 = vpop.f32.mrf.mxu0 }
 0xe44   : > { %4187 = vmatmul.mubr.msk.bf16.vlgmr.msra.gmra.mxu0 %vm1422_vm0, %v3027_v18 }
 0xe45   : > { %4203 = vmatpush3.bf16.msra.mxu0 %v4546_v17  ;;  %4218 = vmatprep.mubr.msk.bf16.mxu0 %vm5301_vm2, %v5300_v23 }
 0xe46   : > { %4204 = vmatprep.subr.bf16.mxu0 %v5300_v23 }
 0xe49   : > { %4205 = vmatpush3.bf16.msra.mxu0 %v4547_v54 }
 0xe4a   : > { %4206 = vmatprep.subr.bf16.mxu0 %v5300_v23 }
 0xe4d   : > { %4207 = vmatpush3.bf16.msra.mxu0 %v4548_v21 }
 0xe4e   : > { %4208 = vmatprep.subr.bf16.mxu0 %v5300_v23 }
 0xe51   : > { %4209 = vmatpush3.bf16.msra.mxu0 %v4549_v22 }
 0xe52   : > { %4210 = vmatprep.subr.bf16.mxu0 %v5300_v23 }
 0xe55   : > { %4211 = vmatpush3.bf16.msra.mxu0 %v4550_v24 }
 0xe56   : > { %4212 = vmatprep.subr.bf16.mxu0 %v5300_v23 }
 0xe59   : > { %4213 = vmatpush3.bf16.msra.mxu0 %v4551_v25 }
 0xe5a   : > { %4214 = vmatprep.subr.bf16.mxu0 %v5300_v23 }
 0xe5d   : > { %4215 = vmatpush3.bf16.msra.mxu0 %v4552_v26 }
 0xe5e   : > { %4216 = vmatprep.subr.bf16.mxu0 %v5300_v23 }
 0xe61   : > { %4217 = vmatpush3.bf16.msra.mxu0 %v4553_v27 }
 0xeca   : > { %v3241_v29 = vpop.f32.mrf.mxu1 }
 0xecb   : > { %v3242_v31 = vadd.f32 %v3909_v28, %v3241_v29 }
 0xecc   : > { %v4200_v30 = vpop.f32.mrf.mxu1 }
 0xecd   : > { %v3248_v35 = vmax.f32 %v3242_v31, 0.0 }
 0xece   : > { %v3244_v32 = vpop.f32.mrf.mxu1 }
 0xecf   : > { %v3245_v33 = vadd.f32 %v3909_v28, %v3244_v32 }
 0xed0   : > { %v4201_v34 = vpop.f32.mrf.mxu1 }
 0xed1   : > { %v3249_v36 = vmax.f32 %v3245_v33, 0.0 }
 0xed3   : > { %v3250_v37 = vpack.c.bf16 %v3249_v36, %v3248_v35 }
 0xed5   : > { %4219 = vmatmul.mubr.bf16.vlgmr.msra.gmra.mxu0 %v3250_v37 }
 0xf04   : > { %v3095_v23 = vpop.f32.mrf.mxu0 }
 0xf05   : > { %v3096_v39 = vadd.f32 %v3901_v38, %v3095_v23 }
 0xf06   : > { %v4188_v40 = vpop.f32.mrf.mxu0 }
 0xf07   : > { %v3101_v41 = vadd.f32 %v3096_v39, %v6016_v52 }
 0xf08   : > { %v3098_v42 = vpop.f32.mrf.mxu0 }
 0xf09   : > { %3102 = vst.msk [vmem:[%s1347_s28] sm:$0xff] %vm1391_vm1, %v3101_v41 }
 0xf0a   : > { %v4189_v43 = vpop.f32.mrf.mxu0 }
 0xf0b   : > { %5100 = shalt.err (!%p5097_p2)
}
 0xf0c   : > { %s5101_s14 = scalar_lea.hbm %s3380_s1, 128  ;;  %s5105_s28 = scalar_lea.hbm %s6297_s3, 256 }
 0xf0d   : > { %p5102_p10 = scmp.ne.s32.totalorder %s3380_s1, %s5101_s14  ;;  %p5106_p0 = scmp.lt.s32.totalorder %s3380_s1, %s6297_s3 }
 0xf0e   : > { %p5107_p7 = scmp.lt.s32.totalorder %s5105_s28, %s5101_s14 }
 0xf0f   : > { %p5103_p6 = pnand %p5102_p10, %p6298_p11 }
 0xf10   : > { %p5108_p9 = por %p5107_p7, %p5106_p0 }
 0xf11   : > { %p5104_p12 = pneg %p5103_p6 }
 0xf13   : > { %p5109_p8 = pnand %p5108_p9, %p5104_p12 }
 0xf15   : > { %5112 = shalt.err (!%p5109_p8)
}
 0xf16   : > { %4292 = dma.vmem_to_hbm [thread:$0]  (%p6298_p11), %s3383_s15, 128, %s3380_s1, %s3354_s9   ;;  %v3915_v52 = vld [vmem:[#allocation29] ss:$0 sm:$0xff] }
 0xf17   : > { %s6299_s13 = sld [smem:[#allocation75_spill]]  ;;  %s3839_s12 = sshll.u32 %s5710_s4, 4 }
 0xf18   : > { %s6300_s11 = sld [smem:[#allocation76_spill]]  ;;  %s3358_s14 = sand.u32 1, %s5526_s2  }
 0xf19   : > { %s3935_s10 = sshll.u32 %s5526_s2, 8  ;;  %s1354_s28 = scalar_lea.vmem [#allocation32], %s3839_s12 }
 0xf1a   : > { %s3395_s7 = sshll.u32 %s1354_s28, 4  ;;  %s6301_s1 = scalar_lea.vmem [#allocation34], %s5713_s8  ;;  %s6110_s7 = int_to_ptr.vmem [resolvable:$true] %s3395_s7 }
 0xf1b   : > { %s3411_s9 = sshll.u32 %s6301_s1, 4  ;;  %s6302_s15 = sshll.u32 %s5526_s2, 7  ;;  %s6117_s9 = int_to_ptr.vmem [resolvable:$true] %s3411_s9 }
 0xf1c   : > { %s6120_s12 = scalar_lea.sflag [#allocation33], %s3358_s14  ;;  %s5113_s8 = scalar_lea.vmem %s6110_s7, 256 }
 0xf1d   : > { %s6107_s4 = scalar_lea.hbm %s6299_s13, %s3935_s10  ;;  %p5114_p1 = scmp.ne.s32.totalorder %s6110_s7, %s5113_s8 }
 0xf1e   : > { %s6115_s3 = scalar_lea.hbm %s6300_s11, %s6302_s15  ;;  %s5317_s10 = smov [#allocation32]  }
 0xf1f   : > { %p5115_p4 = pnand %p5114_p1, %p6298_p11  ;;  %s5117_s1 = sshll.u32 %s5317_s10, 4  ;;  %s5118_s1 = int_to_ptr.vmem [resolvable:$false] %s5117_s1 }
 0xf20   : > { %s5119_s2 = scalar_lea.vmem %s5118_s1, 512  ;;  %p5120_p13 = scmp.lt.s32.totalorder %s6110_s7, %s5118_s1 }
 0xf21   : > { %p5116_p3 = pneg %p5115_p4  ;;  %p5121_p5 = scmp.lt.s32.totalorder %s5119_s2, %s5113_s8 }
 0xf23   : > { %p5122_p2 = por %p5121_p5, %p5120_p13 }
 0xf25   : > { %p5123_p10 = pnand %p5122_p2, %p5116_p3 }
 0xf95   : > { %v3339_v44 = vpop.f32.mrf.mxu0 }
 0xf96   : > { %v3340_v45 = vadd.f32 %v3915_v52, %v3339_v44 }
 0xf97   : > { %v4220_v46 = vpop.f32.mrf.mxu0 }
 0xf98   : > { %v3346_v47 = vadd.f32 %v3340_v45, %v6028_v14 }
 0xf99   : > { %v3342_v48 = vpop.f32.mrf.mxu0 }
 0xf9a   : > { %3348 = vst.msk [vmem:[%s1354_s28] sm:$0xff] %vm1422_vm0, %v3346_v47  ;;  %v3343_v49 = vadd.f32 %v3915_v52, %v3342_v48 }
 0xf9b   : > { %v4221_v50 = vpop.f32.mrf.mxu0 }
 0xf9c   : > { %v3347_v51 = vadd.f32 %v3343_v49, %v6034_v20 }
 0xf9e   : > { %3349 = vst.msk [vmem:[%s1354_s28 + $0x8] sm:$0xff] %vm1422_vm0, %v3347_v51 }
 0xf9f   : > { %5126 = shalt.err (!%p5123_p10)
}
 0xfa0   : > { %s5127_s14 = scalar_lea.hbm %s6107_s4, 256  ;;  %s5131_s28 = scalar_lea.hbm %s6299_s13, 512 }
 0xfa1   : > { %p5128_p6 = scmp.ne.s32.totalorder %s6107_s4, %s5127_s14  ;;  %p5132_p7 = scmp.lt.s32.totalorder %s6107_s4, %s6299_s13 }
 0xfa2   : > { %p5133_p9 = scmp.lt.s32.totalorder %s5131_s28, %s5127_s14 }
 0xfa3   : > { %p5129_p12 = pnand %p5128_p6, %p6298_p11 }
 0xfa4   : > { %p5134_p8 = por %p5133_p9, %p5132_p7 }
 0xfa5   : > { %p5130_p0 = pneg %p5129_p12 }
 0xfa7   : > { %p5135_p1 = pnand %p5134_p8, %p5130_p0 }
 0xfa9   : > { %5138 = shalt.err (!%p5135_p1)
}
 0xfaa   : > { %s5318_s15 = smov 128   ;;  %s6303_s8 = smov 8  }
 0xfab   : > { %4293 = dma.vmem_to_hbm [thread:$0]  (%p6298_p11), %s6110_s7, 256, %s6107_s4, %s6120_s12, %s5318_s15, %s5318_s15, %s6303_s8  }
 0xfac   : > { %s5139_s10 = scalar_lea.vmem %s6117_s9, 128  ;;  %s5319_s1 = smov [#allocation34]  }
 0xfad   : > { %p5140_p4 = scmp.ne.s32.totalorder %s6117_s9, %s5139_s10  ;;  %s5143_s2 = sshll.u32 %s5319_s1, 4  ;;  %s5144_s2 = int_to_ptr.vmem [resolvable:$false] %s5143_s2 }
 0xfae   : > { %s5145_s14 = scalar_lea.vmem %s5144_s2, 256  ;;  %p5146_p5 = scmp.lt.s32.totalorder %s6117_s9, %s5144_s2 }
 0xfaf   : > { %p5141_p3 = pnand %p5140_p4, %p6298_p11  ;;  %p5147_p2 = scmp.lt.s32.totalorder %s5145_s14, %s5139_s10 }
 0xfb1   : > { %p5142_p13 = pneg %p5141_p3  ;;  %p5148_p10 = por %p5147_p2, %p5146_p5 }
 0xfb3   : > { %p5149_p6 = pnand %p5148_p10, %p5142_p13 }
 0xfb5   : > { %5152 = shalt.err (!%p5149_p6)
}
 0xfb6   : > { %s5153_s7 = scalar_lea.hbm %s6115_s3, 128  ;;  %s5157_s4 = scalar_lea.hbm %s6300_s11, 256 }
 0xfb7   : > { %p5154_p12 = scmp.ne.s32.totalorder %s6115_s3, %s5153_s7  ;;  %p5158_p9 = scmp.lt.s32.totalorder %s6115_s3, %s6300_s11 }
 0xfb8   : > { %p5159_p8 = scmp.lt.s32.totalorder %s5157_s4, %s5153_s7 }
 0xfb9   : > { %p5155_p0 = pnand %p5154_p12, %p6298_p11 }
 0xfba   : > { %p5160_p1 = por %p5159_p8, %p5158_p9 }
 0xfbb   : > { %p5156_p7 = pneg %p5155_p0 }
 0xfbd   : > { %p5161_p4 = pnand %p5160_p1, %p5156_p7 }
 0xfbf   : > { %5164 = shalt.err (!%p5161_p4)
}
 0xfc0   : > { %4294 = dma.vmem_to_hbm [thread:$0]  (%p6298_p11), %s6117_s9, 128, %s6115_s3, %s6120_s12  }
 0xfc1 PF: > { %s3426_s28 = sand.u32 1, %s5231_s22   ;;  %p6304_p3 = scmp.ne.s32.totalorder %s6259_s24, 0 }
 0xfc2   : > { %p6305_p13 = scmp.ge.s32.totalorder %s5243_s26, 2  ;;  %s3427_s15 = scalar_lea.sflag [#allocation4], %s3426_s28 }
 0xfc4   : > { %p4355_p5 = pnand %p6305_p13, %p6304_p3 }
 0xfc6   : > { %p4356_p2 = pneg %p4355_p5 }
 0xfc8   : > { %5222 = dma.done.wait (%p4356_p2), %s3427_s15, 128  }
 0xfc9   : > { %5224 = vsyncadd (%p4356_p2), %s3427_s15, 4294967168  ;;  %s6306_s8 = sadd.s32 4294967294, %s5243_s26  }
 0xfca   : > { %s3435_s10 = sand.u32 1, %s6306_s8  }
 0xfcb   : > { %s3436_s6 = scalar_lea.sflag [#allocation33], %s3435_s10 }
 0xfcc   : > { %5226 = dma.done.wait (%p4356_p2), %s3436_s6, 384  }
 0xfcd   : > { %5228 = vsyncadd (%p4356_p2), %s3436_s6, 4294966912  ;;  %p97_p11 = scmp.ge.s32.totalorder %s5657_s5, 4   ;;  %s6307_s22 = smov %s5235_s23 }
 0xfce   : > { %s6308_s23 = smov %s5239_s0  ;;  %s6309_s0 = smov %s5669_s19 }
 0xfcf   : > { %s6310_s26 = smov %s5657_s5  ;;  %99 = sbr.rel (!%p97_p11) target bundleno = 85 (0x55), region = 349 }
 0xfd4   :  { %3458 = vsyncpa [#allocation3], 1 }
 0xfd5   :  { %3460 = vsyncpa [#allocation3 + $0x1], 1 }
 0xfd6   :  { %3461 = vsyncpa [#allocation6], 1 }
 0xfd7   :  { %3462 = vsyncpa [#allocation9], 1 }
 0xfd8   :  { %3463 = vsyncpa [#allocation12], 1 }
 0xfd9   :  { %3464 = vsyncpa [#allocation15], 1 }
 0xfda   :  { %3465 = vsyncpa [#allocation18], 1 }
 0xfdb   :  { %3466 = vsyncpa [#allocation21], 1 }
 0xfdc   :  { %3467 = vsyncpa [#allocation24], 1 }
 0xfdd   :  { %3468 = vsyncpa [#allocation27], 1 }
 0xfde   :  { %3469 = vsyncpa [#allocation30], 1 }
 0xfdf   :  { %3470 = vsyncpa [#allocation4], 1 }
 0xfe0   :  { %3472 = vsyncpa [#allocation4 + $0x1], 1 }
 0xfe1   :  { %3473 = vsyncpa [#allocation33], 1 }
 0xfe2   :  { %3475 = vsyncpa [#allocation33 + $0x1], 1 }

</bundles_post_ra>
